<compile_context>
chip_gen: v6e
topology: v6e:2x2x1
jax: 0.10.0
libtpu: 0.0.40
codegen_flags: <defaults>
</compile_context>

<pallas_src>
import functools

import jax
import jax.numpy as jnp
from jax.experimental import pallas as pl
from jax.experimental.pallas import tpu as pltpu

LEAKY_SLOPE = 0.2   # nn.LeakyReLU(0.2) in the reference coupling net
LANE = 128          # TPU lane width; feature dims are padded to multiples of this


def _softplus(x):
    # numerically-stable softplus, VPU/EUP ops only
    return jnp.maximum(x, 0.0) + jnp.log1p(jnp.exp(-jnp.abs(x)))


def _leaky_relu(x):
    return jnp.where(x > 0, x, LEAKY_SLOPE * x)


def nice_kernel(num_coupling, num_hidden_linears, data_dim,
                x_ref, mask_ref,
                w_in_ref, b_in_ref, w_h_ref, b_h_ref, w_out_ref, b_out_ref,
                s_ref,
                z_ref, ll_ref):
    """One (TB, Dp) batch tile of the NICE forward pass.

    x_ref:    (TB, Dp)  f32        mask_ref: (L, Dp) f32 (padded cols = 1)
    w_in_ref: (L, Dp, Hp) bf16     b_in_ref: (L, 1, Hp) f32
    w_h_ref:  (L*NH, Hp, Hp) bf16  b_h_ref:  (L*NH, 1, Hp) f32
    w_out_ref:(L, Hp, Dp) bf16     b_out_ref:(L, 1, Dp) f32
    s_ref:    (1, Dp) f32 (padded cols = 0)
    z_ref:    (TB, Dp) f32
    ll_ref:   (TB, LANE) f32   log-likelihood broadcast across lanes (col 0 used)
    """
    z = x_ref[...]                                        # (TB, Dp) f32

    # Hoist mask loads and complements out of the matmul chain.
    masks = [mask_ref[pl.ds(l, 1), :] for l in range(num_coupling)]
    inv_masks = [1.0 - m for m in masks]

    for l in range(num_coupling):
        a0 = (z * masks[l]).astype(jnp.bfloat16)          # (TB, Dp) bf16
        h = jnp.dot(a0, w_in_ref[l],
                    preferred_element_type=jnp.float32) + b_in_ref[l]
        h = _leaky_relu(h)
        for k in range(num_hidden_linears):
            idx = l * num_hidden_linears + k
            h = jnp.dot(h.astype(jnp.bfloat16), w_h_ref[idx],
                        preferred_element_type=jnp.float32) + b_h_ref[idx]
            h = _leaky_relu(h)
        t = jnp.dot(h.astype(jnp.bfloat16), w_out_ref[l],
                    preferred_element_type=jnp.float32) + b_out_ref[l]
        z = z + t * inv_masks[l]                          # additive coupling

    # Scaling layer (padded log_scale cols are 0 -> exp = 1, no log-det effect).
    s = s_ref[...]                                        # (1, Dp)
    z = z * jnp.exp(s)
    log_det = jnp.sum(s, axis=1, keepdims=True)           # (1, 1)

    # Logistic prior log-prob, summed over the *real* feature columns only.
    col = jax.lax.broadcasted_iota(jnp.int32, (1, z.shape[1]), 1)
    log_prob = -(_softplus(z) + _softplus(-z))            # (TB, Dp)
    log_prob = jnp.where(col < data_dim, log_prob, 0.0)
    ll = jnp.sum(log_prob, axis=1, keepdims=True) + log_det   # (TB, 1)

    z_ref[...] = z
    ll_ref[...] = jnp.broadcast_to(ll, ll_ref.shape)      # lane-dense unmasked store


def _round_up(n, m):
    return pl.cdiv(n, m) * m


def nice_forward(x, params, *, num_coupling, num_hidden_linears, batch_tile=128):
    """NICE forward: returns (z, log_likelihood) matching the PyTorch module.

    batch_tile: rows per grid step. At realistic H, re-derive it against v7x's
    64 MiB VMEM (weights single-buffered + 2x double-buffered (TB, Dp) tiles +
    live (TB, Hp) activations must fit); 128 is ample at these shapes.
    """
    B, D = x.shape
    H = params["w_in"].shape[-1]
    L = num_coupling
    NH = num_hidden_linears

    Dp = _round_up(D, LANE)
    Hp = _round_up(H, LANE)
    TB = batch_tile
    Bp = _round_up(B, TB)

    f32, bf16 = jnp.float32, jnp.bfloat16

    # Pad to lane-dense shapes (exact: padded weight rows/cols contribute 0,
    # padded mask cols = 1 so (1-m)=0, padded log_scale cols = 0) and cast
    # weights to bf16 for the MXU; biases stay f32 (added post-accumulation).
    x_p    = jnp.zeros((Bp, Dp), f32).at[:B, :D].set(x.astype(f32))
    mask_p = jnp.ones((L, Dp), f32).at[:, :D].set(params["masks"].astype(f32))
    w_in   = jnp.zeros((L, Dp, Hp), bf16).at[:, :D, :H].set(params["w_in"].astype(bf16))
    b_in   = jnp.zeros((L, 1, Hp), f32).at[:, :, :H].set(params["b_in"].astype(f32))
    w_h    = jnp.zeros((L * NH, Hp, Hp), bf16).at[:, :H, :H].set(params["w_h"].astype(bf16))
    b_h    = jnp.zeros((L * NH, 1, Hp), f32).at[:, :, :H].set(params["b_h"].astype(f32))
    w_out  = jnp.zeros((L, Hp, Dp), bf16).at[:, :H, :D].set(params["w_out"].astype(bf16))
    b_out  = jnp.zeros((L, 1, Dp), f32).at[:, :, :D].set(params["b_out"].astype(f32))
    s_p    = jnp.zeros((1, Dp), f32).at[:, :D].set(params["log_scale"].astype(f32))

    kernel = functools.partial(nice_kernel, L, NH, D)

    grid = (Bp // TB,)
    resident3 = lambda i: (0, 0, 0)
    resident2 = lambda i: (0, 0)

    z_p, ll_p = pl.pallas_call(
        kernel,
        out_shape=(jax.ShapeDtypeStruct((Bp, Dp), f32),
                   jax.ShapeDtypeStruct((Bp, LANE), f32)),
        grid=grid,
        in_specs=[
            pl.BlockSpec((TB, Dp), lambda i: (i, 0)),      # x batch tile
            pl.BlockSpec((L, Dp), resident2),              # masks (resident)
            pl.BlockSpec((L, Dp, Hp), resident3),          # w_in
            pl.BlockSpec((L, 1, Hp), resident3),           # b_in
            pl.BlockSpec((L * NH, Hp, Hp), resident3),     # w_h
            pl.BlockSpec((L * NH, 1, Hp), resident3),      # b_h
            pl.BlockSpec((L, Hp, Dp), resident3),          # w_out
            pl.BlockSpec((L, 1, Dp), resident3),           # b_out
            pl.BlockSpec((1, Dp), resident2),              # log_scale
        ],
        out_specs=(
            pl.BlockSpec((TB, Dp), lambda i: (i, 0)),      # z batch tile
            pl.BlockSpec((TB, LANE), lambda i: (i, 0)),    # ll lane-dense slab
        ),
        compiler_params=pltpu.CompilerParams(
            dimension_semantics=("parallel",)),
    )(x_p, mask_p, w_in, b_in, w_h, b_h, w_out, b_out, s_p)

    return z_p[:B, :D], ll_p[:B, 0]


def make_params(key, data_dim, hidden_dim, num_coupling, num_net_layers):
    """Deterministic synthetic parameters matching the module's shapes."""
    num_hidden_linears = num_net_layers - 2
    keys = jax.random.split(key, 8)

    def uni(k, shape, fan_in):
        bound = 1.0 / jnp.sqrt(fan_in)
        return jax.random.uniform(k, shape, jnp.float32, -bound, bound)

    # masks: mask[::2] = 1 ; for even layer index (orientation=True) mask = 1 - mask
    base = jnp.zeros((data_dim,), jnp.float32).at[::2].set(1.0)
    masks = jnp.stack([1.0 - base if (i % 2 == 0) else base
                       for i in range(num_coupling)], axis=0)

    params = {
        "masks": masks,
        "w_in":  uni(keys[0], (num_coupling, data_dim, hidden_dim), data_dim),
        "b_in":  uni(keys[1], (num_coupling, 1, hidden_dim), data_dim),
        "w_h":   uni(keys[2], (num_coupling * num_hidden_linears,
                               hidden_dim, hidden_dim), hidden_dim),
        "b_h":   uni(keys[3], (num_coupling * num_hidden_linears,
                               1, hidden_dim), hidden_dim),
        "w_out": uni(keys[4], (num_coupling, hidden_dim, data_dim), hidden_dim),
        "b_out": uni(keys[5], (num_coupling, 1, data_dim), hidden_dim),
        "log_scale": jax.random.normal(keys[6], (1, data_dim), jnp.float32),
    }
    return params, num_hidden_linears


def nice_forward_ref(x, params, *, num_coupling, num_hidden_linears):
    """Plain-JAX reference with the same bf16-weight / f32-accumulate contract."""
    bf16 = jnp.bfloat16
    z = x.astype(jnp.float32)
    for l in range(num_coupling):
        m = params["masks"][l][None, :]
        h = jnp.dot((z * m).astype(bf16), params["w_in"][l].astype(bf16),
                    preferred_element_type=jnp.float32) + params["b_in"][l]
        h = jax.nn.leaky_relu(h, LEAKY_SLOPE)
        for k in range(num_hidden_linears):
            idx = l * num_hidden_linears + k
            h = jnp.dot(h.astype(bf16), params["w_h"][idx].astype(bf16),
                        preferred_element_type=jnp.float32) + params["b_h"][idx]
            h = jax.nn.leaky_relu(h, LEAKY_SLOPE)
        t = jnp.dot(h.astype(bf16), params["w_out"][l].astype(bf16),
                    preferred_element_type=jnp.float32) + params["b_out"][l]
        z = z + t * (1.0 - m)
    s = params["log_scale"]
    z = z * jnp.exp(s)
    log_det = jnp.sum(s)
    log_prob = -(jax.nn.softplus(z) + jax.nn.softplus(-z))
    return z, jnp.sum(log_prob, axis=1) + log_det


# TODO(synk): the invert=True path (f_inverse) and sample() are not implemented;
# only the default forward (z, log_likelihood) is translated.

if __name__ == "__main__":
    DATA_DIM = 16
    HIDDEN_DIM = 32          # cfg['NUM_HIDDEN_UNITS'] (small synthetic value)
    NUM_COUPLING = 3
    NUM_NET_LAYERS = 4       # cfg['NUM_NET_LAYERS'] (small synthetic value)
    BATCH = 200              # non-multiple of the 128-row batch tile (exercises padding + grid of 2)

    key = jax.random.PRNGKey(0)
    pkey, xkey = jax.random.split(key)
    params, num_hidden_linears = make_params(
        pkey, DATA_DIM, HIDDEN_DIM, NUM_COUPLING, NUM_NET_LAYERS)
    x = jax.random.normal(xkey, (BATCH, DATA_DIM), jnp.float32)

    z, log_likelihood = nice_forward(
        x, params, num_coupling=NUM_COUPLING,
        num_hidden_linears=num_hidden_linears)
    jax.block_until_ready((z, log_likelihood))

    z_ref, ll_ref = nice_forward_ref(
        x, params, num_coupling=NUM_COUPLING,
        num_hidden_linears=num_hidden_linears)

    assert z.shape == (BATCH, DATA_DIM)
    assert log_likelihood.shape == (BATCH,)
    assert jnp.allclose(z, z_ref, atol=1e-3, rtol=1e-3)
    assert jnp.allclose(log_likelihood, ll_ref, atol=1e-3, rtol=1e-3)

    print("KERNEL_OK")
</pallas_src>

<mosaic_0001>
module attributes {stable_mosaic.version = 11 : i64} {
  func.func @nice_kernel(%arg0: i32, %arg1: memref<128x128xf32, #tpu.memory_space<vmem>>, %arg2: memref<3x128xf32, #tpu.memory_space<vmem>>, %arg3: memref<3x128x128xbf16, #tpu.memory_space<vmem>>, %arg4: memref<3x1x128xf32, #tpu.memory_space<vmem>>, %arg5: memref<6x128x128xbf16, #tpu.memory_space<vmem>>, %arg6: memref<6x1x128xf32, #tpu.memory_space<vmem>>, %arg7: memref<3x128x128xbf16, #tpu.memory_space<vmem>>, %arg8: memref<3x1x128xf32, #tpu.memory_space<vmem>>, %arg9: memref<1x128xf32, #tpu.memory_space<vmem>>, %arg10: memref<128x128xf32, #tpu.memory_space<vmem>>, %arg11: memref<128x128xf32, #tpu.memory_space<vmem>>) attributes {dimension_semantics = [#tpu.dimension_semantics<parallel>], iteration_bounds = array<i64: 2>, scalar_prefetch = 0 : i64, scratch_operands = 0 : i64, tpu.core_type = #tpu.core_type<tc>, window_params = [{transform_indices = @transform_0, window_bounds = array<i64: 128, 128>}, {pipeline_mode = #tpu.pipeline_mode<synchronous>, transform_indices = @transform_1, window_bounds = array<i64: 3, 128>}, {pipeline_mode = #tpu.pipeline_mode<synchronous>, transform_indices = @transform_2, window_bounds = array<i64: 3, 128, 128>}, {pipeline_mode = #tpu.pipeline_mode<synchronous>, transform_indices = @transform_3, window_bounds = array<i64: 3, 1, 128>}, {pipeline_mode = #tpu.pipeline_mode<synchronous>, transform_indices = @transform_4, window_bounds = array<i64: 6, 128, 128>}, {pipeline_mode = #tpu.pipeline_mode<synchronous>, transform_indices = @transform_5, window_bounds = array<i64: 6, 1, 128>}, {pipeline_mode = #tpu.pipeline_mode<synchronous>, transform_indices = @transform_6, window_bounds = array<i64: 3, 128, 128>}, {pipeline_mode = #tpu.pipeline_mode<synchronous>, transform_indices = @transform_7, window_bounds = array<i64: 3, 1, 128>}, {pipeline_mode = #tpu.pipeline_mode<synchronous>, transform_indices = @transform_8, window_bounds = array<i64: 1, 128>}, {transform_indices = @transform_9, window_bounds = array<i64: 128, 128>}, {transform_indices = @transform_10, window_bounds = array<i64: 128, 128>}]} {
    %c0 = arith.constant 0 : index
    %c0_0 = arith.constant 0 : index
    %0 = vector.load %arg1[%c0, %c0_0] : memref<128x128xf32, #tpu.memory_space<vmem>>, vector<128x128xf32>
    %c0_1 = arith.constant 0 : index
    %c0_2 = arith.constant 0 : index
    %1 = vector.load %arg2[%c0_1, %c0_2] : memref<3x128xf32, #tpu.memory_space<vmem>>, vector<1x128xf32>
    %c1 = arith.constant 1 : index
    %c0_3 = arith.constant 0 : index
    %2 = vector.load %arg2[%c1, %c0_3] : memref<3x128xf32, #tpu.memory_space<vmem>>, vector<1x128xf32>
    %c2 = arith.constant 2 : index
    %c0_4 = arith.constant 0 : index
    %3 = vector.load %arg2[%c2, %c0_4] : memref<3x128xf32, #tpu.memory_space<vmem>>, vector<1x128xf32>
    %cst = arith.constant 1.000000e+00 : f32
    %4 = vector.broadcast %cst : f32 to vector<1x128xf32>
    %5 = arith.subf %4, %1 : vector<1x128xf32>
    %cst_5 = arith.constant 1.000000e+00 : f32
    %6 = vector.broadcast %cst_5 : f32 to vector<1x128xf32>
    %7 = arith.subf %6, %2 : vector<1x128xf32>
    %cst_6 = arith.constant 1.000000e+00 : f32
    %8 = vector.broadcast %cst_6 : f32 to vector<1x128xf32>
    %9 = arith.subf %8, %3 : vector<1x128xf32>
    %10 = vector.broadcast %1 : vector<1x128xf32> to vector<128x128xf32>
    %11 = arith.mulf %0, %10 : vector<128x128xf32>
    %12 = arith.truncf %11 : vector<128x128xf32> to vector<128x128xbf16>
    %c0_7 = arith.constant 0 : index
    %c0_8 = arith.constant 0 : index
    %c0_9 = arith.constant 0 : index
    %13 = vector.load %arg3[%c0_7, %c0_8, %c0_9] : memref<3x128x128xbf16, #tpu.memory_space<vmem>>, vector<1x128x128xbf16>
    %14 = vector.shape_cast %13 : vector<1x128x128xbf16> to vector<128x128xbf16>
    %cst_10 = arith.constant dense<0.000000e+00> : vector<128x128xf32>
    %15 = tpu.matmul %12, %14, %cst_10 {dimension_numbers = #tpu.dot_dimension_numbers<[1], [0], [0], [1], [0, 0, 1, 1], [], []>} : vector<128x128xbf16>, vector<128x128xbf16>, vector<128x128xf32> -> vector<128x128xf32>
    %c0_11 = arith.constant 0 : index
    %c0_12 = arith.constant 0 : index
    %c0_13 = arith.constant 0 : index
    %16 = vector.load %arg4[%c0_11, %c0_12, %c0_13] : memref<3x1x128xf32, #tpu.memory_space<vmem>>, vector<1x1x128xf32>
    %17 = vector.shape_cast %16 : vector<1x1x128xf32> to vector<1x128xf32>
    %18 = vector.broadcast %17 : vector<1x128xf32> to vector<128x128xf32>
    %19 = arith.addf %15, %18 : vector<128x128xf32>
    %cst_14 = arith.constant 0.000000e+00 : f32
    %20 = vector.broadcast %cst_14 : f32 to vector<128x128xf32>
    %21 = arith.cmpf ogt, %19, %20 : vector<128x128xf32>
    %cst_15 = arith.constant 2.000000e-01 : f32
    %22 = vector.broadcast %cst_15 : f32 to vector<128x128xf32>
    %23 = arith.mulf %22, %19 : vector<128x128xf32>
    %24 = arith.select %21, %19, %23 : vector<128x128xi1>, vector<128x128xf32>
    %25 = arith.truncf %24 : vector<128x128xf32> to vector<128x128xbf16>
    %c0_16 = arith.constant 0 : index
    %c0_17 = arith.constant 0 : index
    %c0_18 = arith.constant 0 : index
    %26 = vector.load %arg5[%c0_16, %c0_17, %c0_18] : memref<6x128x128xbf16, #tpu.memory_space<vmem>>, vector<1x128x128xbf16>
    %27 = vector.shape_cast %26 : vector<1x128x128xbf16> to vector<128x128xbf16>
    %cst_19 = arith.constant dense<0.000000e+00> : vector<128x128xf32>
    %28 = tpu.matmul %25, %27, %cst_19 {dimension_numbers = #tpu.dot_dimension_numbers<[1], [0], [0], [1], [0, 0, 1, 1], [], []>} : vector<128x128xbf16>, vector<128x128xbf16>, vector<128x128xf32> -> vector<128x128xf32>
    %c0_20 = arith.constant 0 : index
    %c0_21 = arith.constant 0 : index
    %c0_22 = arith.constant 0 : index
    %29 = vector.load %arg6[%c0_20, %c0_21, %c0_22] : memref<6x1x128xf32, #tpu.memory_space<vmem>>, vector<1x1x128xf32>
    %30 = vector.shape_cast %29 : vector<1x1x128xf32> to vector<1x128xf32>
    %31 = vector.broadcast %30 : vector<1x128xf32> to vector<128x128xf32>
    %32 = arith.addf %28, %31 : vector<128x128xf32>
    %cst_23 = arith.constant 0.000000e+00 : f32
    %33 = vector.broadcast %cst_23 : f32 to vector<128x128xf32>
    %34 = arith.cmpf ogt, %32, %33 : vector<128x128xf32>
    %cst_24 = arith.constant 2.000000e-01 : f32
    %35 = vector.broadcast %cst_24 : f32 to vector<128x128xf32>
    %36 = arith.mulf %35, %32 : vector<128x128xf32>
    %37 = arith.select %34, %32, %36 : vector<128x128xi1>, vector<128x128xf32>
    %38 = arith.truncf %37 : vector<128x128xf32> to vector<128x128xbf16>
    %c1_25 = arith.constant 1 : index
    %c0_26 = arith.constant 0 : index
    %c0_27 = arith.constant 0 : index
    %39 = vector.load %arg5[%c1_25, %c0_26, %c0_27] : memref<6x128x128xbf16, #tpu.memory_space<vmem>>, vector<1x128x128xbf16>
    %40 = vector.shape_cast %39 : vector<1x128x128xbf16> to vector<128x128xbf16>
    %cst_28 = arith.constant dense<0.000000e+00> : vector<128x128xf32>
    %41 = tpu.matmul %38, %40, %cst_28 {dimension_numbers = #tpu.dot_dimension_numbers<[1], [0], [0], [1], [0, 0, 1, 1], [], []>} : vector<128x128xbf16>, vector<128x128xbf16>, vector<128x128xf32> -> vector<128x128xf32>
    %c1_29 = arith.constant 1 : index
    %c0_30 = arith.constant 0 : index
    %c0_31 = arith.constant 0 : index
    %42 = vector.load %arg6[%c1_29, %c0_30, %c0_31] : memref<6x1x128xf32, #tpu.memory_space<vmem>>, vector<1x1x128xf32>
    %43 = vector.shape_cast %42 : vector<1x1x128xf32> to vector<1x128xf32>
    %44 = vector.broadcast %43 : vector<1x128xf32> to vector<128x128xf32>
    %45 = arith.addf %41, %44 : vector<128x128xf32>
    %cst_32 = arith.constant 0.000000e+00 : f32
    %46 = vector.broadcast %cst_32 : f32 to vector<128x128xf32>
    %47 = arith.cmpf ogt, %45, %46 : vector<128x128xf32>
    %cst_33 = arith.constant 2.000000e-01 : f32
    %48 = vector.broadcast %cst_33 : f32 to vector<128x128xf32>
    %49 = arith.mulf %48, %45 : vector<128x128xf32>
    %50 = arith.select %47, %45, %49 : vector<128x128xi1>, vector<128x128xf32>
    %51 = arith.truncf %50 : vector<128x128xf32> to vector<128x128xbf16>
    %c0_34 = arith.constant 0 : index
    %c0_35 = arith.constant 0 : index
    %c0_36 = arith.constant 0 : index
    %52 = vector.load %arg7[%c0_34, %c0_35, %c0_36] : memref<3x128x128xbf16, #tpu.memory_space<vmem>>, vector<1x128x128xbf16>
    %53 = vector.shape_cast %52 : vector<1x128x128xbf16> to vector<128x128xbf16>
    %cst_37 = arith.constant dense<0.000000e+00> : vector<128x128xf32>
    %54 = tpu.matmul %51, %53, %cst_37 {dimension_numbers = #tpu.dot_dimension_numbers<[1], [0], [0], [1], [0, 0, 1, 1], [], []>} : vector<128x128xbf16>, vector<128x128xbf16>, vector<128x128xf32> -> vector<128x128xf32>
    %c0_38 = arith.constant 0 : index
    %c0_39 = arith.constant 0 : index
    %c0_40 = arith.constant 0 : index
    %55 = vector.load %arg8[%c0_38, %c0_39, %c0_40] : memref<3x1x128xf32, #tpu.memory_space<vmem>>, vector<1x1x128xf32>
    %56 = vector.shape_cast %55 : vector<1x1x128xf32> to vector<1x128xf32>
    %57 = vector.broadcast %56 : vector<1x128xf32> to vector<128x128xf32>
    %58 = arith.addf %54, %57 : vector<128x128xf32>
    %59 = vector.broadcast %5 : vector<1x128xf32> to vector<128x128xf32>
    %60 = arith.mulf %58, %59 : vector<128x128xf32>
    %61 = arith.addf %0, %60 : vector<128x128xf32>
    %62 = vector.broadcast %2 : vector<1x128xf32> to vector<128x128xf32>
    %63 = arith.mulf %61, %62 : vector<128x128xf32>
    %64 = arith.truncf %63 : vector<128x128xf32> to vector<128x128xbf16>
    %c1_41 = arith.constant 1 : index
    %c0_42 = arith.constant 0 : index
    %c0_43 = arith.constant 0 : index
    %65 = vector.load %arg3[%c1_41, %c0_42, %c0_43] : memref<3x128x128xbf16, #tpu.memory_space<vmem>>, vector<1x128x128xbf16>
    %66 = vector.shape_cast %65 : vector<1x128x128xbf16> to vector<128x128xbf16>
    %cst_44 = arith.constant dense<0.000000e+00> : vector<128x128xf32>
    %67 = tpu.matmul %64, %66, %cst_44 {dimension_numbers = #tpu.dot_dimension_numbers<[1], [0], [0], [1], [0, 0, 1, 1], [], []>} : vector<128x128xbf16>, vector<128x128xbf16>, vector<128x128xf32> -> vector<128x128xf32>
    %c1_45 = arith.constant 1 : index
    %c0_46 = arith.constant 0 : index
    %c0_47 = arith.constant 0 : index
    %68 = vector.load %arg4[%c1_45, %c0_46, %c0_47] : memref<3x1x128xf32, #tpu.memory_space<vmem>>, vector<1x1x128xf32>
    %69 = vector.shape_cast %68 : vector<1x1x128xf32> to vector<1x128xf32>
    %70 = vector.broadcast %69 : vector<1x128xf32> to vector<128x128xf32>
    %71 = arith.addf %67, %70 : vector<128x128xf32>
    %cst_48 = arith.constant 0.000000e+00 : f32
    %72 = vector.broadcast %cst_48 : f32 to vector<128x128xf32>
    %73 = arith.cmpf ogt, %71, %72 : vector<128x128xf32>
    %cst_49 = arith.constant 2.000000e-01 : f32
    %74 = vector.broadcast %cst_49 : f32 to vector<128x128xf32>
    %75 = arith.mulf %74, %71 : vector<128x128xf32>
    %76 = arith.select %73, %71, %75 : vector<128x128xi1>, vector<128x128xf32>
    %77 = arith.truncf %76 : vector<128x128xf32> to vector<128x128xbf16>
    %c2_50 = arith.constant 2 : index
    %c0_51 = arith.constant 0 : index
    %c0_52 = arith.constant 0 : index
    %78 = vector.load %arg5[%c2_50, %c0_51, %c0_52] : memref<6x128x128xbf16, #tpu.memory_space<vmem>>, vector<1x128x128xbf16>
    %79 = vector.shape_cast %78 : vector<1x128x128xbf16> to vector<128x128xbf16>
    %cst_53 = arith.constant dense<0.000000e+00> : vector<128x128xf32>
    %80 = tpu.matmul %77, %79, %cst_53 {dimension_numbers = #tpu.dot_dimension_numbers<[1], [0], [0], [1], [0, 0, 1, 1], [], []>} : vector<128x128xbf16>, vector<128x128xbf16>, vector<128x128xf32> -> vector<128x128xf32>
    %c2_54 = arith.constant 2 : index
    %c0_55 = arith.constant 0 : index
    %c0_56 = arith.constant 0 : index
    %81 = vector.load %arg6[%c2_54, %c0_55, %c0_56] : memref<6x1x128xf32, #tpu.memory_space<vmem>>, vector<1x1x128xf32>
    %82 = vector.shape_cast %81 : vector<1x1x128xf32> to vector<1x128xf32>
    %83 = vector.broadcast %82 : vector<1x128xf32> to vector<128x128xf32>
    %84 = arith.addf %80, %83 : vector<128x128xf32>
    %cst_57 = arith.constant 0.000000e+00 : f32
    %85 = vector.broadcast %cst_57 : f32 to vector<128x128xf32>
    %86 = arith.cmpf ogt, %84, %85 : vector<128x128xf32>
    %cst_58 = arith.constant 2.000000e-01 : f32
    %87 = vector.broadcast %cst_58 : f32 to vector<128x128xf32>
    %88 = arith.mulf %87, %84 : vector<128x128xf32>
    %89 = arith.select %86, %84, %88 : vector<128x128xi1>, vector<128x128xf32>
    %90 = arith.truncf %89 : vector<128x128xf32> to vector<128x128xbf16>
    %c3 = arith.constant 3 : index
    %c0_59 = arith.constant 0 : index
    %c0_60 = arith.constant 0 : index
    %91 = vector.load %arg5[%c3, %c0_59, %c0_60] : memref<6x128x128xbf16, #tpu.memory_space<vmem>>, vector<1x128x128xbf16>
    %92 = vector.shape_cast %91 : vector<1x128x128xbf16> to vector<128x128xbf16>
    %cst_61 = arith.constant dense<0.000000e+00> : vector<128x128xf32>
    %93 = tpu.matmul %90, %92, %cst_61 {dimension_numbers = #tpu.dot_dimension_numbers<[1], [0], [0], [1], [0, 0, 1, 1], [], []>} : vector<128x128xbf16>, vector<128x128xbf16>, vector<128x128xf32> -> vector<128x128xf32>
    %c3_62 = arith.constant 3 : index
    %c0_63 = arith.constant 0 : index
    %c0_64 = arith.constant 0 : index
    %94 = vector.load %arg6[%c3_62, %c0_63, %c0_64] : memref<6x1x128xf32, #tpu.memory_space<vmem>>, vector<1x1x128xf32>
    %95 = vector.shape_cast %94 : vector<1x1x128xf32> to vector<1x128xf32>
    %96 = vector.broadcast %95 : vector<1x128xf32> to vector<128x128xf32>
    %97 = arith.addf %93, %96 : vector<128x128xf32>
    %cst_65 = arith.constant 0.000000e+00 : f32
    %98 = vector.broadcast %cst_65 : f32 to vector<128x128xf32>
    %99 = arith.cmpf ogt, %97, %98 : vector<128x128xf32>
    %cst_66 = arith.constant 2.000000e-01 : f32
    %100 = vector.broadcast %cst_66 : f32 to vector<128x128xf32>
    %101 = arith.mulf %100, %97 : vector<128x128xf32>
    %102 = arith.select %99, %97, %101 : vector<128x128xi1>, vector<128x128xf32>
    %103 = arith.truncf %102 : vector<128x128xf32> to vector<128x128xbf16>
    %c1_67 = arith.constant 1 : index
    %c0_68 = arith.constant 0 : index
    %c0_69 = arith.constant 0 : index
    %104 = vector.load %arg7[%c1_67, %c0_68, %c0_69] : memref<3x128x128xbf16, #tpu.memory_space<vmem>>, vector<1x128x128xbf16>
    %105 = vector.shape_cast %104 : vector<1x128x128xbf16> to vector<128x128xbf16>
    %cst_70 = arith.constant dense<0.000000e+00> : vector<128x128xf32>
    %106 = tpu.matmul %103, %105, %cst_70 {dimension_numbers = #tpu.dot_dimension_numbers<[1], [0], [0], [1], [0, 0, 1, 1], [], []>} : vector<128x128xbf16>, vector<128x128xbf16>, vector<128x128xf32> -> vector<128x128xf32>
    %c1_71 = arith.constant 1 : index
    %c0_72 = arith.constant 0 : index
    %c0_73 = arith.constant 0 : index
    %107 = vector.load %arg8[%c1_71, %c0_72, %c0_73] : memref<3x1x128xf32, #tpu.memory_space<vmem>>, vector<1x1x128xf32>
    %108 = vector.shape_cast %107 : vector<1x1x128xf32> to vector<1x128xf32>
    %109 = vector.broadcast %108 : vector<1x128xf32> to vector<128x128xf32>
    %110 = arith.addf %106, %109 : vector<128x128xf32>
    %111 = vector.broadcast %7 : vector<1x128xf32> to vector<128x128xf32>
    %112 = arith.mulf %110, %111 : vector<128x128xf32>
    %113 = arith.addf %61, %112 : vector<128x128xf32>
    %114 = vector.broadcast %3 : vector<1x128xf32> to vector<128x128xf32>
    %115 = arith.mulf %113, %114 : vector<128x128xf32>
    %116 = arith.truncf %115 : vector<128x128xf32> to vector<128x128xbf16>
    %c2_74 = arith.constant 2 : index
    %c0_75 = arith.constant 0 : index
    %c0_76 = arith.constant 0 : index
    %117 = vector.load %arg3[%c2_74, %c0_75, %c0_76] : memref<3x128x128xbf16, #tpu.memory_space<vmem>>, vector<1x128x128xbf16>
    %118 = vector.shape_cast %117 : vector<1x128x128xbf16> to vector<128x128xbf16>
    %cst_77 = arith.constant dense<0.000000e+00> : vector<128x128xf32>
    %119 = tpu.matmul %116, %118, %cst_77 {dimension_numbers = #tpu.dot_dimension_numbers<[1], [0], [0], [1], [0, 0, 1, 1], [], []>} : vector<128x128xbf16>, vector<128x128xbf16>, vector<128x128xf32> -> vector<128x128xf32>
    %c2_78 = arith.constant 2 : index
    %c0_79 = arith.constant 0 : index
    %c0_80 = arith.constant 0 : index
    %120 = vector.load %arg4[%c2_78, %c0_79, %c0_80] : memref<3x1x128xf32, #tpu.memory_space<vmem>>, vector<1x1x128xf32>
    %121 = vector.shape_cast %120 : vector<1x1x128xf32> to vector<1x128xf32>
    %122 = vector.broadcast %121 : vector<1x128xf32> to vector<128x128xf32>
    %123 = arith.addf %119, %122 : vector<128x128xf32>
    %cst_81 = arith.constant 0.000000e+00 : f32
    %124 = vector.broadcast %cst_81 : f32 to vector<128x128xf32>
    %125 = arith.cmpf ogt, %123, %124 : vector<128x128xf32>
    %cst_82 = arith.constant 2.000000e-01 : f32
    %126 = vector.broadcast %cst_82 : f32 to vector<128x128xf32>
    %127 = arith.mulf %126, %123 : vector<128x128xf32>
    %128 = arith.select %125, %123, %127 : vector<128x128xi1>, vector<128x128xf32>
    %129 = arith.truncf %128 : vector<128x128xf32> to vector<128x128xbf16>
    %c4 = arith.constant 4 : index
    %c0_83 = arith.constant 0 : index
    %c0_84 = arith.constant 0 : index
    %130 = vector.load %arg5[%c4, %c0_83, %c0_84] : memref<6x128x128xbf16, #tpu.memory_space<vmem>>, vector<1x128x128xbf16>
    %131 = vector.shape_cast %130 : vector<1x128x128xbf16> to vector<128x128xbf16>
    %cst_85 = arith.constant dense<0.000000e+00> : vector<128x128xf32>
    %132 = tpu.matmul %129, %131, %cst_85 {dimension_numbers = #tpu.dot_dimension_numbers<[1], [0], [0], [1], [0, 0, 1, 1], [], []>} : vector<128x128xbf16>, vector<128x128xbf16>, vector<128x128xf32> -> vector<128x128xf32>
    %c4_86 = arith.constant 4 : index
    %c0_87 = arith.constant 0 : index
    %c0_88 = arith.constant 0 : index
    %133 = vector.load %arg6[%c4_86, %c0_87, %c0_88] : memref<6x1x128xf32, #tpu.memory_space<vmem>>, vector<1x1x128xf32>
    %134 = vector.shape_cast %133 : vector<1x1x128xf32> to vector<1x128xf32>
    %135 = vector.broadcast %134 : vector<1x128xf32> to vector<128x128xf32>
    %136 = arith.addf %132, %135 : vector<128x128xf32>
    %cst_89 = arith.constant 0.000000e+00 : f32
    %137 = vector.broadcast %cst_89 : f32 to vector<128x128xf32>
    %138 = arith.cmpf ogt, %136, %137 : vector<128x128xf32>
    %cst_90 = arith.constant 2.000000e-01 : f32
    %139 = vector.broadcast %cst_90 : f32 to vector<128x128xf32>
    %140 = arith.mulf %139, %136 : vector<128x128xf32>
    %141 = arith.select %138, %136, %140 : vector<128x128xi1>, vector<128x128xf32>
    %142 = arith.truncf %141 : vector<128x128xf32> to vector<128x128xbf16>
    %c5 = arith.constant 5 : index
    %c0_91 = arith.constant 0 : index
    %c0_92 = arith.constant 0 : index
    %143 = vector.load %arg5[%c5, %c0_91, %c0_92] : memref<6x128x128xbf16, #tpu.memory_space<vmem>>, vector<1x128x128xbf16>
    %144 = vector.shape_cast %143 : vector<1x128x128xbf16> to vector<128x128xbf16>
    %cst_93 = arith.constant dense<0.000000e+00> : vector<128x128xf32>
    %145 = tpu.matmul %142, %144, %cst_93 {dimension_numbers = #tpu.dot_dimension_numbers<[1], [0], [0], [1], [0, 0, 1, 1], [], []>} : vector<128x128xbf16>, vector<128x128xbf16>, vector<128x128xf32> -> vector<128x128xf32>
    %c5_94 = arith.constant 5 : index
    %c0_95 = arith.constant 0 : index
    %c0_96 = arith.constant 0 : index
    %146 = vector.load %arg6[%c5_94, %c0_95, %c0_96] : memref<6x1x128xf32, #tpu.memory_space<vmem>>, vector<1x1x128xf32>
    %147 = vector.shape_cast %146 : vector<1x1x128xf32> to vector<1x128xf32>
    %148 = vector.broadcast %147 : vector<1x128xf32> to vector<128x128xf32>
    %149 = arith.addf %145, %148 : vector<128x128xf32>
    %cst_97 = arith.constant 0.000000e+00 : f32
    %150 = vector.broadcast %cst_97 : f32 to vector<128x128xf32>
    %151 = arith.cmpf ogt, %149, %150 : vector<128x128xf32>
    %cst_98 = arith.constant 2.000000e-01 : f32
    %152 = vector.broadcast %cst_98 : f32 to vector<128x128xf32>
    %153 = arith.mulf %152, %149 : vector<128x128xf32>
    %154 = arith.select %151, %149, %153 : vector<128x128xi1>, vector<128x128xf32>
    %155 = arith.truncf %154 : vector<128x128xf32> to vector<128x128xbf16>
    %c2_99 = arith.constant 2 : index
    %c0_100 = arith.constant 0 : index
    %c0_101 = arith.constant 0 : index
    %156 = vector.load %arg7[%c2_99, %c0_100, %c0_101] : memref<3x128x128xbf16, #tpu.memory_space<vmem>>, vector<1x128x128xbf16>
    %157 = vector.shape_cast %156 : vector<1x128x128xbf16> to vector<128x128xbf16>
    %cst_102 = arith.constant dense<0.000000e+00> : vector<128x128xf32>
    %158 = tpu.matmul %155, %157, %cst_102 {dimension_numbers = #tpu.dot_dimension_numbers<[1], [0], [0], [1], [0, 0, 1, 1], [], []>} : vector<128x128xbf16>, vector<128x128xbf16>, vector<128x128xf32> -> vector<128x128xf32>
    %c2_103 = arith.constant 2 : index
    %c0_104 = arith.constant 0 : index
    %c0_105 = arith.constant 0 : index
    %159 = vector.load %arg8[%c2_103, %c0_104, %c0_105] : memref<3x1x128xf32, #tpu.memory_space<vmem>>, vector<1x1x128xf32>
    %160 = vector.shape_cast %159 : vector<1x1x128xf32> to vector<1x128xf32>
    %161 = vector.broadcast %160 : vector<1x128xf32> to vector<128x128xf32>
    %162 = arith.addf %158, %161 : vector<128x128xf32>
    %163 = vector.broadcast %9 : vector<1x128xf32> to vector<128x128xf32>
    %164 = arith.mulf %162, %163 : vector<128x128xf32>
    %165 = arith.addf %113, %164 : vector<128x128xf32>
    %c0_106 = arith.constant 0 : index
    %c0_107 = arith.constant 0 : index
    %166 = vector.load %arg9[%c0_106, %c0_107] : memref<1x128xf32, #tpu.memory_space<vmem>>, vector<1x128xf32>
    %167 = math.exp %166 : vector<1x128xf32>
    %168 = vector.broadcast %167 : vector<1x128xf32> to vector<128x128xf32>
    %169 = arith.mulf %165, %168 : vector<128x128xf32>
    %cst_108 = arith.constant dense<0.000000e+00> : vector<1xf32>
    %170 = vector.multi_reduction <add>, %166, %cst_108 [1] : vector<1x128xf32> to vector<1xf32>
    %171 = vector.shape_cast %170 : vector<1xf32> to vector<1x1xf32>
    %172 = tpu.iota {dimensions = array<i32: 1>} : vector<1x128xi32>
    %cst_109 = arith.constant 0.000000e+00 : f32
    %173 = vector.broadcast %cst_109 : f32 to vector<128x128xf32>
    %174 = arith.maximumf %169, %173 : vector<128x128xf32>
    %175 = math.absf %169 : vector<128x128xf32>
    %cst_110 = arith.constant 0.000000e+00 : f32
    %176 = vector.broadcast %cst_110 : f32 to vector<128x128xf32>
    %177 = arith.subf %176, %175 : vector<128x128xf32>
    %178 = math.exp %177 : vector<128x128xf32>
    %179 = math.log1p %178 : vector<128x128xf32>
    %180 = arith.addf %174, %179 : vector<128x128xf32>
    %cst_111 = arith.constant 0.000000e+00 : f32
    %181 = vector.broadcast %cst_111 : f32 to vector<128x128xf32>
    %182 = arith.subf %181, %169 : vector<128x128xf32>
    %cst_112 = arith.constant 0.000000e+00 : f32
    %183 = vector.broadcast %cst_112 : f32 to vector<128x128xf32>
    %184 = arith.maximumf %182, %183 : vector<128x128xf32>
    %185 = math.absf %182 : vector<128x128xf32>
    %cst_113 = arith.constant 0.000000e+00 : f32
    %186 = vector.broadcast %cst_113 : f32 to vector<128x128xf32>
    %187 = arith.subf %186, %185 : vector<128x128xf32>
    %188 = math.exp %187 : vector<128x128xf32>
    %189 = math.log1p %188 : vector<128x128xf32>
    %190 = arith.addf %184, %189 : vector<128x128xf32>
    %191 = arith.addf %180, %190 : vector<128x128xf32>
    %cst_114 = arith.constant 0.000000e+00 : f32
    %192 = vector.broadcast %cst_114 : f32 to vector<128x128xf32>
    %193 = arith.subf %192, %191 : vector<128x128xf32>
    %c16_i32 = arith.constant 16 : i32
    %194 = vector.broadcast %c16_i32 : i32 to vector<1x128xi32>
    %195 = arith.cmpi slt, %172, %194 : vector<1x128xi32>
    %cst_115 = arith.constant 0.000000e+00 : f32
    %196 = vector.shape_cast %195 : vector<1x128xi1> to vector<1x128xi1>
    %197 = vector.broadcast %196 : vector<1x128xi1> to vector<128x128xi1>
    %198 = vector.broadcast %cst_115 : f32 to vector<128x128xf32>
    %199 = arith.select %197, %193, %198 : vector<128x128xi1>, vector<128x128xf32>
    %cst_116 = arith.constant dense<0.000000e+00> : vector<128xf32>
    %200 = vector.multi_reduction <add>, %199, %cst_116 [1] : vector<128x128xf32> to vector<128xf32>
    %201 = vector.shape_cast %200 : vector<128xf32> to vector<128x1xf32>
    %202 = vector.broadcast %171 : vector<1x1xf32> to vector<128x1xf32>
    %203 = arith.addf %201, %202 : vector<128x1xf32>
    %c0_117 = arith.constant 0 : index
    %c0_118 = arith.constant 0 : index
    %204 = vector.load %arg10[%c0_117, %c0_118] : memref<128x128xf32, #tpu.memory_space<vmem>>, vector<128x128xf32>
    tpu.vector_store %arg10[%c0_117, %c0_118], %169 {strides = array<i32>} : memref<128x128xf32, #tpu.memory_space<vmem>>, vector<128x128xf32>,
    %205 = vector.shape_cast %203 : vector<128x1xf32> to vector<128x1xf32>
    %206 = vector.broadcast %205 : vector<128x1xf32> to vector<128x128xf32>
    %c0_119 = arith.constant 0 : index
    %c0_120 = arith.constant 0 : index
    %207 = vector.load %arg11[%c0_119, %c0_120] : memref<128x128xf32, #tpu.memory_space<vmem>>, vector<128x128xf32>
    tpu.vector_store %arg11[%c0_119, %c0_120], %206 {strides = array<i32>} : memref<128x128xf32, #tpu.memory_space<vmem>>, vector<128x128xf32>,
    return
  }
  func.func @transform_0(%arg0: i32) -> (i32, i32) {
    %c0_i32 = arith.constant 0 : i32
    %c0_i32_0 = arith.constant 0 : i32
    return %arg0, %c0_i32 : i32, i32
  }
  func.func @transform_1(%arg0: i32) -> (i32, i32) {
    %c0_i32 = arith.constant 0 : i32
    %c0_i32_0 = arith.constant 0 : i32
    %c0_i32_1 = arith.constant 0 : i32
    return %c0_i32, %c0_i32_0 : i32, i32
  }
  func.func @transform_2(%arg0: i32) -> (i32, i32, i32) {
    %c0_i32 = arith.constant 0 : i32
    %c0_i32_0 = arith.constant 0 : i32
    %c0_i32_1 = arith.constant 0 : i32
    %c0_i32_2 = arith.constant 0 : i32
    return %c0_i32, %c0_i32_0, %c0_i32_1 : i32, i32, i32
  }
  func.func @transform_3(%arg0: i32) -> (i32, i32, i32) {
    %c0_i32 = arith.constant 0 : i32
    %c0_i32_0 = arith.constant 0 : i32
    %c0_i32_1 = arith.constant 0 : i32
    %c0_i32_2 = arith.constant 0 : i32
    return %c0_i32, %c0_i32_0, %c0_i32_1 : i32, i32, i32
  }
  func.func @transform_4(%arg0: i32) -> (i32, i32, i32) {
    %c0_i32 = arith.constant 0 : i32
    %c0_i32_0 = arith.constant 0 : i32
    %c0_i32_1 = arith.constant 0 : i32
    %c0_i32_2 = arith.constant 0 : i32
    return %c0_i32, %c0_i32_0, %c0_i32_1 : i32, i32, i32
  }
  func.func @transform_5(%arg0: i32) -> (i32, i32, i32) {
    %c0_i32 = arith.constant 0 : i32
    %c0_i32_0 = arith.constant 0 : i32
    %c0_i32_1 = arith.constant 0 : i32
    %c0_i32_2 = arith.constant 0 : i32
    return %c0_i32, %c0_i32_0, %c0_i32_1 : i32, i32, i32
  }
  func.func @transform_6(%arg0: i32) -> (i32, i32, i32) {
    %c0_i32 = arith.constant 0 : i32
    %c0_i32_0 = arith.constant 0 : i32
    %c0_i32_1 = arith.constant 0 : i32
    %c0_i32_2 = arith.constant 0 : i32
    return %c0_i32, %c0_i32_0, %c0_i32_1 : i32, i32, i32
  }
  func.func @transform_7(%arg0: i32) -> (i32, i32, i32) {
    %c0_i32 = arith.constant 0 : i32
    %c0_i32_0 = arith.constant 0 : i32
    %c0_i32_1 = arith.constant 0 : i32
    %c0_i32_2 = arith.constant 0 : i32
    return %c0_i32, %c0_i32_0, %c0_i32_1 : i32, i32, i32
  }
  func.func @transform_8(%arg0: i32) -> (i32, i32) {
    %c0_i32 = arith.constant 0 : i32
    %c0_i32_0 = arith.constant 0 : i32
    %c0_i32_1 = arith.constant 0 : i32
    return %c0_i32, %c0_i32_0 : i32, i32
  }
  func.func @transform_9(%arg0: i32) -> (i32, i32) {
    %c0_i32 = arith.constant 0 : i32
    %c0_i32_0 = arith.constant 0 : i32
    return %arg0, %c0_i32 : i32, i32
  }
  func.func @transform_10(%arg0: i32) -> (i32, i32) {
    %c0_i32 = arith.constant 0 : i32
    %c0_i32_0 = arith.constant 0 : i32
    return %arg0, %c0_i32 : i32, i32
  }
}

</mosaic_0001>

<bundles_post_ra>
// kernel: tpu_custom_call.1
= control target key start
LH: loop header
LB: loop body
LE: loop exit
PB: predicated region body
PF: predicated region fallthrough
CT: control target
= control target key end

     0   :  { %s6830_s0 = inlined_call_operand.hbm [shape: f32[256,128], index: 0, kind: input, shape index: {}]   ;;  %s6831_s1 = inlined_call_operand.hbm [shape: f32[3,128], index: 1, kind: input, shape index: {}]   ;;  %s6832_s2 = inlined_call_operand.hbm [shape: bf16[3,128,128], index: 2, kind: input, shape index: {}]   ;;  %s6833_s3 = inlined_call_operand.vmem [shape: f32[3,1,128], index: 3, kind: input, shape index: {}]   ;;  %s6834_s4 = inlined_call_operand.hbm [shape: bf16[6,128,128], index: 4, kind: input, shape index: {}]   ;;  %s6835_s5 = inlined_call_operand.vmem [shape: f32[6,1,128], index: 5, kind: input, shape index: {}]   ;;  %s6836_s6 = inlined_call_operand.hbm [shape: bf16[3,128,128], index: 6, kind: input, shape index: {}]   ;;  %s6837_s7 = inlined_call_operand.vmem [shape: f32[3,1,128], index: 7, kind: input, shape index: {}]   ;;  %s6838_s8 = inlined_call_operand.vmem [shape: f32[1,128], index: 8, kind: input, shape index: {}]   ;;  %s6839_s9 = inlined_call_operand.hbm [shape: f32[256,128], index: 9, kind: output, shape index: {0}]   ;;  %s6840_s10 = inlined_call_operand.hbm [shape: f32[256,128], index: 10, kind: output, shape index: {1}]  }
   0x1   :  { %6845 = sst [smem:[#allocation19_spill]] %s6831_s1 }
   0x2   :  { %6846 = sst [smem:[#allocation20_spill]] %s6832_s2 }
   0x3   :  { %6847 = sst [smem:[#allocation21_spill]] %s6834_s4 }
   0x4   :  { %6848 = sst [smem:[#allocation22_spill]] %s6836_s6 }
   0x5   :  { %16 = vsyncpa [#allocation3], 0 }
   0x6   :  { %18 = vsyncpa [#allocation3 + $0x1], 0 }
   0x7   :  { %19 = vsyncpa [#allocation6], 0 }
   0x8   :  { %20 = vsyncpa [#allocation9], 0 }
   0x9   :  { %21 = vsyncpa [#allocation4], 0 }
   0xa   :  { %23 = vsyncpa [#allocation4 + $0x1], 0 }
   0xb   :  { %24 = vsyncpa [#allocation13], 0 }
   0xc   :  { %26 = vsyncpa [#allocation13 + $0x1], 0  ;;  %s5409_s13 = smov 0   ;;  %s5411_s14 = smov 0  }
   0xd   :  { %s5413_s15 = smov 0   ;;  %s5415_s16 = smov 0  }
   0xe LB: > { %s5430_s17 = sadd.s32 4294967295, %s5339_s16   ;;  %s4041_s18 = sadd.s32 4294967294, %s5339_s16   ;;  %s5339_s16 = sphi %s5415_s16, %s6908_s16   ;;  %s5335_s15 = sphi %s5413_s15, %s6907_s15   ;;  %s5331_s14 = sphi %s5411_s14, %s6906_s14   ;;  %s5327_s13 = sphi %s5409_s13, %s6905_s13  }
   0xf   : > { %p52_p0 = scmp.ne.s32.totalorder %s5331_s14, %s5327_s13  ;;  %p6841_p1 = scmp.eq.s32.totalorder %s5430_s17, 0 }
  0x10   : > { %p250_p3 = scmp.eq.s32.totalorder %s4041_s18, 1  ;;  %p4042_p5 = scmp.ge.s32.totalorder %s5339_s16, 1 }
  0x11   : > { %p5439_p4 = por %p6841_p1, %p52_p0  ;;  %p283_p7 = scmp.lt.s32.totalorder %s5339_s16, 3 }
  0x12   : > { %p5444_p6 = por %p250_p3, %p52_p0  ;;  %s5341_s22 = smov [#allocation5]  }
  0x13   : > { %s6849_s19 = scalar_select %p5439_p4, 1, 0 }
  0x14   : > { %s6850_s20 = scalar_select %p5444_p6, 1, 0 }
  0x15   : > { %p5449_p8 = pnand %p4042_p5, %p283_p7  ;;  %s296_s23 = sshll.u32 %s5341_s22, 4  ;;  %s297_s23 = int_to_ptr.vmem [resolvable:$true] %s296_s23 }
  0x16   : > { %s5342_s25 = smov [#allocation8]   ;;  %s5343_s27 = smov [#allocation7]  }
  0x17   : > { %s6851_s21 = scalar_select %p5449_p8, 1, 0 }
  0x18   : > { %p4785_p10 = pneg %p5449_p8  ;;  %s322_s26 = sshll.u32 %s5342_s25, 4  ;;  %s323_s26 = int_to_ptr.vmem [resolvable:$true] %s322_s26 }
  0x19   : > { %s306_s28 = sshll.u32 %s5343_s27, 4  ;;  %s5116_s29 = scalar_lea.vmem %s297_s23, 64  ;;  %s307_s28 = int_to_ptr.vmem [resolvable:$true] %s306_s28 }
  0x1a   : > { %p5458_p11 = pnand %p4785_p10, %p6841_p1  ;;  %p5117_p13 = scmp.ne.s32.totalorder %s297_s23, %s5116_s29 }
  0x1b   : > { %p5124_p5 = scmp.lt.s32.totalorder %s297_s23, %s297_s23  ;;  %p5125_p7 = scmp.lt.s32.totalorder %s5116_s29, %s5116_s29 }
  0x1c   : > { %p5107_p12 = pneg %p5458_p11 }
  0x1d   : > { %p5126_p10 = por %p5125_p7, %p5124_p5 }
  0x1e   : > { %p5119_p0 = pnand %p5117_p13, %p5107_p12 }
  0x20   : > { %p5120_p3 = pneg %p5119_p0 }
  0x22   : > { %p5127_p9 = pnand %p5126_p10, %p5120_p3 }
  0x24   : > { %5130 = shalt.err (!%p5127_p9)
}
  0x25   : > { %s6853_s1 = sld [smem:[#allocation19_spill]]  ;;  %s5142_s12 = scalar_lea.vmem %s323_s26, 6144 }
  0x26   : > { %p5143_p1 = scmp.ne.s32.totalorder %s323_s26, %s5142_s12  ;;  %p5150_p13 = scmp.lt.s32.totalorder %s323_s26, %s323_s26 }
  0x27   : > { %p5151_p0 = scmp.lt.s32.totalorder %s5142_s12, %s5142_s12 }
  0x28   : > { %p5145_p2 = pnand %p5143_p1, %p5107_p12 }
  0x29   : > { %p5152_p4 = por %p5151_p0, %p5150_p13 }
  0x2a   : > { %p5146_p6 = pneg %p5145_p2 }
  0x2b   : > { %4788 = dma.hbm_to_vmem [thread:$0]  (!%p5458_p11), %s6853_s1, 64, %s297_s23, [#allocation6]  }
  0x2c   : > { %p5153_p8 = pnand %p5152_p4, %p5146_p6 }
  0x2e   : > { %5156 = shalt.err (!%p5153_p8)
}
  0x2f   : > { %s5344_s18 = smov 64   ;;  %s5345_s22 = smov 4  }
  0x30   : > { %s6854_s4 = sld [smem:[#allocation21_spill]]  ;;  %s5168_s23 = scalar_lea.vmem %s307_s28, 3072 }
  0x31   : > { %p5169_p9 = scmp.ne.s32.totalorder %s307_s28, %s5168_s23  ;;  %p5176_p3 = scmp.lt.s32.totalorder %s307_s28, %s307_s28 }
  0x32   : > { %p5177_p5 = scmp.lt.s32.totalorder %s5168_s23, %s5168_s23 }
  0x33   : > { %p5171_p1 = pnand %p5169_p9, %p5107_p12 }
  0x34   : > { %p5178_p4 = por %p5177_p5, %p5176_p3 }
  0x35   : > { %p5172_p2 = pneg %p5171_p1 }
  0x36   : > { %4794 = dma.hbm_to_vmem [thread:$0]  (!%p5458_p11), %s6854_s4, 6144, %s323_s26, [#allocation9], %s5344_s18, %s5344_s18, %s5345_s22  }
  0x37   : > { %p5179_p6 = pnand %p5178_p4, %p5172_p2 }
  0x39   : > { %5182 = shalt.err (!%p5179_p6)
}
  0x3a   : > { %s6855_s2 = sld [smem:[#allocation20_spill]]  ;;  %s5346_s26 = smov [#allocation10]  }
  0x3b   : > { %s338_s11 = sshll.u32 %s5346_s26, 4  ;;  %s339_s11 = int_to_ptr.vmem [resolvable:$true] %s338_s11 }
  0x3c   : > { %s5194_s12 = scalar_lea.vmem %s339_s11, 3072  ;;  %p5202_p13 = scmp.lt.s32.totalorder %s339_s11, %s339_s11 }
  0x3d   : > { %p5195_p8 = scmp.ne.s32.totalorder %s339_s11, %s5194_s12  ;;  %p5203_p0 = scmp.lt.s32.totalorder %s5194_s12, %s5194_s12 }
  0x3f   : > { %p5197_p7 = pnand %p5195_p8, %p5107_p12  ;;  %p5204_p9 = por %p5203_p0, %p5202_p13 }
  0x40   : > { %4791 = dma.hbm_to_vmem [thread:$0]  (!%p5458_p11), %s6855_s2, 3072, %s307_s28, [#allocation6], %s5344_s18, %s5344_s18, %s5345_s22  }
  0x41   : > { %p5198_p10 = pneg %p5197_p7 }
  0x43   : > { %p5205_p1 = pnand %p5204_p9, %p5198_p10 }
  0x45   : > { %5208 = shalt.err (!%p5205_p1)
}
  0x46   : > { %s6856_s6 = sld [smem:[#allocation22_spill]]  ;;  %s5497_s28 = sadd.s32 1, %s5339_s16  }
  0x47   : > { %s39_s23 = sadd.s32 1, %s5335_s15  ;;  %s36_s24 = ssub.s32 %s5339_s16, %s5497_s28 }
  0x48   : > { %p46_p12 = scmp.ne.s32.totalorder %s5335_s15, %s5331_s14  ;;  %p37_p2 = scmp.eq.s32.totalorder %s36_s24, 0 }
  0x49   : > { %p47_p3 = scmp.eq.s32.totalorder %s5339_s16, 0  ;;  %p6857_p5 = scmp.eq.s32.totalorder %s5430_s17, 1 }
  0x4a   : > { %p4813_p6 = scmp.lt.s32.totalorder %s5339_s16, 2  ;;  %s358_s26 = sand.u32 1, %s5335_s15  }
  0x4b   : > { %p5507_p4 = por %p6857_p5, %p46_p12  ;;  %p48_p8 = por %p47_p3, %p46_p12 }
  0x4c   : > { %4797 = dma.hbm_to_vmem [thread:$0]  (!%p5458_p11), %s6856_s6, 3072, %s339_s11, [#allocation9], %s5344_s18, %s5344_s18, %s5345_s22  }
  0x4d   : > { %s6858_s29 = scalar_select %p5507_p4, 1, 0 }
  0x4e   : > { %s5513_s30 = scalar_select %p37_p2, %s5335_s15, %s39_s23  }
  0x4f   : > { %s4048_s12 = sshll.u32 %s358_s26, 7  ;;  %s4184_s18 = sshll.u32 %s5339_s16, 11 }
  0x50   : > { %s5520_s25 = scalar_lea.hbm %s6830_s0, %s4184_s18  ;;  %s362_s27 = scalar_lea.vmem [#allocation2], %s4048_s12 }
  0x51   : > { %s369_s24 = sshll.u32 %s362_s27, 4  ;;  %p5524_p11 = pnand %p4813_p6, %p48_p8  ;;  %s5522_s24 = int_to_ptr.vmem [resolvable:$true] %s369_s24 }
  0x52   : > { %s5528_s23 = scalar_lea.sflag [#allocation3], %s358_s26  ;;  %s5209_s2 = scalar_lea.hbm %s5520_s25, 2048 }
  0x53   : > { %p5210_p7 = scmp.ne.s32.totalorder %s5520_s25, %s5209_s2  ;;  %p5211_p10 = pneg %p5524_p11 }
  0x54   : > { %s5214_s12 = scalar_lea.hbm %s6830_s0, 4096  ;;  %p5215_p9 = scmp.lt.s32.totalorder %s5520_s25, %s6830_s0 }
  0x55   : > { %p5212_p13 = pnand %p5211_p10, %p5210_p7  ;;  %p5216_p1 = scmp.lt.s32.totalorder %s5214_s12, %s5209_s2 }
  0x57   : > { %p5213_p0 = pneg %p5212_p13  ;;  %p5217_p12 = por %p5216_p1, %p5215_p9 }
  0x59   : > { %p5218_p2 = pnand %p5217_p12, %p5213_p0 }
  0x5b   : > { %5221 = shalt.err (!%p5218_p2)
}
  0x5c   : > { %s5222_s26 = scalar_lea.vmem %s5522_s24, 2048  ;;  %s5347_s4 = smov [#allocation2]  }
  0x5d   : > { %p5223_p3 = scmp.ne.s32.totalorder %s5522_s24, %s5222_s26  ;;  %s5227_s6 = sshll.u32 %s5347_s4, 4  ;;  %s5228_s6 = int_to_ptr.vmem [resolvable:$false] %s5227_s6 }
  0x5e   : > { %s5229_s18 = scalar_lea.vmem %s5228_s6, 4096  ;;  %p5230_p8 = scmp.lt.s32.totalorder %s5522_s24, %s5228_s6 }
  0x5f   : > { %p5225_p5 = pnand %p5223_p3, %p5211_p10  ;;  %p5231_p7 = scmp.lt.s32.totalorder %s5229_s18, %s5222_s26 }
  0x61   : > { %p5226_p6 = pneg %p5225_p5  ;;  %p5232_p13 = por %p5231_p7, %p5230_p8 }
  0x63   : > { %p5233_p4 = pnand %p5232_p13, %p5226_p6 }
  0x65   : > { %5236 = shalt.err (!%p5233_p4)
}
  0x66   : > { %s5348_s2 = smov 128   ;;  %s5349_s22 = smov 8  }
  0x67   : > { %4801 = dma.hbm_to_vmem [thread:$0]  (!%p5524_p11), %s5520_s25, 2048, %s5522_s24, %s5528_s23, %s5348_s2, %s5348_s2, %s5349_s22  }
  0x68   : > { %p6860_p10 = scmp.ne.s32.totalorder %s6851_s21, 0 }
  0x69   : > { %s5552_s4 = sand.u32 (!%p6860_p10), 1, %s5331_s14   ;;  %p6861_p4 = scmp.ne.s32.totalorder (!%p6860_p10), %s6849_s19, 0 }
  0x6a   : > { %381 = sbr.rel (%p6860_p10) target bundleno = 2959 (0xb8f), region = 56  ;;  %s5555_s6 = sshll.u32 (!%p6860_p10), %s5552_s4, 7 }
  0x6b   : > { %s384_s12 = scalar_lea.sflag (!%p6860_p10), [#allocation3], %s5552_s4  ;;  %s5559_s11 = scalar_lea.vmem (!%p6860_p10), [#allocation2], %s5555_s6 }
  0x6f   : > { %5306 = dma.done.wait (%p6861_p4), %s384_s12, 2048  }
  0x70   : > { %5308 = vsyncadd (%p6861_p4), %s384_s12, 4294965248  ;;  %p6862_p11 = scmp.eq.s32.totalorder %s5430_s17, 0 }
  0x72   : > { %5310 = dma.done.wait (%p6862_p11), [#allocation6], 3136   ;;  %p6863_p0 = pmov %p6862_p11 }
  0x74   : > { %5312 = vsyncadd (%p6863_p0), [#allocation6], 4294964160  ;;  %p6864_p9 = pmov %p6863_p0 }
  0x75   : > { %p6865_p1 = pmov %p6863_p0 }
  0x76   : > { %5314 = dma.done.wait (%p6864_p9), [#allocation9], 9216  }
  0x77   : > { %5316 = vsyncadd (%p6865_p1), [#allocation9], 4294958080  ;;  %v471_v0 = vlaneseq  ;;  %v4861_v1 = vld [vmem:[#allocation7 + $0x38] sm:$0xff]   ;;  %v4862_v2 = vld [vmem:[#allocation7 + $0x30] sm:$0xff]   ;;  %s6082_s1 = scalar_lea.vmem [#allocation11], %s5555_s6  ;;  %s4185_s19 = sshll.u32 %s5430_s17, 11 }
  0x78   : > { %4379 = vmatprep.subr.bf16.mxu0 %v4861_v1  ;;  %v4863_v4 = vld [vmem:[#allocation7 + $0x28] sm:$0xff]   ;;  %v4864_v6 = vld [vmem:[#allocation7 + $0x20] sm:$0xff]   ;;  %v5578_v9 = vld [vmem:[#allocation5] ss:$0 sm:$0xff]  ;;  %s6713_s24 = scalar_lea.hbm %s6839_s9, %s4185_s19  ;;  %s3882_s23 = sshll.u32 %s6082_s1, 4  ;;  %s6720_s23 = int_to_ptr.vmem [resolvable:$true] %s3882_s23 }
  0x79   : > { %v472_v3 = vshrl.u32 %v471_v0, 7  ;;  %4380 = vmatpush3.bf16.msra.mxu0 %v4861_v1  ;;  %v449_v7 = vld [vmem:[%s5559_s11] sm:$0xff]  ;;  %v450_v8 = vld [vmem:[%s5559_s11 + $0x8] sm:$0xff]  ;;  %v4870_v15 = vld [vmem:[#allocation8 + $0x30] sm:$0xff]   ;;  %s6717_s27 = scalar_lea.vmem [#allocation12], %s5555_s6  ;;  %s3864_s26 = scalar_lea.sflag [#allocation4], %s5552_s4 }
  0x7a   : > { %4381 = vmatprep.subr.bf16.mxu0 %v4862_v2  ;;  %v475_v10 = vmul.f32 %v5578_v9, %v449_v7  ;;  %v476_v11 = vmul.f32 %v5578_v9, %v450_v8  ;;  %v4865_v12 = vld [vmem:[#allocation7 + $0x18] sm:$0xff]   ;;  %v4866_v16 = vld [vmem:[#allocation7 + $0x10] sm:$0xff]   ;;  %v4867_v17 = vld [vmem:[#allocation7 + $0x8] sm:$0xff]   ;;  %s5237_s18 = scalar_lea.vmem %s6720_s23, 2048  ;;  %p6902_p2 = scmp.ne.s32.totalorder %s6858_s29, 0 }
  0x7b   : > { %v5574_v5 = vsub.s32 0, %v472_v3  ;;  %v4869_v14 = vld [vmem:[#allocation8 + $0x38] sm:$0xff]   ;;  %v4871_v18 = vld [vmem:[#allocation8 + $0x28] sm:$0xff]   ;;  %v4872_v19 = vld [vmem:[#allocation8 + $0x20] sm:$0xff]   ;;  %p5238_p12 = scmp.ne.s32.totalorder %s6720_s23, %s5237_s18  ;;  %s5350_s2 = smov [#allocation11]  }
  0x7c   : > { %v491_v13 = vpack.c.bf16 %v476_v11, %v475_v10  ;;  %4411 = vmatprep.subr.bf16.mxu1 %v4869_v14  ;;  %v451_v20 = vld [vmem:[%s5559_s11 + $0x10] sm:$0xff]  ;;  %v452_v21 = vld [vmem:[%s5559_s11 + $0x18] sm:$0xff]  ;;  %v4868_v22 = vld [vmem:[#allocation7] sm:$0xff]   ;;  %s5241_s22 = sshll.u32 %s5350_s2, 4  ;;  %s5242_s22 = int_to_ptr.vmem [resolvable:$false] %s5241_s22 }
  0x7d   : > { %4382 = vmatpush3.bf16.msra.mxu0 %v4862_v2  ;;  %4412 = vmatpush3.bf16.msra.mxu1 %v4869_v14  ;;  %v453_v23 = vld [vmem:[%s5559_s11 + $0x20] sm:$0xff]  ;;  %v454_v24 = vld [vmem:[%s5559_s11 + $0x28] sm:$0xff]  ;;  %v477_v26 = vmul.f32 %v5578_v9, %v451_v20  ;;  %v478_v27 = vmul.f32 %v5578_v9, %v452_v21  ;;  %v455_v30 = vld [vmem:[%s5559_s11 + $0x30] sm:$0xff]  ;;  %p5239_p3 = pnand %p5238_p12, %p6902_p2  ;;  %s5243_s6 = scalar_lea.vmem %s5242_s22, 4096 }
  0x7e   : > { %4383 = vmatprep.subr.bf16.mxu0 %v4863_v4  ;;  %4395 = vmatprep.mubr.bf16.mxu0 %v491_v13  ;;  %v4873_v25 = vld [vmem:[#allocation8 + $0x18] sm:$0xff]   ;;  %v479_v28 = vmul.f32 %v5578_v9, %v453_v23  ;;  %v480_v29 = vmul.f32 %v5578_v9, %v454_v24  ;;  %v458_v34 = vld [vmem:[%s5559_s11 + $0x48] sm:$0xff]  ;;  %v481_v36 = vmul.f32 %v5578_v9, %v455_v30  ;;  %v459_v40 = vld [vmem:[%s5559_s11 + $0x50] sm:$0xff]  ;;  %p5244_p6 = scmp.lt.s32.totalorder %s6720_s23, %s5242_s22  ;;  %p5245_p8 = scmp.lt.s32.totalorder %s5243_s6, %s5237_s18 }
  0x7f   : > { %4413 = vmatprep.subr.bf16.mxu1 %v4870_v15  ;;  %v456_v31 = vld [vmem:[%s5559_s11 + $0x38] sm:$0xff]  ;;  %v492_v32 = vpack.c.bf16 %v478_v27, %v477_v26  ;;  %v457_v33 = vld [vmem:[%s5559_s11 + $0x40] sm:$0xff]  ;;  %v484_v39 = vmul.f32 %v5578_v9, %v458_v34  ;;  %v462_v44 = vld [vmem:[%s5559_s11 + $0x68] sm:$0xff]  ;;  %v485_v46 = vmul.f32 %v5578_v9, %v459_v40  ;;  %p5240_p5 = pneg %p5239_p3 }
  0x80   : > { %v493_v35 = vpack.c.bf16 %v480_v29, %v479_v28  ;;  %v482_v37 = vmul.f32 %v5578_v9, %v456_v31  ;;  %v483_v38 = vmul.f32 %v5578_v9, %v457_v33  ;;  %v460_v41 = vld [vmem:[%s5559_s11 + $0x58] sm:$0xff]  ;;  %v461_v43 = vld [vmem:[%s5559_s11 + $0x60] sm:$0xff]  ;;  %v488_v49 = vmul.f32 %v5578_v9, %v462_v44  ;;  %v463_v50 = vld [vmem:[%s5559_s11 + $0x70] sm:$0xff]  ;;  %p5246_p7 = por %p5245_p8, %p5244_p6 }
  0x81   : > { %4384 = vmatpush3.bf16.msra.mxu0 %v4863_v4  ;;  %4414 = vmatpush3.bf16.msra.mxu1 %v4870_v15  ;;  %v486_v47 = vmul.f32 %v5578_v9, %v460_v41  ;;  %v487_v48 = vmul.f32 %v5578_v9, %v461_v43  ;;  %v464_v51 = vld [vmem:[%s5559_s11 + $0x78] sm:$0xff]  ;;  %v489_v54 = vmul.f32 %v5578_v9, %v463_v50  ;;  %v4875_v58 = vld [vmem:[#allocation8 + $0x8] sm:$0xff]   ;;  %v4876_v59 = vld [vmem:[#allocation8] sm:$0xff]  }
  0x82   : > { %4385 = vmatprep.subr.bf16.mxu0 %v4864_v6  ;;  %4415 = vmatprep.subr.bf16.mxu1 %v4871_v18  ;;  %v494_v42 = vpack.c.bf16 %v482_v37, %v481_v36  ;;  %v495_v45 = vpack.c.bf16 %v484_v39, %v483_v38  ;;  %v490_v55 = vmul.f32 %v5578_v9, %v464_v51  ;;  %v4874_v57 = vld [vmem:[#allocation8 + $0x10] sm:$0xff]   ;;  %v4877_v60 = vld [vmem:[#allocation8 + $0x78] sm:$0xff]   ;;  %v4879_v62 = vld [vmem:[#allocation8 + $0x68] sm:$0xff]   ;;  %p5247_p13 = pnand %p5246_p7, %p5240_p5 }
  0x83   : > { %v496_v52 = vpack.c.bf16 %v486_v47, %v485_v46  ;;  %v497_v53 = vpack.c.bf16 %v488_v49, %v487_v48  ;;  %v4878_v61 = vld [vmem:[#allocation8 + $0x70] sm:$0xff]   ;;  %v4880_v63 = vld [vmem:[#allocation8 + $0x60] sm:$0xff]   ;;  %v4881_v1 = vld [vmem:[#allocation8 + $0x58] sm:$0xff]  }
  0x84   : > { %v498_v56 = vpack.c.bf16 %v490_v55, %v489_v54  ;;  %v5613_v3 = vld [vmem:[%s6833_s3] ss:$0 sm:$0xff] }
  0x85   : > { %4386 = vmatpush3.bf16.msra.mxu0 %v4864_v6  ;;  %4416 = vmatpush3.bf16.msra.mxu1 %v4871_v18 }
  0x86   : > { %4387 = vmatprep.subr.bf16.mxu0 %v4865_v12  ;;  %4417 = vmatprep.subr.bf16.mxu1 %v4872_v19 }
  0x89   : > { %4388 = vmatpush3.bf16.msra.mxu0 %v4865_v12  ;;  %4418 = vmatpush3.bf16.msra.mxu1 %v4872_v19 }
  0x8a   : > { %4389 = vmatprep.subr.bf16.mxu0 %v4866_v16  ;;  %4419 = vmatprep.subr.bf16.mxu1 %v4873_v25 }
  0x8d   : > { %4390 = vmatpush3.bf16.msra.mxu0 %v4866_v16  ;;  %4420 = vmatpush3.bf16.msra.mxu1 %v4873_v25 }
  0x8e   : > { %4391 = vmatprep.subr.bf16.mxu0 %v4867_v17  ;;  %4421 = vmatprep.subr.bf16.mxu1 %v4874_v57 }
  0x91   : > { %4392 = vmatpush3.bf16.msra.mxu0 %v4867_v17  ;;  %4422 = vmatpush3.bf16.msra.mxu1 %v4874_v57 }
  0x92   : > { %4393 = vmatprep.subr.bf16.mxu0 %v4868_v22  ;;  %4423 = vmatprep.subr.bf16.mxu1 %v4875_v58 }
  0x95   : > { %4394 = vmatpush3.bf16.msra.mxu0 %v4868_v22  ;;  %4424 = vmatpush3.bf16.msra.mxu1 %v4875_v58 }
  0x96   : > { %4425 = vmatprep.subr.bf16.mxu1 %v4876_v59  ;;  %4443 = vmatprep.subr.bf16.mxu0 %v4877_v60 }
  0x98   : > { %4396 = vmatmul.mubr.bf16.vlgmr.msra.gmra.mxu0 %v492_v32 }
  0x99   : > { %4399 = vmatprep.mubr.bf16.mxu0 %v493_v35  ;;  %4426 = vmatpush3.bf16.msra.mxu1 %v4876_v59 }
  0x9a   : > { %4444 = vmatpush3.bf16.msra.mxu0 %v4877_v60 }
  0x9b   : > { %4445 = vmatprep.subr.bf16.mxu0 %v4878_v61 }
  0x9e   : > { %4446 = vmatpush3.bf16.msra.mxu0 %v4878_v61 }
  0x9f   : > { %4447 = vmatprep.subr.bf16.mxu0 %v4879_v62 }
  0xa0   : > { %4400 = vmatmul.mubr.bf16.gmra.mxu0 %v494_v42 }
  0xa1   : > { %4403 = vmatprep.mubr.bf16.mxu0 %v495_v45 }
  0xa2   : > { %4448 = vmatpush3.bf16.msra.mxu0 %v4879_v62 }
  0xa3   : > { %4449 = vmatprep.subr.bf16.mxu0 %v4880_v63 }
  0xa6   : > { %4450 = vmatpush3.bf16.msra.mxu0 %v4880_v63 }
  0xa7   : > { %4451 = vmatprep.subr.bf16.mxu0 %v4881_v1 }
  0xa8   : > { %4404 = vmatmul.mubr.bf16.gmra.mxu0 %v496_v52 }
  0xa9   : > { %4407 = vmatprep.mubr.bf16.mxu0 %v497_v53 }
  0xaa   : > { %4452 = vmatpush3.bf16.msra.mxu0 %v4881_v1 }
  0xb0   : > { %4408 = vmatmul.mubr.bf16.gmra.mxu0 %v498_v56 }
 0x158   : > { %v4397_v2 = vpop.f32.mrf.mxu0 }
 0x159   : > { %v613_v7 = vadd.f32 %v4397_v2, %v5613_v3 }
 0x15a   : > { %v604_v4 = vpop.f32.mrf.mxu0 }
 0x15b   : > { %v605_v6 = vadd.f32 %v5613_v3, %v604_v4  ;;  %v685_v14 = vmul.f32 0.2, %v613_v7  ;;  %vm669_vm2 = vcmp.gt.f32.partialorder %v613_v7, 0.0 }
 0x15c   : > { %v4398_v8 = vpop.f32.mrf.mxu0 }
 0x15d   : > { %v616_v9 = vadd.f32 %v4398_v8, %v5613_v3  ;;  %v683_v11 = vmul.f32 0.2, %v605_v6  ;;  %vm667_vm1 = vcmp.gt.f32.partialorder %v605_v6, 0.0  ;;  %v701_v25 = vsel %vm669_vm2, %v613_v7, %v685_v14 }
 0x15e   : > { %v607_v10 = vpop.f32.mrf.mxu0 }
 0x15f   : > { %vm670_vm0 = vcmp.gt.f32.partialorder %v616_v9, 0.0  ;;  %v686_v12 = vmul.f32 0.2, %v616_v9  ;;  %v608_v13 = vadd.f32 %v5613_v3, %v607_v10  ;;  %v699_v20 = vsel %vm667_vm1, %v605_v6, %v683_v11 }
 0x160   : > { %v4401_v15 = vpop.f32.mrf.mxu0 }
 0x161   : > { %v684_v16 = vmul.f32 0.2, %v608_v13  ;;  %vm668_vm3 = vcmp.gt.f32.partialorder %v608_v13, 0.0  ;;  %v702_v18 = vsel %vm670_vm0, %v616_v9, %v686_v12  ;;  %v629_v22 = vadd.f32 %v4401_v15, %v5613_v3  ;;  %v4882_v15 = vld [vmem:[#allocation8 + $0x50] sm:$0xff]  }
 0x162   : > { %v620_v17 = vpop.f32.mrf.mxu0  ;;  %v716_v27 = vpack.c.bf16 %v702_v18, %v701_v25  ;;  %4453 = vmatprep.subr.bf16.mxu0 %v4882_v15  ;;  %v4886_v18 = vld [vmem:[#allocation10 + $0x30] sm:$0xff]  }
 0x163   : > { %v621_v19 = vadd.f32 %v5613_v3, %v620_v17  ;;  %v700_v21 = vsel %vm668_vm3, %v608_v13, %v684_v16  ;;  %v689_v32 = vmul.f32 0.2, %v629_v22  ;;  %vm673_vm6 = vcmp.gt.f32.partialorder %v629_v22, 0.0  ;;  %4454 = vmatpush3.bf16.msra.mxu0 %v4882_v15  ;;  %v4883_v16 = vld [vmem:[#allocation8 + $0x48] sm:$0xff]   ;;  %v4885_v17 = vld [vmem:[#allocation10 + $0x38] sm:$0xff]  }
 0x164   : > { %v4402_v23 = vpop.f32.mrf.mxu0  ;;  %v715_v24 = vpack.c.bf16 %v700_v21, %v699_v20  ;;  %4455 = vmatprep.subr.bf16.mxu0 %v4883_v16  ;;  %4475 = vmatprep.subr.bf16.mxu1 %v4885_v17  ;;  %v4888_v20 = vld [vmem:[#allocation10 + $0x20] sm:$0xff]   ;;  %v4889_v21 = vld [vmem:[#allocation10 + $0x18] sm:$0xff]  }
 0x165   : > { %v632_v26 = vadd.f32 %v4402_v23, %v5613_v3  ;;  %v687_v29 = vmul.f32 0.2, %v621_v19  ;;  %vm671_vm5 = vcmp.gt.f32.partialorder %v621_v19, 0.0  ;;  %v705_v43 = vsel %vm673_vm6, %v629_v22, %v689_v32  ;;  %v5634_v23 = vld [vmem:[%s6835_s5] ss:$0 sm:$0xff] }
 0x166   : > { %v623_v28 = vpop.f32.mrf.mxu0  ;;  %4427 = vmatprep.mubr.bf16.mxu1 %v715_v24 }
 0x167   : > { %vm674_vm4 = vcmp.gt.f32.partialorder %v632_v26, 0.0  ;;  %v690_v30 = vmul.f32 0.2, %v632_v26  ;;  %v624_v31 = vadd.f32 %v5613_v3, %v623_v28  ;;  %4428 = vmatmul.mubr.bf16.vlgmr.msra.gmra.mxu1 %v716_v27  ;;  %v703_v38 = vsel %vm671_vm5, %v621_v19, %v687_v29  ;;  %4456 = vmatpush3.bf16.msra.mxu0 %v4883_v16  ;;  %v4887_v19 = vld [vmem:[#allocation10 + $0x28] sm:$0xff]  }
 0x168   : > { %v4405_v33 = vpop.f32.mrf.mxu0  ;;  %4476 = vmatpush3.bf16.msra.mxu1 %v4885_v17 }
 0x169   : > { %vm672_vm7 = vcmp.gt.f32.partialorder %v624_v31, 0.0  ;;  %v688_v34 = vmul.f32 0.2, %v624_v31  ;;  %v706_v36 = vsel %vm674_vm4, %v632_v26, %v690_v30  ;;  %v645_v40 = vadd.f32 %v4405_v33, %v5613_v3  ;;  %4477 = vmatprep.subr.bf16.mxu1 %v4886_v18 }
 0x16a   : > { %v636_v35 = vpop.f32.mrf.mxu0  ;;  %v718_v45 = vpack.c.bf16 %v706_v36, %v705_v43 }
 0x16b   : > { %v637_v37 = vadd.f32 %v5613_v3, %v636_v35  ;;  %v704_v39 = vsel %vm672_vm7, %v624_v31, %v688_v34  ;;  %v693_v50 = vmul.f32 0.2, %v645_v40  ;;  %vm677_vm10 = vcmp.gt.f32.partialorder %v645_v40, 0.0 }
 0x16c   : > { %v4406_v41 = vpop.f32.mrf.mxu0  ;;  %v717_v42 = vpack.c.bf16 %v704_v39, %v703_v38  ;;  %4478 = vmatpush3.bf16.msra.mxu1 %v4886_v18 }
 0x16d   : > { %v648_v44 = vadd.f32 %v4406_v41, %v5613_v3  ;;  %v691_v47 = vmul.f32 0.2, %v637_v37  ;;  %vm675_vm9 = vcmp.gt.f32.partialorder %v637_v37, 0.0  ;;  %v709_v61 = vsel %vm677_vm10, %v645_v40, %v693_v50  ;;  %4479 = vmatprep.subr.bf16.mxu1 %v4887_v19 }
 0x16e   : > { %v639_v46 = vpop.f32.mrf.mxu0  ;;  %4431 = vmatprep.mubr.bf16.mxu1 %v717_v42 }
 0x16f   : > { %vm678_vm8 = vcmp.gt.f32.partialorder %v648_v44, 0.0  ;;  %v694_v48 = vmul.f32 0.2, %v648_v44  ;;  %v640_v49 = vadd.f32 %v5613_v3, %v639_v46  ;;  %4432 = vmatmul.mubr.bf16.gmra.mxu1 %v718_v45  ;;  %v707_v56 = vsel %vm675_vm9, %v637_v37, %v691_v47 }
 0x170   : > { %v4409_v51 = vpop.f32.mrf.mxu0  ;;  %4480 = vmatpush3.bf16.msra.mxu1 %v4887_v19 }
 0x171   : > { %vm676_vm11 = vcmp.gt.f32.partialorder %v640_v49, 0.0  ;;  %v692_v52 = vmul.f32 0.2, %v640_v49  ;;  %v710_v54 = vsel %vm678_vm8, %v648_v44, %v694_v48  ;;  %v661_v58 = vadd.f32 %v4409_v51, %v5613_v3  ;;  %4481 = vmatprep.subr.bf16.mxu1 %v4888_v20 }
 0x172   : > { %v652_v53 = vpop.f32.mrf.mxu0  ;;  %v720_v63 = vpack.c.bf16 %v710_v54, %v709_v61 }
 0x173   : > { %v653_v55 = vadd.f32 %v5613_v3, %v652_v53  ;;  %v708_v57 = vsel %vm676_vm11, %v640_v49, %v692_v52  ;;  %v697_v7 = vmul.f32 0.2, %v661_v58  ;;  %vm681_vm14 = vcmp.gt.f32.partialorder %v661_v58, 0.0 }
 0x174   : > { %v4410_v59 = vpop.f32.mrf.mxu0  ;;  %v719_v60 = vpack.c.bf16 %v708_v57, %v707_v56  ;;  %4482 = vmatpush3.bf16.msra.mxu1 %v4888_v20 }
 0x175   : > { %v664_v62 = vadd.f32 %v4410_v59, %v5613_v3  ;;  %v695_v2 = vmul.f32 0.2, %v653_v55  ;;  %vm679_vm13 = vcmp.gt.f32.partialorder %v653_v55, 0.0  ;;  %v713_v13 = vsel %vm681_vm14, %v661_v58, %v697_v7  ;;  %4483 = vmatprep.subr.bf16.mxu1 %v4889_v21 }
 0x176   : > { %v655_v1 = vpop.f32.mrf.mxu0  ;;  %4435 = vmatprep.mubr.bf16.mxu1 %v719_v60 }
 0x177   : > { %vm682_vm12 = vcmp.gt.f32.partialorder %v664_v62, 0.0  ;;  %v698_v4 = vmul.f32 0.2, %v664_v62  ;;  %v656_v6 = vadd.f32 %v5613_v3, %v655_v1  ;;  %4436 = vmatmul.mubr.bf16.gmra.mxu1 %v720_v63  ;;  %v711_v10 = vsel %vm679_vm13, %v653_v55, %v695_v2  ;;  %v4884_v3 = vld [vmem:[#allocation8 + $0x40] sm:$0xff]  }
 0x178   : > { %4457 = vmatprep.subr.bf16.mxu0 %v4884_v3  ;;  %4484 = vmatpush3.bf16.msra.mxu1 %v4889_v21 }
 0x179   : > { %vm680_vm15 = vcmp.gt.f32.partialorder %v656_v6, 0.0  ;;  %v696_v8 = vmul.f32 0.2, %v656_v6  ;;  %v714_v9 = vsel %vm682_vm12, %v664_v62, %v698_v4  ;;  %4458 = vmatpush3.bf16.msra.mxu0 %v4884_v3 }
 0x17a   : > { %v722_v14 = vpack.c.bf16 %v714_v9, %v713_v13 }
 0x17b   : > { %v712_v11 = vsel %vm680_vm15, %v656_v6, %v696_v8 }
 0x17c   : > { %v721_v12 = vpack.c.bf16 %v712_v11, %v711_v10 }
 0x17e   : > { %4439 = vmatprep.mubr.bf16.mxu1 %v721_v12 }
 0x17f   : > { %4440 = vmatmul.mubr.bf16.gmra.mxu1 %v722_v14 }
 0x227   : > { %v4429_v22 = vpop.f32.mrf.mxu1 }
 0x228   : > { %v837_v26 = vadd.f32 %v4429_v22, %v5634_v23 }
 0x229   : > { %v828_v24 = vpop.f32.mrf.mxu1 }
 0x22a   : > { %v829_v25 = vadd.f32 %v5634_v23, %v828_v24  ;;  %v909_v33 = vmul.f32 0.2, %v837_v26  ;;  %vm893_vm2 = vcmp.gt.f32.partialorder %v837_v26, 0.0 }
 0x22b   : > { %v4430_v27 = vpop.f32.mrf.mxu1 }
 0x22c   : > { %v840_v28 = vadd.f32 %v4430_v27, %v5634_v23  ;;  %v907_v30 = vmul.f32 0.2, %v829_v25  ;;  %vm891_vm1 = vcmp.gt.f32.partialorder %v829_v25, 0.0  ;;  %v925_v41 = vsel %vm893_vm2, %v837_v26, %v909_v33 }
 0x22d   : > { %v831_v29 = vpop.f32.mrf.mxu1 }
 0x22e   : > { %vm894_vm0 = vcmp.gt.f32.partialorder %v840_v28, 0.0  ;;  %v910_v31 = vmul.f32 0.2, %v840_v28  ;;  %v832_v32 = vadd.f32 %v5634_v23, %v831_v29  ;;  %v923_v39 = vsel %vm891_vm1, %v829_v25, %v907_v30 }
 0x22f   : > { %v4433_v34 = vpop.f32.mrf.mxu1 }
 0x230   : > { %vm892_vm3 = vcmp.gt.f32.partialorder %v832_v32, 0.0  ;;  %v908_v35 = vmul.f32 0.2, %v832_v32  ;;  %v926_v36 = vsel %vm894_vm0, %v840_v28, %v910_v31  ;;  %v853_v42 = vadd.f32 %v4433_v34, %v5634_v23  ;;  %v4890_v34 = vld [vmem:[#allocation10 + $0x10] sm:$0xff]  }
 0x231   : > { %v844_v37 = vpop.f32.mrf.mxu1  ;;  %v940_v45 = vpack.c.bf16 %v926_v36, %v925_v41  ;;  %4485 = vmatprep.subr.bf16.mxu1 %v4890_v34  ;;  %v4893_v36 = vld [vmem:[#allocation7 + $0x78] sm:$0xff]  }
 0x232   : > { %v845_v38 = vadd.f32 %v5634_v23, %v844_v37  ;;  %v924_v40 = vsel %vm892_vm3, %v832_v32, %v908_v35  ;;  %v913_v51 = vmul.f32 0.2, %v853_v42  ;;  %vm897_vm6 = vcmp.gt.f32.partialorder %v853_v42, 0.0  ;;  %4486 = vmatpush3.bf16.msra.mxu1 %v4890_v34  ;;  %v4891_v35 = vld [vmem:[#allocation10 + $0x8] sm:$0xff]   ;;  %v4894_v37 = vld [vmem:[#allocation7 + $0x70] sm:$0xff]   ;;  %4507 = vmatprep.subr.bf16.mxu0 %v4893_v36 }
 0x233   : > { %v4434_v43 = vpop.f32.mrf.mxu1  ;;  %v939_v44 = vpack.c.bf16 %v924_v40, %v923_v39  ;;  %4487 = vmatprep.subr.bf16.mxu1 %v4891_v35  ;;  %v4896_v39 = vld [vmem:[#allocation7 + $0x60] sm:$0xff]   ;;  %v5655_v41 = vld [vmem:[%s6835_s5 + $0x1] ss:$0 sm:$0xff] }
 0x234   : > { %v856_v46 = vadd.f32 %v4434_v43, %v5634_v23  ;;  %v911_v48 = vmul.f32 0.2, %v845_v38  ;;  %vm895_vm5 = vcmp.gt.f32.partialorder %v845_v38, 0.0  ;;  %v929_v62 = vsel %vm897_vm6, %v853_v42, %v913_v51 }
 0x235   : > { %v847_v47 = vpop.f32.mrf.mxu1  ;;  %4459 = vmatprep.mubr.bf16.mxu0 %v939_v44 }
 0x236   : > { %vm898_vm4 = vcmp.gt.f32.partialorder %v856_v46, 0.0  ;;  %v914_v49 = vmul.f32 0.2, %v856_v46  ;;  %v848_v50 = vadd.f32 %v5634_v23, %v847_v47  ;;  %4460 = vmatmul.mubr.bf16.vlgmr.msra.gmra.mxu0 %v940_v45  ;;  %v927_v57 = vsel %vm895_vm5, %v845_v38, %v911_v48  ;;  %4488 = vmatpush3.bf16.msra.mxu1 %v4891_v35  ;;  %v4895_v38 = vld [vmem:[#allocation7 + $0x68] sm:$0xff]  }
 0x237   : > { %v4437_v52 = vpop.f32.mrf.mxu1  ;;  %4508 = vmatpush3.bf16.msra.mxu0 %v4893_v36 }
 0x238   : > { %vm896_vm7 = vcmp.gt.f32.partialorder %v848_v50, 0.0  ;;  %v912_v53 = vmul.f32 0.2, %v848_v50  ;;  %v930_v55 = vsel %vm898_vm4, %v856_v46, %v914_v49  ;;  %v869_v59 = vadd.f32 %v4437_v52, %v5634_v23  ;;  %4509 = vmatprep.subr.bf16.mxu0 %v4894_v37 }
 0x239   : > { %v860_v54 = vpop.f32.mrf.mxu1  ;;  %v942_v1 = vpack.c.bf16 %v930_v55, %v929_v62 }
 0x23a   : > { %v861_v56 = vadd.f32 %v5634_v23, %v860_v54  ;;  %v928_v58 = vsel %vm896_vm7, %v848_v50, %v912_v53  ;;  %v917_v8 = vmul.f32 0.2, %v869_v59  ;;  %vm901_vm10 = vcmp.gt.f32.partialorder %v869_v59, 0.0 }
 0x23b   : > { %v4438_v60 = vpop.f32.mrf.mxu1  ;;  %v941_v61 = vpack.c.bf16 %v928_v58, %v927_v57  ;;  %4510 = vmatpush3.bf16.msra.mxu0 %v4894_v37 }
 0x23c   : > { %v872_v63 = vadd.f32 %v4438_v60, %v5634_v23  ;;  %v915_v4 = vmul.f32 0.2, %v861_v56  ;;  %vm899_vm9 = vcmp.gt.f32.partialorder %v861_v56, 0.0  ;;  %v933_v18 = vsel %vm901_vm10, %v869_v59, %v917_v8  ;;  %4511 = vmatprep.subr.bf16.mxu0 %v4895_v38 }
 0x23d   : > { %v863_v2 = vpop.f32.mrf.mxu1  ;;  %4463 = vmatprep.mubr.bf16.mxu0 %v941_v61 }
 0x23e   : > { %vm902_vm8 = vcmp.gt.f32.partialorder %v872_v63, 0.0  ;;  %v918_v6 = vmul.f32 0.2, %v872_v63  ;;  %v864_v7 = vadd.f32 %v5634_v23, %v863_v2  ;;  %4464 = vmatmul.mubr.bf16.gmra.mxu0 %v942_v1  ;;  %v931_v14 = vsel %vm899_vm9, %v861_v56, %v915_v4 }
 0x23f   : > { %v4441_v9 = vpop.f32.mrf.mxu1  ;;  %4512 = vmatpush3.bf16.msra.mxu0 %v4895_v38 }
 0x240   : > { %vm900_vm11 = vcmp.gt.f32.partialorder %v864_v7, 0.0  ;;  %v916_v10 = vmul.f32 0.2, %v864_v7  ;;  %v934_v12 = vsel %vm902_vm8, %v872_v63, %v918_v6  ;;  %v885_v16 = vadd.f32 %v4441_v9, %v5634_v23  ;;  %4513 = vmatprep.subr.bf16.mxu0 %v4896_v39 }
 0x241   : > { %v876_v11 = vpop.f32.mrf.mxu1  ;;  %v944_v20 = vpack.c.bf16 %v934_v12, %v933_v18 }
 0x242   : > { %v877_v13 = vadd.f32 %v5634_v23, %v876_v11  ;;  %v932_v15 = vsel %vm900_vm11, %v864_v7, %v916_v10  ;;  %v921_v26 = vmul.f32 0.2, %v885_v16  ;;  %vm905_vm14 = vcmp.gt.f32.partialorder %v885_v16, 0.0 }
 0x243   : > { %v4442_v3 = vpop.f32.mrf.mxu1  ;;  %v943_v17 = vpack.c.bf16 %v932_v15, %v931_v14  ;;  %4514 = vmatpush3.bf16.msra.mxu0 %v4896_v39 }
 0x244   : > { %v888_v19 = vadd.f32 %v4442_v3, %v5634_v23  ;;  %v919_v22 = vmul.f32 0.2, %v877_v13  ;;  %vm903_vm13 = vcmp.gt.f32.partialorder %v877_v13, 0.0  ;;  %v937_v32 = vsel %vm905_vm14, %v885_v16, %v921_v26 }
 0x245   : > { %v879_v21 = vpop.f32.mrf.mxu1  ;;  %4467 = vmatprep.mubr.bf16.mxu0 %v943_v17 }
 0x246   : > { %vm906_vm12 = vcmp.gt.f32.partialorder %v888_v19, 0.0  ;;  %v922_v24 = vmul.f32 0.2, %v888_v19  ;;  %v880_v25 = vadd.f32 %v5634_v23, %v879_v21  ;;  %4468 = vmatmul.mubr.bf16.gmra.mxu0 %v944_v20  ;;  %v935_v29 = vsel %vm903_vm13, %v877_v13, %v919_v22  ;;  %v4892_v23 = vld [vmem:[#allocation10] sm:$0xff]  }
 0x247   : > { %4489 = vmatprep.subr.bf16.mxu1 %v4892_v23 }
 0x248   : > { %vm904_vm15 = vcmp.gt.f32.partialorder %v880_v25, 0.0  ;;  %v920_v27 = vmul.f32 0.2, %v880_v25  ;;  %v938_v28 = vsel %vm906_vm12, %v888_v19, %v922_v24  ;;  %4490 = vmatpush3.bf16.msra.mxu1 %v4892_v23 }
 0x249   : > { %v946_v33 = vpack.c.bf16 %v938_v28, %v937_v32 }
 0x24a   : > { %v936_v30 = vsel %vm904_vm15, %v880_v25, %v920_v27 }
 0x24b   : > { %v945_v31 = vpack.c.bf16 %v936_v30, %v935_v29 }
 0x24d   : > { %4471 = vmatprep.mubr.bf16.mxu0 %v945_v31 }
 0x24e   : > { %4472 = vmatmul.mubr.bf16.gmra.mxu0 %v946_v33 }
 0x2f6   : > { %v4461_v40 = vpop.f32.mrf.mxu0 }
 0x2f7   : > { %v1063_v44 = vadd.f32 %v4461_v40, %v5655_v41 }
 0x2f8   : > { %v1054_v42 = vpop.f32.mrf.mxu0 }
 0x2f9   : > { %v1055_v43 = vadd.f32 %v5655_v41, %v1054_v42  ;;  %v1135_v51 = vmul.f32 0.2, %v1063_v44  ;;  %vm1119_vm2 = vcmp.gt.f32.partialorder %v1063_v44, 0.0 }
 0x2fa   : > { %v4462_v45 = vpop.f32.mrf.mxu0 }
 0x2fb   : > { %v1066_v46 = vadd.f32 %v4462_v45, %v5655_v41  ;;  %v1133_v48 = vmul.f32 0.2, %v1055_v43  ;;  %vm1117_vm1 = vcmp.gt.f32.partialorder %v1055_v43, 0.0  ;;  %v1151_v59 = vsel %vm1119_vm2, %v1063_v44, %v1135_v51 }
 0x2fc   : > { %v1057_v47 = vpop.f32.mrf.mxu0 }
 0x2fd   : > { %vm1120_vm0 = vcmp.gt.f32.partialorder %v1066_v46, 0.0  ;;  %v1136_v49 = vmul.f32 0.2, %v1066_v46  ;;  %v1058_v50 = vadd.f32 %v5655_v41, %v1057_v47  ;;  %v1149_v57 = vsel %vm1117_vm1, %v1055_v43, %v1133_v48 }
 0x2fe   : > { %v4465_v52 = vpop.f32.mrf.mxu0 }
 0x2ff   : > { %vm1118_vm3 = vcmp.gt.f32.partialorder %v1058_v50, 0.0  ;;  %v1134_v53 = vmul.f32 0.2, %v1058_v50  ;;  %v1152_v54 = vsel %vm1120_vm0, %v1066_v46, %v1136_v49  ;;  %v1079_v60 = vadd.f32 %v4465_v52, %v5655_v41  ;;  %v4897_v52 = vld [vmem:[#allocation7 + $0x58] sm:$0xff]  }
 0x300   : > { %v1070_v55 = vpop.f32.mrf.mxu0  ;;  %v1166_v63 = vpack.c.bf16 %v1152_v54, %v1151_v59  ;;  %4515 = vmatprep.subr.bf16.mxu0 %v4897_v52  ;;  %v4900_v54 = vld [vmem:[#allocation7 + $0x40] sm:$0xff]   ;;  %v4905_v59 = vld [vmem:[#allocation8 + $0x98] sm:$0xff]  }
 0x301   : > { %v1071_v56 = vadd.f32 %v5655_v41, %v1070_v55  ;;  %v1150_v58 = vsel %vm1118_vm3, %v1058_v50, %v1134_v53  ;;  %v1139_v8 = vmul.f32 0.2, %v1079_v60  ;;  %vm1123_vm6 = vcmp.gt.f32.partialorder %v1079_v60, 0.0  ;;  %4516 = vmatpush3.bf16.msra.mxu0 %v4897_v52  ;;  %v4898_v53 = vld [vmem:[#allocation7 + $0x50] sm:$0xff]   ;;  %v4901_v55 = vld [vmem:[#allocation8 + $0xb8] sm:$0xff]   ;;  %v5095_v52 = vld [vmem:[%s5559_s11 + $0x28] sm:$0xff] }
 0x302   : > { %v4466_v61 = vpop.f32.mrf.mxu0  ;;  %v1165_v62 = vpack.c.bf16 %v1150_v58, %v1149_v57  ;;  %4517 = vmatprep.subr.bf16.mxu0 %v4898_v53  ;;  %4539 = vmatprep.subr.bf16.mxu1 %v4901_v55  ;;  %v4903_v57 = vld [vmem:[#allocation8 + $0xa8] sm:$0xff]   ;;  %v4904_v58 = vld [vmem:[#allocation8 + $0xa0] sm:$0xff]  }
 0x303   : > { %v1082_v1 = vadd.f32 %v4466_v61, %v5655_v41  ;;  %v1137_v4 = vmul.f32 0.2, %v1071_v56  ;;  %vm1121_vm5 = vcmp.gt.f32.partialorder %v1071_v56, 0.0  ;;  %v1155_v18 = vsel %vm1123_vm6, %v1079_v60, %v1139_v8  ;;  %v5087_v60 = vld [vmem:[#allocation5] sm:$0x1] }
 0x304   : > { %v1073_v2 = vpop.f32.mrf.mxu0  ;;  %4491 = vmatprep.mubr.bf16.mxu1 %v1165_v62  ;;  %v468_v61 = vsub.f32 1.0, %v5087_v60 }
 0x305   : > { %vm1124_vm4 = vcmp.gt.f32.partialorder %v1082_v1, 0.0  ;;  %v1140_v6 = vmul.f32 0.2, %v1082_v1  ;;  %v1074_v7 = vadd.f32 %v5655_v41, %v1073_v2  ;;  %4492 = vmatmul.mubr.bf16.vlgmr.msra.gmra.mxu1 %v1166_v63  ;;  %v1153_v14 = vsel %vm1121_vm5, %v1071_v56, %v1137_v4  ;;  %4518 = vmatpush3.bf16.msra.mxu0 %v4898_v53  ;;  %v4902_v56 = vld [vmem:[#allocation8 + $0xb0] sm:$0xff]   ;;  %v5676_v63 = vld [vmem:[%s6837_s7] ss:$0 sm:$0xff] }
 0x306   : > { %v4469_v9 = vpop.f32.mrf.mxu0  ;;  %4540 = vmatpush3.bf16.msra.mxu1 %v4901_v55  ;;  %v5680_v4 = vrot.slane %v468_v61, %v5574_v5 }
 0x307   : > { %vm1122_vm7 = vcmp.gt.f32.partialorder %v1074_v7, 0.0  ;;  %v1138_v10 = vmul.f32 0.2, %v1074_v7  ;;  %v1156_v12 = vsel %vm1124_vm4, %v1082_v1, %v1140_v6  ;;  %v1095_v16 = vadd.f32 %v4469_v9, %v5655_v41  ;;  %4541 = vmatprep.subr.bf16.mxu1 %v4902_v56 }
 0x308   : > { %v1086_v11 = vpop.f32.mrf.mxu0  ;;  %v1168_v20 = vpack.c.bf16 %v1156_v12, %v1155_v18 }
 0x309   : > { %v1087_v13 = vadd.f32 %v5655_v41, %v1086_v11  ;;  %v1154_v15 = vsel %vm1122_vm7, %v1074_v7, %v1138_v10  ;;  %v1143_v26 = vmul.f32 0.2, %v1095_v16  ;;  %vm1127_vm10 = vcmp.gt.f32.partialorder %v1095_v16, 0.0  ;;  %v5685_v11 = vld [vmem:[#allocation5 + $0x1] sm:$0x1] }
 0x30a   : > { %v4470_v3 = vpop.f32.mrf.mxu0  ;;  %v1167_v17 = vpack.c.bf16 %v1154_v15, %v1153_v14  ;;  %4542 = vmatpush3.bf16.msra.mxu1 %v4902_v56  ;;  %v5696_v18 = vrot.slane %v5685_v11, %v5574_v5 }
 0x30b   : > { %v1098_v19 = vadd.f32 %v4470_v3, %v5655_v41  ;;  %v1141_v22 = vmul.f32 0.2, %v1087_v13  ;;  %vm1125_vm9 = vcmp.gt.f32.partialorder %v1087_v13, 0.0  ;;  %v1159_v36 = vsel %vm1127_vm10, %v1095_v16, %v1143_v26  ;;  %4543 = vmatprep.subr.bf16.mxu1 %v4903_v57  ;;  %v5088_v16 = vld [vmem:[%s5559_s11 + $0x18] sm:$0xff] }
 0x30c   : > { %v1089_v21 = vpop.f32.mrf.mxu0  ;;  %4495 = vmatprep.mubr.bf16.mxu1 %v1167_v17 }
 0x30d   : > { %vm1128_vm8 = vcmp.gt.f32.partialorder %v1098_v19, 0.0  ;;  %v1144_v24 = vmul.f32 0.2, %v1098_v19  ;;  %v1090_v25 = vadd.f32 %v5655_v41, %v1089_v21  ;;  %4496 = vmatmul.mubr.bf16.gmra.mxu1 %v1168_v20  ;;  %v1157_v32 = vsel %vm1125_vm9, %v1087_v13, %v1141_v22  ;;  %v5090_v22 = vld [vmem:[%s5559_s11 + $0x10] sm:$0xff] }
 0x30e   : > { %v4473_v27 = vpop.f32.mrf.mxu0  ;;  %4544 = vmatpush3.bf16.msra.mxu1 %v4903_v57 }
 0x30f   : > { %vm1126_vm11 = vcmp.gt.f32.partialorder %v1090_v25, 0.0  ;;  %v1142_v28 = vmul.f32 0.2, %v1090_v25  ;;  %v1160_v30 = vsel %vm1128_vm8, %v1098_v19, %v1144_v24  ;;  %v1111_v34 = vadd.f32 %v4473_v27, %v5655_v41  ;;  %4545 = vmatprep.subr.bf16.mxu1 %v4904_v58  ;;  %v5089_v19 = vld [vmem:[%s5559_s11] sm:$0xff] }
 0x310   : > { %v1102_v29 = vpop.f32.mrf.mxu0  ;;  %v1170_v38 = vpack.c.bf16 %v1160_v30, %v1159_v36 }
 0x311   : > { %v1103_v31 = vadd.f32 %v5655_v41, %v1102_v29  ;;  %v1158_v33 = vsel %vm1126_vm11, %v1090_v25, %v1142_v28  ;;  %v1147_v44 = vmul.f32 0.2, %v1111_v34  ;;  %vm1131_vm14 = vcmp.gt.f32.partialorder %v1111_v34, 0.0  ;;  %v5091_v25 = vld [vmem:[%s5559_s11 + $0x8] sm:$0xff] }
 0x312   : > { %v4474_v35 = vpop.f32.mrf.mxu0  ;;  %v1169_v23 = vpack.c.bf16 %v1158_v33, %v1157_v32  ;;  %4546 = vmatpush3.bf16.msra.mxu1 %v4904_v58 }
 0x313   : > { %v1114_v37 = vadd.f32 %v4474_v35, %v5655_v41  ;;  %v1145_v40 = vmul.f32 0.2, %v1103_v31  ;;  %vm1129_vm13 = vcmp.gt.f32.partialorder %v1103_v31, 0.0  ;;  %v1163_v50 = vsel %vm1131_vm14, %v1111_v34, %v1147_v44  ;;  %4547 = vmatprep.subr.bf16.mxu1 %v4905_v59 }
 0x314   : > { %v1105_v39 = vpop.f32.mrf.mxu0  ;;  %4499 = vmatprep.mubr.bf16.mxu1 %v1169_v23 }
 0x315   : > { %vm1132_vm12 = vcmp.gt.f32.partialorder %v1114_v37, 0.0  ;;  %v1148_v42 = vmul.f32 0.2, %v1114_v37  ;;  %v1106_v43 = vadd.f32 %v5655_v41, %v1105_v39  ;;  %4500 = vmatmul.mubr.bf16.gmra.mxu1 %v1170_v38  ;;  %v1161_v47 = vsel %vm1129_vm13, %v1103_v31, %v1145_v40  ;;  %v4899_v41 = vld [vmem:[#allocation7 + $0x48] sm:$0xff]   ;;  %v5092_v39 = vld [vmem:[%s5559_s11 + $0x20] sm:$0xff] }
 0x316   : > { %4519 = vmatprep.subr.bf16.mxu0 %v4899_v41  ;;  %4548 = vmatpush3.bf16.msra.mxu1 %v4905_v59 }
 0x317   : > { %vm1130_vm15 = vcmp.gt.f32.partialorder %v1106_v43, 0.0  ;;  %v1146_v45 = vmul.f32 0.2, %v1106_v43  ;;  %v1164_v46 = vsel %vm1132_vm12, %v1114_v37, %v1148_v42  ;;  %4520 = vmatpush3.bf16.msra.mxu0 %v4899_v41 }
 0x318   : > { %v1172_v51 = vpack.c.bf16 %v1164_v46, %v1163_v50  ;;  %4521 = vmatprep.subr.bf16.mxu0 %v4900_v54  ;;  %v5094_v50 = vld [vmem:[%s5559_s11 + $0x30] sm:$0xff] }
 0x319   : > { %v1162_v48 = vsel %vm1130_vm15, %v1106_v43, %v1146_v45  ;;  %v5093_v45 = vld [vmem:[%s5559_s11 + $0x38] sm:$0xff] }
 0x31a   : > { %v1171_v49 = vpack.c.bf16 %v1162_v48, %v1161_v47 }
 0x31b   : > { %4522 = vmatpush3.bf16.msra.mxu0 %v4900_v54 }
 0x31c   : > { %4503 = vmatprep.mubr.bf16.mxu1 %v1171_v49 }
 0x31d   : > { %4504 = vmatmul.mubr.bf16.gmra.mxu1 %v1172_v51 }
 0x3c5   : > { %v4493_v62 = vpop.f32.mrf.mxu1 }
 0x3c6   : > { %v1287_v2 = vadd.f32 %v4493_v62, %v5676_v63 }
 0x3c7   : > { %v1278_v1 = vpop.f32.mrf.mxu1 }
 0x3c8   : > { %v1279_v6 = vadd.f32 %v5676_v63, %v1278_v1  ;;  %v1347_v12 = vmul.f32 %v5680_v4, %v1287_v2 }
 0x3c9   : > { %v4494_v7 = vpop.f32.mrf.mxu1 }
 0x3ca   : > { %v1290_v8 = vadd.f32 %v4494_v7, %v5676_v63  ;;  %v1345_v9 = vmul.f32 %v5680_v4, %v1279_v6  ;;  %v5702_v24 = vadd.f32 %v5090_v22, %v1347_v12  ;;  %v5096_v7 = vld [vmem:[%s5559_s11 + $0x40] sm:$0xff] }
 0x3cb   : > { %v1281_v10 = vpop.f32.mrf.mxu1 }
 0x3cc   : > { %v1348_v13 = vmul.f32 %v5680_v4, %v1290_v8  ;;  %v1282_v14 = vadd.f32 %v5676_v63, %v1281_v10  ;;  %v5699_v20 = vadd.f32 %v5089_v19, %v1345_v9  ;;  %v1383_v23 = vmul.f32 %v5696_v18, %v5702_v24  ;;  %v5097_v10 = vld [vmem:[%s5559_s11 + $0x58] sm:$0xff]  ;;  %v5099_v19 = vld [vmem:[%s5559_s11 + $0x48] sm:$0xff] }
 0x3cd   : > { %v4497_v15 = vpop.f32.mrf.mxu1 }
 0x3ce   : > { %v5691_v3 = vadd.f32 %v5088_v16, %v1348_v13  ;;  %v1346_v17 = vmul.f32 %v5680_v4, %v1282_v14  ;;  %v1303_v27 = vadd.f32 %v4497_v15, %v5676_v63  ;;  %v1381_v34 = vmul.f32 %v5696_v18, %v5699_v20  ;;  %v5098_v15 = vld [vmem:[%s5559_s11 + $0x50] sm:$0xff] }
 0x3cf   : > { %v1294_v21 = vpop.f32.mrf.mxu1 }
 0x3d0   : > { %v5705_v26 = vadd.f32 %v5091_v25, %v1346_v17  ;;  %v1295_v28 = vadd.f32 %v5676_v63, %v1294_v21  ;;  %v1384_v30 = vmul.f32 %v5696_v18, %v5691_v3  ;;  %v1351_v36 = vmul.f32 %v5680_v4, %v1303_v27 }
 0x3d1   : > { %v4498_v29 = vpop.f32.mrf.mxu1 }
 0x3d2   : > { %v1349_v31 = vmul.f32 %v5680_v4, %v1295_v28  ;;  %v1306_v32 = vadd.f32 %v4498_v29, %v5676_v63  ;;  %v1382_v35 = vmul.f32 %v5696_v18, %v5705_v26  ;;  %v1398_v44 = vpack.c.bf16 %v1384_v30, %v1383_v23 }
 0x3d3   : > { %v1297_v33 = vpop.f32.mrf.mxu1  ;;  %v5731_v51 = vadd.f32 %v5094_v50, %v1351_v36 }
 0x3d4   : > { %v1352_v37 = vmul.f32 %v5680_v4, %v1306_v32  ;;  %v1298_v38 = vadd.f32 %v5676_v63, %v1297_v33  ;;  %v5723_v40 = vadd.f32 %v5092_v39, %v1349_v31  ;;  %v1397_v43 = vpack.c.bf16 %v1382_v35, %v1381_v34 }
 0x3d5   : > { %v4501_v42 = vpop.f32.mrf.mxu1  ;;  %v1387_v6 = vmul.f32 %v5696_v18, %v5731_v51 }
 0x3d6   : > { %v5726_v46 = vadd.f32 %v5093_v45, %v1352_v37  ;;  %v1350_v47 = vmul.f32 %v5680_v4, %v1298_v38  ;;  %v1319_v48 = vadd.f32 %v4501_v42, %v5676_v63  ;;  %4523 = vmatprep.mubr.bf16.mxu0 %v1397_v43  ;;  %v1385_v55 = vmul.f32 %v5696_v18, %v5723_v40  ;;  %v5100_v38 = vld [vmem:[%s5559_s11 + $0x60] sm:$0xff]  ;;  %v5101_v42 = vld [vmem:[%s5559_s11 + $0x78] sm:$0xff] }
 0x3d7   : > { %v1310_v49 = vpop.f32.mrf.mxu1  ;;  %4524 = vmatmul.mubr.bf16.vlgmr.msra.gmra.mxu0 %v1398_v44 }
 0x3d8   : > { %v5734_v53 = vadd.f32 %v5095_v52, %v1350_v47  ;;  %v1311_v41 = vadd.f32 %v5676_v63, %v1310_v49  ;;  %v1388_v59 = vmul.f32 %v5696_v18, %v5726_v46  ;;  %v1355_v60 = vmul.f32 %v5680_v4, %v1319_v48  ;;  %v5102_v47 = vld [vmem:[%s5559_s11 + $0x70] sm:$0xff]  ;;  %v5103_v49 = vld [vmem:[%s5559_s11 + $0x68] sm:$0xff] }
 0x3d9   : > { %v4502_v54 = vpop.f32.mrf.mxu1 }
 0x3da   : > { %v1353_v56 = vmul.f32 %v5680_v4, %v1311_v41  ;;  %v1322_v57 = vadd.f32 %v4502_v54, %v5676_v63  ;;  %v1386_v58 = vmul.f32 %v5696_v18, %v5734_v53  ;;  %v1400_v14 = vpack.c.bf16 %v1388_v59, %v1387_v6  ;;  %v4909_v59 = vld [vmem:[#allocation8 + $0xf8] sm:$0xff]  }
 0x3db   : > { %v1313_v61 = vpop.f32.mrf.mxu1  ;;  %v5758_v16 = vadd.f32 %v5098_v15, %v1355_v60  ;;  %v4910_v60 = vld [vmem:[#allocation8 + $0xf0] sm:$0xff]   ;;  %4571 = vmatprep.subr.bf16.mxu0 %v4909_v59 }
 0x3dc   : > { %v1356_v62 = vmul.f32 %v5680_v4, %v1322_v57  ;;  %v1314_v1 = vadd.f32 %v5676_v63, %v1313_v61  ;;  %v1399_v2 = vpack.c.bf16 %v1386_v58, %v1385_v55  ;;  %v5751_v8 = vadd.f32 %v5096_v7, %v1353_v56  ;;  %v4906_v56 = vld [vmem:[#allocation8 + $0x90] sm:$0xff]   ;;  %v4907_v57 = vld [vmem:[#allocation8 + $0x88] sm:$0xff]   ;;  %v4908_v58 = vld [vmem:[#allocation8 + $0x80] sm:$0xff]   ;;  %4572 = vmatpush3.bf16.msra.mxu0 %v4909_v59 }
 0x3dd   : > { %v4505_v9 = vpop.f32.mrf.mxu1  ;;  %v1391_v34 = vmul.f32 %v5696_v18, %v5758_v16  ;;  %4549 = vmatprep.subr.bf16.mxu1 %v4906_v56  ;;  %4573 = vmatprep.subr.bf16.mxu0 %v4910_v60  ;;  %v4911_v61 = vld [vmem:[#allocation8 + $0xe8] sm:$0xff]  }
 0x3de   : > { %v5754_v12 = vadd.f32 %v5097_v10, %v1356_v62  ;;  %v1354_v13 = vmul.f32 %v5680_v4, %v1314_v1  ;;  %4527 = vmatprep.mubr.bf16.mxu0 %v1399_v2  ;;  %v1335_v22 = vadd.f32 %v4505_v9, %v5676_v63  ;;  %v1389_v28 = vmul.f32 %v5696_v18, %v5751_v8  ;;  %v4913_v62 = vld [vmem:[#allocation8 + $0xd8] sm:$0xff]  }
 0x3df   : > { %v1326_v17 = vpop.f32.mrf.mxu1  ;;  %4528 = vmatmul.mubr.bf16.gmra.mxu0 %v1400_v14  ;;  %4550 = vmatpush3.bf16.msra.mxu1 %v4906_v56  ;;  %v5802_v2 = vld [vmem:[%s6833_s3 + $0x1] ss:$0 sm:$0xff] }
 0x3e0   : > { %v5761_v21 = vadd.f32 %v5099_v19, %v1354_v13  ;;  %v1327_v25 = vadd.f32 %v5676_v63, %v1326_v17  ;;  %v1392_v32 = vmul.f32 %v5696_v18, %v5754_v12  ;;  %v1359_v35 = vmul.f32 %v5680_v4, %v1335_v22  ;;  %4551 = vmatprep.subr.bf16.mxu1 %v4907_v57 }
 0x3e1   : > { %v4506_v27 = vpop.f32.mrf.mxu1  ;;  %4574 = vmatpush3.bf16.msra.mxu0 %v4910_v60 }
 0x3e2   : > { %v1357_v29 = vmul.f32 %v5680_v4, %v1327_v25  ;;  %v1338_v30 = vadd.f32 %v4506_v27, %v5676_v63  ;;  %v1390_v31 = vmul.f32 %v5696_v18, %v5761_v21  ;;  %v1402_v45 = vpack.c.bf16 %v1392_v32, %v1391_v34  ;;  %4575 = vmatprep.subr.bf16.mxu0 %v4911_v61 }
 0x3e3   : > { %v1329_v33 = vpop.f32.mrf.mxu1  ;;  %v5786_v48 = vadd.f32 %v5102_v47, %v1359_v35  ;;  %4552 = vmatpush3.bf16.msra.mxu1 %v4907_v57 }
 0x3e4   : > { %v1360_v23 = vmul.f32 %v5680_v4, %v1338_v30  ;;  %v1330_v36 = vadd.f32 %v5676_v63, %v1329_v33  ;;  %v1401_v37 = vpack.c.bf16 %v1390_v31, %v1389_v28  ;;  %v5779_v39 = vadd.f32 %v5100_v38, %v1357_v29  ;;  %4553 = vmatprep.subr.bf16.mxu1 %v4908_v58 }
 0x3e5   : > { %4576 = vmatpush3.bf16.msra.mxu0 %v4911_v61 }
 0x3e6   : > { %v5782_v43 = vadd.f32 %v5101_v42, %v1360_v23  ;;  %v1358_v44 = vmul.f32 %v5680_v4, %v1330_v36  ;;  %4531 = vmatprep.mubr.bf16.mxu0 %v1401_v37  ;;  %v1393_v63 = vmul.f32 %v5696_v18, %v5779_v39  ;;  %v1395_v4 = vmul.f32 %v5696_v18, %v5786_v48 }
 0x3e7   : > { %4532 = vmatmul.mubr.bf16.gmra.mxu0 %v1402_v45  ;;  %4554 = vmatpush3.bf16.msra.mxu1 %v4908_v58 }
 0x3e8   : > { %v5789_v50 = vadd.f32 %v5103_v49, %v1358_v44  ;;  %v1396_v41 = vmul.f32 %v5696_v18, %v5782_v43 }
 0x3ea   : > { %v1394_v52 = vmul.f32 %v5696_v18, %v5789_v50  ;;  %v1404_v55 = vpack.c.bf16 %v1396_v41, %v1395_v4  ;;  %v4912_v18 = vld [vmem:[#allocation8 + $0xe0] sm:$0xff]  }
 0x3eb   : > { %4577 = vmatprep.subr.bf16.mxu0 %v4912_v18 }
 0x3ec   : > { %v1403_v54 = vpack.c.bf16 %v1394_v52, %v1393_v63  ;;  %4578 = vmatpush3.bf16.msra.mxu0 %v4912_v18 }
 0x3ed   : > { %4579 = vmatprep.subr.bf16.mxu0 %v4913_v62 }
 0x3ee   : > { %4535 = vmatprep.mubr.bf16.mxu0 %v1403_v54 }
 0x3ef   : > { %4536 = vmatmul.mubr.bf16.gmra.mxu0 %v1404_v55 }
 0x3f0   : > { %4580 = vmatpush3.bf16.msra.mxu0 %v4913_v62 }
 0x497   : > { %v4525_v1 = vpop.f32.mrf.mxu0 }
 0x498   : > { %v1521_v9 = vadd.f32 %v4525_v1, %v5802_v2 }
 0x499   : > { %v1512_v6 = vpop.f32.mrf.mxu0 }
 0x49a   : > { %v1513_v7 = vadd.f32 %v5802_v2, %v1512_v6  ;;  %v1593_v22 = vmul.f32 0.2, %v1521_v9  ;;  %vm1577_vm2 = vcmp.gt.f32.partialorder %v1521_v9, 0.0 }
 0x49b   : > { %v4526_v10 = vpop.f32.mrf.mxu0 }
 0x49c   : > { %v1524_v13 = vadd.f32 %v4526_v10, %v5802_v2  ;;  %v1591_v15 = vmul.f32 0.2, %v1513_v7  ;;  %vm1575_vm1 = vcmp.gt.f32.partialorder %v1513_v7, 0.0  ;;  %v1609_v33 = vsel %vm1577_vm2, %v1521_v9, %v1593_v22 }
 0x49d   : > { %v1515_v14 = vpop.f32.mrf.mxu0 }
 0x49e   : > { %vm1578_vm0 = vcmp.gt.f32.partialorder %v1524_v13, 0.0  ;;  %v1594_v17 = vmul.f32 0.2, %v1524_v13  ;;  %v1516_v19 = vadd.f32 %v5802_v2, %v1515_v14  ;;  %v1607_v31 = vsel %vm1575_vm1, %v1513_v7, %v1591_v15 }
 0x49f   : > { %v4529_v25 = vpop.f32.mrf.mxu0 }
 0x4a0   : > { %vm1576_vm3 = vcmp.gt.f32.partialorder %v1516_v19, 0.0  ;;  %v1592_v27 = vmul.f32 0.2, %v1516_v19  ;;  %v1610_v28 = vsel %vm1578_vm0, %v1524_v13, %v1594_v17  ;;  %v1537_v34 = vadd.f32 %v4529_v25, %v5802_v2 }
 0x4a1   : > { %v1528_v29 = vpop.f32.mrf.mxu0  ;;  %v1624_v36 = vpack.c.bf16 %v1610_v28, %v1609_v33 }
 0x4a2   : > { %v1529_v30 = vadd.f32 %v5802_v2, %v1528_v29  ;;  %v1608_v32 = vsel %vm1576_vm3, %v1516_v19, %v1592_v27  ;;  %v1597_v47 = vmul.f32 0.2, %v1537_v34  ;;  %vm1581_vm6 = vcmp.gt.f32.partialorder %v1537_v34, 0.0 }
 0x4a3   : > { %v4530_v35 = vpop.f32.mrf.mxu0  ;;  %v1623_v23 = vpack.c.bf16 %v1608_v32, %v1607_v31 }
 0x4a4   : > { %v1540_v37 = vadd.f32 %v4530_v35, %v5802_v2  ;;  %v1595_v42 = vmul.f32 0.2, %v1529_v30  ;;  %vm1579_vm5 = vcmp.gt.f32.partialorder %v1529_v30, 0.0  ;;  %v1613_v59 = vsel %vm1581_vm6, %v1537_v34, %v1597_v47  ;;  %v4914_v47 = vld [vmem:[#allocation8 + $0xd0] sm:$0xff]  }
 0x4a5   : > { %v1531_v38 = vpop.f32.mrf.mxu0  ;;  %4555 = vmatprep.mubr.bf16.mxu1 %v1623_v23  ;;  %4581 = vmatprep.subr.bf16.mxu0 %v4914_v47 }
 0x4a6   : > { %vm1582_vm4 = vcmp.gt.f32.partialorder %v1540_v37, 0.0  ;;  %v1598_v44 = vmul.f32 0.2, %v1540_v37  ;;  %v1532_v45 = vadd.f32 %v5802_v2, %v1531_v38  ;;  %4556 = vmatmul.mubr.bf16.vlgmr.msra.gmra.mxu1 %v1624_v36  ;;  %v1611_v4 = vsel %vm1579_vm5, %v1529_v30, %v1595_v42  ;;  %4582 = vmatpush3.bf16.msra.mxu0 %v4914_v47 }
 0x4a7   : > { %v4533_v49 = vpop.f32.mrf.mxu0 }
 0x4a8   : > { %vm1580_vm7 = vcmp.gt.f32.partialorder %v1532_v45, 0.0  ;;  %v1596_v63 = vmul.f32 0.2, %v1532_v45  ;;  %v1614_v41 = vsel %vm1582_vm4, %v1540_v37, %v1598_v44  ;;  %v1553_v56 = vadd.f32 %v4533_v49, %v5802_v2  ;;  %v4915_v49 = vld [vmem:[#allocation8 + $0xc8] sm:$0xff]  }
 0x4a9   : > { %v1544_v52 = vpop.f32.mrf.mxu0  ;;  %v1626_v61 = vpack.c.bf16 %v1614_v41, %v1613_v59  ;;  %4583 = vmatprep.subr.bf16.mxu0 %v4915_v49  ;;  %v4919_v41 = vld [vmem:[#allocation10 + $0x68] sm:$0xff]  }
 0x4aa   : > { %v1545_v54 = vadd.f32 %v5802_v2, %v1544_v52  ;;  %v1612_v55 = vsel %vm1580_vm7, %v1532_v45, %v1596_v63  ;;  %v1601_v7 = vmul.f32 0.2, %v1553_v56  ;;  %vm1585_vm10 = vcmp.gt.f32.partialorder %v1553_v56, 0.0  ;;  %4584 = vmatpush3.bf16.msra.mxu0 %v4915_v49  ;;  %v4917_v63 = vld [vmem:[#allocation10 + $0x78] sm:$0xff]   ;;  %v4918_v52 = vld [vmem:[#allocation10 + $0x70] sm:$0xff]  }
 0x4ab   : > { %v4534_v57 = vpop.f32.mrf.mxu0  ;;  %v1625_v58 = vpack.c.bf16 %v1612_v55, %v1611_v4  ;;  %4603 = vmatprep.subr.bf16.mxu1 %v4917_v63  ;;  %v4921_v4 = vld [vmem:[#allocation10 + $0x58] sm:$0xff]  }
 0x4ac   : > { %v1556_v60 = vadd.f32 %v4534_v57, %v5802_v2  ;;  %v1599_v62 = vmul.f32 0.2, %v1545_v54  ;;  %vm1583_vm9 = vcmp.gt.f32.partialorder %v1545_v54, 0.0  ;;  %v1617_v28 = vsel %vm1585_vm10, %v1553_v56, %v1601_v7  ;;  %4604 = vmatpush3.bf16.msra.mxu1 %v4917_v63  ;;  %v5823_v56 = vld [vmem:[%s6835_s5 + $0x2] ss:$0 sm:$0xff] }
 0x4ad   : > { %v1547_v18 = vpop.f32.mrf.mxu0  ;;  %4559 = vmatprep.mubr.bf16.mxu1 %v1625_v58  ;;  %4605 = vmatprep.subr.bf16.mxu1 %v4918_v52 }
 0x4ae   : > { %vm1586_vm8 = vcmp.gt.f32.partialorder %v1556_v60, 0.0  ;;  %v1602_v1 = vmul.f32 0.2, %v1556_v60  ;;  %v1548_v6 = vadd.f32 %v5802_v2, %v1547_v18  ;;  %4560 = vmatmul.mubr.bf16.gmra.mxu1 %v1626_v61  ;;  %v1615_v17 = vsel %vm1583_vm9, %v1545_v54, %v1599_v62  ;;  %v4920_v54 = vld [vmem:[#allocation10 + $0x60] sm:$0xff]  }
 0x4af   : > { %v4537_v9 = vpop.f32.mrf.mxu0 }
 0x4b0   : > { %vm1584_vm11 = vcmp.gt.f32.partialorder %v1548_v6, 0.0  ;;  %v1600_v10 = vmul.f32 0.2, %v1548_v6  ;;  %v1618_v14 = vsel %vm1586_vm8, %v1556_v60, %v1602_v1  ;;  %v1569_v22 = vadd.f32 %v4537_v9, %v5802_v2  ;;  %4606 = vmatpush3.bf16.msra.mxu1 %v4918_v52 }
 0x4b1   : > { %v1560_v13 = vpop.f32.mrf.mxu0  ;;  %v1628_v30 = vpack.c.bf16 %v1618_v14, %v1617_v28  ;;  %4607 = vmatprep.subr.bf16.mxu1 %v4919_v41 }
 0x4b2   : > { %v1561_v15 = vadd.f32 %v5802_v2, %v1560_v13  ;;  %v1616_v19 = vsel %vm1584_vm11, %v1548_v6, %v1600_v10  ;;  %v1605_v35 = vmul.f32 0.2, %v1569_v22  ;;  %vm1589_vm14 = vcmp.gt.f32.partialorder %v1569_v22, 0.0 }
 0x4b3   : > { %v4538_v25 = vpop.f32.mrf.mxu0  ;;  %v1627_v27 = vpack.c.bf16 %v1616_v19, %v1615_v17 }
 0x4b4   : > { %v1572_v29 = vadd.f32 %v4538_v25, %v5802_v2  ;;  %v1603_v32 = vmul.f32 0.2, %v1561_v15  ;;  %vm1587_vm13 = vcmp.gt.f32.partialorder %v1561_v15, 0.0  ;;  %v1621_v44 = vsel %vm1589_vm14, %v1569_v22, %v1605_v35  ;;  %4608 = vmatpush3.bf16.msra.mxu1 %v4919_v41 }
 0x4b5   : > { %v1563_v31 = vpop.f32.mrf.mxu0  ;;  %4563 = vmatprep.mubr.bf16.mxu1 %v1627_v27  ;;  %4609 = vmatprep.subr.bf16.mxu1 %v4920_v54 }
 0x4b6   : > { %vm1590_vm12 = vcmp.gt.f32.partialorder %v1572_v29, 0.0  ;;  %v1606_v33 = vmul.f32 0.2, %v1572_v29  ;;  %v1564_v34 = vadd.f32 %v5802_v2, %v1563_v31  ;;  %4564 = vmatmul.mubr.bf16.gmra.mxu1 %v1628_v30  ;;  %v1619_v37 = vsel %vm1587_vm13, %v1561_v15, %v1603_v32  ;;  %v4916_v2 = vld [vmem:[#allocation8 + $0xc0] sm:$0xff]  }
 0x4b7   : > { %4585 = vmatprep.subr.bf16.mxu0 %v4916_v2 }
 0x4b8   : > { %vm1588_vm15 = vcmp.gt.f32.partialorder %v1564_v34, 0.0  ;;  %v1604_v23 = vmul.f32 0.2, %v1564_v34  ;;  %v1622_v36 = vsel %vm1590_vm12, %v1572_v29, %v1606_v33  ;;  %4586 = vmatpush3.bf16.msra.mxu0 %v4916_v2  ;;  %4610 = vmatpush3.bf16.msra.mxu1 %v4920_v54 }
 0x4b9   : > { %v1630_v45 = vpack.c.bf16 %v1622_v36, %v1621_v44  ;;  %4611 = vmatprep.subr.bf16.mxu1 %v4921_v4 }
 0x4ba   : > { %v1620_v38 = vsel %vm1588_vm15, %v1564_v34, %v1604_v23 }
 0x4bb   : > { %v1629_v42 = vpack.c.bf16 %v1620_v38, %v1619_v37 }
 0x4bc   : > { %4612 = vmatpush3.bf16.msra.mxu1 %v4921_v4 }
 0x4bd   : > { %4567 = vmatprep.mubr.bf16.mxu1 %v1629_v42 }
 0x4be   : > { %4568 = vmatmul.mubr.bf16.gmra.mxu1 %v1630_v45 }
 0x566   : > { %v4557_v55 = vpop.f32.mrf.mxu1 }
 0x567   : > { %v1747_v59 = vadd.f32 %v4557_v55, %v5823_v56 }
 0x568   : > { %v1738_v57 = vpop.f32.mrf.mxu1 }
 0x569   : > { %v1739_v58 = vadd.f32 %v5823_v56, %v1738_v57  ;;  %v1819_v7 = vmul.f32 0.2, %v1747_v59  ;;  %vm1803_vm2 = vcmp.gt.f32.partialorder %v1747_v59, 0.0 }
 0x56a   : > { %v4558_v60 = vpop.f32.mrf.mxu1 }
 0x56b   : > { %v1750_v61 = vadd.f32 %v4558_v60, %v5823_v56  ;;  %v1817_v62 = vmul.f32 0.2, %v1739_v58  ;;  %vm1801_vm1 = vcmp.gt.f32.partialorder %v1739_v58, 0.0  ;;  %v1835_v22 = vsel %vm1803_vm2, %v1747_v59, %v1819_v7 }
 0x56c   : > { %v1741_v18 = vpop.f32.mrf.mxu1 }
 0x56d   : > { %vm1804_vm0 = vcmp.gt.f32.partialorder %v1750_v61, 0.0  ;;  %v1820_v1 = vmul.f32 0.2, %v1750_v61  ;;  %v1742_v6 = vadd.f32 %v5823_v56, %v1741_v18  ;;  %v1833_v17 = vsel %vm1801_vm1, %v1739_v58, %v1817_v62 }
 0x56e   : > { %v4561_v9 = vpop.f32.mrf.mxu1 }
 0x56f   : > { %vm1802_vm3 = vcmp.gt.f32.partialorder %v1742_v6, 0.0  ;;  %v1818_v10 = vmul.f32 0.2, %v1742_v6  ;;  %v1836_v13 = vsel %vm1804_vm0, %v1750_v61, %v1820_v1  ;;  %v1763_v25 = vadd.f32 %v4561_v9, %v5823_v56 }
 0x570   : > { %v1754_v14 = vpop.f32.mrf.mxu1  ;;  %v1850_v29 = vpack.c.bf16 %v1836_v13, %v1835_v22 }
 0x571   : > { %v1755_v15 = vadd.f32 %v5823_v56, %v1754_v14  ;;  %v1834_v19 = vsel %vm1802_vm3, %v1742_v6, %v1818_v10  ;;  %v1823_v35 = vmul.f32 0.2, %v1763_v25  ;;  %vm1807_vm6 = vcmp.gt.f32.partialorder %v1763_v25, 0.0 }
 0x572   : > { %v4562_v27 = vpop.f32.mrf.mxu1  ;;  %v1849_v28 = vpack.c.bf16 %v1834_v19, %v1833_v17 }
 0x573   : > { %v1766_v30 = vadd.f32 %v4562_v27, %v5823_v56  ;;  %v1821_v32 = vmul.f32 0.2, %v1755_v15  ;;  %vm1805_vm5 = vcmp.gt.f32.partialorder %v1755_v15, 0.0  ;;  %v1839_v63 = vsel %vm1807_vm6, %v1763_v25, %v1823_v35  ;;  %v4922_v35 = vld [vmem:[#allocation10 + $0x50] sm:$0xff]  }
 0x574   : > { %v1757_v31 = vpop.f32.mrf.mxu1  ;;  %4587 = vmatprep.mubr.bf16.mxu0 %v1849_v28  ;;  %4613 = vmatprep.subr.bf16.mxu1 %v4922_v35 }
 0x575   : > { %vm1808_vm4 = vcmp.gt.f32.partialorder %v1766_v30, 0.0  ;;  %v1824_v33 = vmul.f32 0.2, %v1766_v30  ;;  %v1758_v34 = vadd.f32 %v5823_v56, %v1757_v31  ;;  %4588 = vmatmul.mubr.bf16.vlgmr.msra.gmra.mxu0 %v1850_v29  ;;  %v1837_v44 = vsel %vm1805_vm5, %v1755_v15, %v1821_v32  ;;  %4614 = vmatpush3.bf16.msra.mxu1 %v4922_v35 }
 0x576   : > { %v4565_v23 = vpop.f32.mrf.mxu1 }
 0x577   : > { %vm1806_vm7 = vcmp.gt.f32.partialorder %v1758_v34, 0.0  ;;  %v1822_v36 = vmul.f32 0.2, %v1758_v34  ;;  %v1840_v38 = vsel %vm1808_vm4, %v1766_v30, %v1824_v33  ;;  %v1779_v47 = vadd.f32 %v4565_v23, %v5823_v56  ;;  %v4923_v23 = vld [vmem:[#allocation10 + $0x48] sm:$0xff]  }
 0x578   : > { %v1770_v37 = vpop.f32.mrf.mxu1  ;;  %v1852_v41 = vpack.c.bf16 %v1840_v38, %v1839_v63  ;;  %4615 = vmatprep.subr.bf16.mxu1 %v4923_v23  ;;  %v4927_v38 = vld [vmem:[#allocation7 + $0xa8] sm:$0xff]  }
 0x579   : > { %v1771_v42 = vadd.f32 %v5823_v56, %v1770_v37  ;;  %v1838_v45 = vsel %vm1806_vm7, %v1758_v34, %v1822_v36  ;;  %v1827_v58 = vmul.f32 0.2, %v1779_v47  ;;  %vm1811_vm10 = vcmp.gt.f32.partialorder %v1779_v47, 0.0  ;;  %4616 = vmatpush3.bf16.msra.mxu1 %v4923_v23  ;;  %v4925_v36 = vld [vmem:[#allocation7 + $0xb8] sm:$0xff]   ;;  %v4926_v37 = vld [vmem:[#allocation7 + $0xb0] sm:$0xff]  }
 0x57a   : > { %v4566_v49 = vpop.f32.mrf.mxu1  ;;  %v1851_v2 = vpack.c.bf16 %v1838_v45, %v1837_v44  ;;  %4635 = vmatprep.subr.bf16.mxu0 %v4925_v36  ;;  %v5844_v45 = vld [vmem:[%s6835_s5 + $0x3] ss:$0 sm:$0xff] }
 0x57b   : > { %v1782_v52 = vadd.f32 %v4566_v49, %v5823_v56  ;;  %v1825_v4 = vmul.f32 0.2, %v1771_v42  ;;  %vm1809_vm9 = vcmp.gt.f32.partialorder %v1771_v42, 0.0  ;;  %v1843_v13 = vsel %vm1811_vm10, %v1779_v47, %v1827_v58  ;;  %4636 = vmatpush3.bf16.msra.mxu0 %v4925_v36 }
 0x57c   : > { %v1773_v54 = vpop.f32.mrf.mxu1  ;;  %4591 = vmatprep.mubr.bf16.mxu0 %v1851_v2  ;;  %4637 = vmatprep.subr.bf16.mxu0 %v4926_v37 }
 0x57d   : > { %vm1812_vm8 = vcmp.gt.f32.partialorder %v1782_v52, 0.0  ;;  %v1828_v55 = vmul.f32 0.2, %v1782_v52  ;;  %v1774_v57 = vadd.f32 %v5823_v56, %v1773_v54  ;;  %4592 = vmatmul.mubr.bf16.gmra.mxu0 %v1852_v41  ;;  %v1841_v1 = vsel %vm1809_vm9, %v1771_v42, %v1825_v4  ;;  %v4928_v42 = vld [vmem:[#allocation7 + $0xa0] sm:$0xff]  }
 0x57e   : > { %v4569_v59 = vpop.f32.mrf.mxu1 }
 0x57f   : > { %vm1810_vm11 = vcmp.gt.f32.partialorder %v1774_v57, 0.0  ;;  %v1826_v60 = vmul.f32 0.2, %v1774_v57  ;;  %v1844_v18 = vsel %vm1812_vm8, %v1782_v52, %v1828_v55  ;;  %v1795_v7 = vadd.f32 %v4569_v59, %v5823_v56  ;;  %4638 = vmatpush3.bf16.msra.mxu0 %v4926_v37 }
 0x580   : > { %v1786_v61 = vpop.f32.mrf.mxu1  ;;  %v1854_v15 = vpack.c.bf16 %v1844_v18, %v1843_v13  ;;  %4639 = vmatprep.subr.bf16.mxu0 %v4927_v38 }
 0x581   : > { %v1787_v62 = vadd.f32 %v5823_v56, %v1786_v61  ;;  %v1842_v6 = vsel %vm1810_vm11, %v1774_v57, %v1826_v60  ;;  %v1831_v27 = vmul.f32 0.2, %v1795_v7  ;;  %vm1815_vm14 = vcmp.gt.f32.partialorder %v1795_v7, 0.0 }
 0x582   : > { %v4570_v9 = vpop.f32.mrf.mxu1  ;;  %v1853_v10 = vpack.c.bf16 %v1842_v6, %v1841_v1 }
 0x583   : > { %v1798_v14 = vadd.f32 %v4570_v9, %v5823_v56  ;;  %v1829_v19 = vmul.f32 0.2, %v1787_v62  ;;  %vm1813_vm13 = vcmp.gt.f32.partialorder %v1787_v62, 0.0  ;;  %v1847_v33 = vsel %vm1815_vm14, %v1795_v7, %v1831_v27  ;;  %4640 = vmatpush3.bf16.msra.mxu0 %v4927_v38 }
 0x584   : > { %v1789_v17 = vpop.f32.mrf.mxu1  ;;  %4595 = vmatprep.mubr.bf16.mxu0 %v1853_v10  ;;  %4641 = vmatprep.subr.bf16.mxu0 %v4928_v42 }
 0x585   : > { %vm1816_vm12 = vcmp.gt.f32.partialorder %v1798_v14, 0.0  ;;  %v1832_v22 = vmul.f32 0.2, %v1798_v14  ;;  %v1790_v25 = vadd.f32 %v5823_v56, %v1789_v17  ;;  %4596 = vmatmul.mubr.bf16.gmra.mxu0 %v1854_v15  ;;  %v1845_v30 = vsel %vm1813_vm13, %v1787_v62, %v1829_v19  ;;  %v4924_v56 = vld [vmem:[#allocation10 + $0x40] sm:$0xff]  }
 0x586   : > { %4617 = vmatprep.subr.bf16.mxu1 %v4924_v56 }
 0x587   : > { %vm1814_vm15 = vcmp.gt.f32.partialorder %v1790_v25, 0.0  ;;  %v1830_v28 = vmul.f32 0.2, %v1790_v25  ;;  %v1848_v29 = vsel %vm1816_vm12, %v1798_v14, %v1832_v22  ;;  %4618 = vmatpush3.bf16.msra.mxu1 %v4924_v56  ;;  %4642 = vmatpush3.bf16.msra.mxu0 %v4928_v42 }
 0x588   : > { %v1856_v34 = vpack.c.bf16 %v1848_v29, %v1847_v33 }
 0x589   : > { %v1846_v31 = vsel %vm1814_vm15, %v1790_v25, %v1830_v28 }
 0x58a   : > { %v1855_v32 = vpack.c.bf16 %v1846_v31, %v1845_v30 }
 0x58c   : > { %4599 = vmatprep.mubr.bf16.mxu0 %v1855_v32 }
 0x58d   : > { %4600 = vmatmul.mubr.bf16.gmra.mxu0 %v1856_v34 }
 0x635   : > { %v4589_v44 = vpop.f32.mrf.mxu0 }
 0x636   : > { %v1973_v2 = vadd.f32 %v4589_v44, %v5844_v45 }
 0x637   : > { %v1964_v47 = vpop.f32.mrf.mxu0 }
 0x638   : > { %v1965_v49 = vadd.f32 %v5844_v45, %v1964_v47  ;;  %v2045_v57 = vmul.f32 0.2, %v1973_v2  ;;  %vm2029_vm2 = vcmp.gt.f32.partialorder %v1973_v2, 0.0 }
 0x639   : > { %v4590_v63 = vpop.f32.mrf.mxu0 }
 0x63a   : > { %v1976_v52 = vadd.f32 %v4590_v63, %v5844_v45  ;;  %v2043_v54 = vmul.f32 0.2, %v1965_v49  ;;  %vm2027_vm1 = vcmp.gt.f32.partialorder %v1965_v49, 0.0  ;;  %v2061_v6 = vsel %vm2029_vm2, %v1973_v2, %v2045_v57 }
 0x63b   : > { %v1967_v41 = vpop.f32.mrf.mxu0 }
 0x63c   : > { %vm2030_vm0 = vcmp.gt.f32.partialorder %v1976_v52, 0.0  ;;  %v2046_v4 = vmul.f32 0.2, %v1976_v52  ;;  %v1968_v55 = vadd.f32 %v5844_v45, %v1967_v41  ;;  %v2059_v62 = vsel %vm2027_vm1, %v1965_v49, %v2043_v54 }
 0x63d   : > { %v4593_v58 = vpop.f32.mrf.mxu0 }
 0x63e   : > { %vm2028_vm3 = vcmp.gt.f32.partialorder %v1968_v55, 0.0  ;;  %v2044_v59 = vmul.f32 0.2, %v1968_v55  ;;  %v2062_v60 = vsel %vm2030_vm0, %v1976_v52, %v2046_v4  ;;  %v1989_v7 = vadd.f32 %v4593_v58, %v5844_v45 }
 0x63f   : > { %v1980_v61 = vpop.f32.mrf.mxu0  ;;  %v2076_v13 = vpack.c.bf16 %v2062_v60, %v2061_v6 }
 0x640   : > { %v1981_v18 = vadd.f32 %v5844_v45, %v1980_v61  ;;  %v2060_v1 = vsel %vm2028_vm3, %v1968_v55, %v2044_v59  ;;  %v2049_v25 = vmul.f32 0.2, %v1989_v7  ;;  %vm2033_vm6 = vcmp.gt.f32.partialorder %v1989_v7, 0.0 }
 0x641   : > { %v4594_v9 = vpop.f32.mrf.mxu0  ;;  %v2075_v10 = vpack.c.bf16 %v2060_v1, %v2059_v62 }
 0x642   : > { %v1992_v14 = vadd.f32 %v4594_v9, %v5844_v45  ;;  %v2047_v17 = vmul.f32 0.2, %v1981_v18  ;;  %vm2031_vm5 = vcmp.gt.f32.partialorder %v1981_v18, 0.0  ;;  %v2065_v56 = vsel %vm2033_vm6, %v1989_v7, %v2049_v25  ;;  %v4929_v25 = vld [vmem:[#allocation7 + $0x98] sm:$0xff]  }
 0x643   : > { %v1983_v15 = vpop.f32.mrf.mxu0  ;;  %4619 = vmatprep.mubr.bf16.mxu1 %v2075_v10  ;;  %4643 = vmatprep.subr.bf16.mxu0 %v4929_v25 }
 0x644   : > { %vm2034_vm4 = vcmp.gt.f32.partialorder %v1992_v14, 0.0  ;;  %v2050_v19 = vmul.f32 0.2, %v1992_v14  ;;  %v1984_v22 = vadd.f32 %v5844_v45, %v1983_v15  ;;  %4620 = vmatmul.mubr.bf16.vlgmr.msra.gmra.mxu1 %v2076_v13  ;;  %v2063_v32 = vsel %vm2031_vm5, %v1981_v18, %v2047_v17  ;;  %4644 = vmatpush3.bf16.msra.mxu0 %v4929_v25 }
 0x645   : > { %v4597_v27 = vpop.f32.mrf.mxu0 }
 0x646   : > { %vm2032_vm7 = vcmp.gt.f32.partialorder %v1984_v22, 0.0  ;;  %v2048_v28 = vmul.f32 0.2, %v1984_v22  ;;  %v2066_v30 = vsel %vm2034_vm4, %v1992_v14, %v2050_v19  ;;  %v2005_v34 = vadd.f32 %v4597_v27, %v5844_v45  ;;  %v4930_v27 = vld [vmem:[#allocation7 + $0x90] sm:$0xff]  }
 0x647   : > { %v1996_v29 = vpop.f32.mrf.mxu0  ;;  %v2078_v37 = vpack.c.bf16 %v2066_v30, %v2065_v56  ;;  %4645 = vmatprep.subr.bf16.mxu0 %v4930_v27  ;;  %v4934_v30 = vld [vmem:[#allocation8 + $0x130] sm:$0xff]  }
 0x648   : > { %v1997_v31 = vadd.f32 %v5844_v45, %v1996_v29  ;;  %v2064_v33 = vsel %vm2032_vm7, %v1984_v22, %v2048_v28  ;;  %v2053_v49 = vmul.f32 0.2, %v2005_v34  ;;  %vm2037_vm10 = vcmp.gt.f32.partialorder %v2005_v34, 0.0  ;;  %4646 = vmatpush3.bf16.msra.mxu0 %v4930_v27  ;;  %v4932_v28 = vld [vmem:[#allocation7 + $0x80] sm:$0xff]   ;;  %v4933_v29 = vld [vmem:[#allocation8 + $0x138] sm:$0xff]  }
 0x649   : > { %v4598_v35 = vpop.f32.mrf.mxu0  ;;  %v2077_v23 = vpack.c.bf16 %v2064_v33, %v2063_v32  ;;  %4667 = vmatprep.subr.bf16.mxu1 %v4933_v29  ;;  %v4936_v32 = vld [vmem:[#allocation8 + $0x120] sm:$0xff]   ;;  %v4937_v33 = vld [vmem:[#allocation8 + $0x118] sm:$0xff]  }
 0x64a   : > { %v2008_v36 = vadd.f32 %v4598_v35, %v5844_v45  ;;  %v2051_v42 = vmul.f32 0.2, %v1997_v31  ;;  %vm2035_vm9 = vcmp.gt.f32.partialorder %v1997_v31, 0.0  ;;  %v2069_v60 = vsel %vm2037_vm10, %v2005_v34, %v2053_v49  ;;  %4668 = vmatpush3.bf16.msra.mxu1 %v4933_v29  ;;  %v5875_v49 = vld [vmem:[#allocation5 + $0x2] sm:$0x1] }
 0x64b   : > { %v1999_v38 = vpop.f32.mrf.mxu0  ;;  %4623 = vmatprep.mubr.bf16.mxu1 %v2077_v23  ;;  %4669 = vmatprep.subr.bf16.mxu1 %v4934_v30  ;;  %v469_v34 = vsub.f32 1.0, %v5685_v11  ;;  %v5866_v23 = vld [vmem:[%s6837_s7 + $0x1] ss:$0 sm:$0xff] }
 0x64c   : > { %vm2038_vm8 = vcmp.gt.f32.partialorder %v2008_v36, 0.0  ;;  %v2054_v44 = vmul.f32 0.2, %v2008_v36  ;;  %v2000_v47 = vadd.f32 %v5844_v45, %v1999_v38  ;;  %4624 = vmatmul.mubr.bf16.gmra.mxu1 %v2078_v37  ;;  %v2067_v4 = vsel %vm2035_vm9, %v1997_v31, %v2051_v42  ;;  %v4935_v31 = vld [vmem:[#allocation8 + $0x128] sm:$0xff]  }
 0x64d   : > { %v4601_v2 = vpop.f32.mrf.mxu0  ;;  %v5870_v37 = vrot.slane %v469_v34, %v5574_v5 }
 0x64e   : > { %vm2036_vm11 = vcmp.gt.f32.partialorder %v2000_v47, 0.0  ;;  %v2052_v63 = vmul.f32 0.2, %v2000_v47  ;;  %v2070_v41 = vsel %vm2038_vm8, %v2008_v36, %v2054_v44  ;;  %v2021_v57 = vadd.f32 %v4601_v2, %v5844_v45  ;;  %4670 = vmatpush3.bf16.msra.mxu1 %v4934_v30 }
 0x64f   : > { %v2012_v52 = vpop.f32.mrf.mxu0  ;;  %v2080_v18 = vpack.c.bf16 %v2070_v41, %v2069_v60  ;;  %4671 = vmatprep.subr.bf16.mxu1 %v4935_v31 }
 0x650   : > { %v2013_v54 = vadd.f32 %v5844_v45, %v2012_v52  ;;  %v2068_v55 = vsel %vm2036_vm11, %v2000_v47, %v2052_v63  ;;  %v2057_v9 = vmul.f32 0.2, %v2021_v57  ;;  %vm2041_vm14 = vcmp.gt.f32.partialorder %v2021_v57, 0.0 }
 0x651   : > { %v4602_v58 = vpop.f32.mrf.mxu0  ;;  %v2079_v59 = vpack.c.bf16 %v2068_v55, %v2067_v4  ;;  %v5886_v55 = vrot.slane %v5875_v49, %v5574_v5 }
 0x652   : > { %v2024_v61 = vadd.f32 %v4602_v58, %v5844_v45  ;;  %v2055_v1 = vmul.f32 0.2, %v2013_v54  ;;  %vm2039_vm13 = vcmp.gt.f32.partialorder %v2013_v54, 0.0  ;;  %v2073_v19 = vsel %vm2041_vm14, %v2021_v57, %v2057_v9  ;;  %4672 = vmatpush3.bf16.msra.mxu1 %v4935_v31 }
 0x653   : > { %v2015_v62 = vpop.f32.mrf.mxu0  ;;  %4627 = vmatprep.mubr.bf16.mxu1 %v2079_v59  ;;  %4673 = vmatprep.subr.bf16.mxu1 %v4936_v32 }
 0x654   : > { %vm2042_vm12 = vcmp.gt.f32.partialorder %v2024_v61, 0.0  ;;  %v2058_v6 = vmul.f32 0.2, %v2024_v61  ;;  %v2016_v7 = vadd.f32 %v5844_v45, %v2015_v62  ;;  %4628 = vmatmul.mubr.bf16.gmra.mxu1 %v2080_v18  ;;  %v2071_v14 = vsel %vm2039_vm13, %v2013_v54, %v2055_v1  ;;  %v4931_v45 = vld [vmem:[#allocation7 + $0x88] sm:$0xff]  }
 0x655   : > { %4647 = vmatprep.subr.bf16.mxu0 %v4931_v45 }
 0x656   : > { %vm2040_vm15 = vcmp.gt.f32.partialorder %v2016_v7, 0.0  ;;  %v2056_v10 = vmul.f32 0.2, %v2016_v7  ;;  %v2074_v13 = vsel %vm2042_vm12, %v2024_v61, %v2058_v6  ;;  %4648 = vmatpush3.bf16.msra.mxu0 %v4931_v45  ;;  %4674 = vmatpush3.bf16.msra.mxu1 %v4936_v32 }
 0x657   : > { %v2082_v22 = vpack.c.bf16 %v2074_v13, %v2073_v19  ;;  %4649 = vmatprep.subr.bf16.mxu0 %v4932_v28  ;;  %4675 = vmatprep.subr.bf16.mxu1 %v4937_v33 }
 0x658   : > { %v2072_v15 = vsel %vm2040_vm15, %v2016_v7, %v2056_v10 }
 0x659   : > { %v2081_v17 = vpack.c.bf16 %v2072_v15, %v2071_v14 }
 0x65a   : > { %4650 = vmatpush3.bf16.msra.mxu0 %v4932_v28  ;;  %4676 = vmatpush3.bf16.msra.mxu1 %v4937_v33 }
 0x65b   : > { %4631 = vmatprep.mubr.bf16.mxu1 %v2081_v17 }
 0x65c   : > { %4632 = vmatmul.mubr.bf16.gmra.mxu1 %v2082_v22 }
 0x704   : > { %v4621_v35 = vpop.f32.mrf.mxu1 }
 0x705   : > { %v2199_v36 = vadd.f32 %v4621_v35, %v5866_v23 }
 0x706   : > { %v2190_v56 = vpop.f32.mrf.mxu1 }
 0x707   : > { %v2191_v38 = vadd.f32 %v5866_v23, %v2190_v56  ;;  %v2259_v2 = vmul.f32 %v5870_v37, %v2199_v36 }
 0x708   : > { %v4622_v42 = vpop.f32.mrf.mxu1 }
 0x709   : > { %v2202_v44 = vadd.f32 %v4622_v42, %v5866_v23  ;;  %v2257_v47 = vmul.f32 %v5870_v37, %v2191_v38  ;;  %v5892_v59 = vadd.f32 %v2259_v2, %v5702_v24 }
 0x70a   : > { %v2193_v11 = vpop.f32.mrf.mxu1 }
 0x70b   : > { %v2260_v63 = vmul.f32 %v5870_v37, %v2202_v44  ;;  %v2194_v52 = vadd.f32 %v5866_v23, %v2193_v11  ;;  %v5889_v57 = vadd.f32 %v2257_v47, %v5699_v20  ;;  %v2295_v7 = vmul.f32 %v5886_v55, %v5892_v59 }
 0x70c   : > { %v4625_v41 = vpop.f32.mrf.mxu1 }
 0x70d   : > { %v5881_v54 = vadd.f32 %v2260_v63, %v5691_v3  ;;  %v2258_v4 = vmul.f32 %v5870_v37, %v2194_v52  ;;  %v2215_v61 = vadd.f32 %v4625_v41, %v5866_v23  ;;  %v2293_v24 = vmul.f32 %v5886_v55, %v5889_v57 }
 0x70e   : > { %v2206_v58 = vpop.f32.mrf.mxu1 }
 0x70f   : > { %v5895_v60 = vadd.f32 %v2258_v4, %v5705_v26  ;;  %v2207_v3 = vadd.f32 %v5866_v23, %v2206_v58  ;;  %v2296_v62 = vmul.f32 %v5886_v55, %v5881_v54  ;;  %v2263_v9 = vmul.f32 %v5870_v37, %v2215_v61 }
 0x710   : > { %v4626_v18 = vpop.f32.mrf.mxu1 }
 0x711   : > { %v2261_v1 = vmul.f32 %v5870_v37, %v2207_v3  ;;  %v2218_v20 = vadd.f32 %v4626_v18, %v5866_v23  ;;  %v2294_v26 = vmul.f32 %v5886_v55, %v5895_v60  ;;  %v2310_v19 = vpack.c.bf16 %v2296_v62, %v2295_v7 }
 0x712   : > { %v2209_v6 = vpop.f32.mrf.mxu1  ;;  %v5921_v28 = vadd.f32 %v2263_v9, %v5731_v51 }
 0x713   : > { %v2264_v10 = vmul.f32 %v5870_v37, %v2218_v20  ;;  %v2210_v13 = vadd.f32 %v5866_v23, %v2209_v6  ;;  %v5913_v14 = vadd.f32 %v2261_v1, %v5723_v40  ;;  %v2309_v17 = vpack.c.bf16 %v2294_v26, %v2293_v24 }
 0x714   : > { %v4629_v15 = vpop.f32.mrf.mxu1  ;;  %v2299_v38 = vmul.f32 %v5886_v55, %v5921_v28 }
 0x715   : > { %v5916_v22 = vadd.f32 %v2264_v10, %v5726_v46  ;;  %v2262_v25 = vmul.f32 %v5870_v37, %v2210_v13  ;;  %v2231_v27 = vadd.f32 %v4629_v15, %v5866_v23  ;;  %4651 = vmatprep.mubr.bf16.mxu0 %v2309_v17  ;;  %v2297_v46 = vmul.f32 %v5886_v55, %v5913_v14 }
 0x716   : > { %v2222_v45 = vpop.f32.mrf.mxu1  ;;  %4652 = vmatmul.mubr.bf16.vlgmr.msra.gmra.mxu0 %v2310_v19  ;;  %v4938_v19 = vld [vmem:[#allocation8 + $0x110] sm:$0xff]  }
 0x717   : > { %v5924_v29 = vadd.f32 %v2262_v25, %v5734_v53  ;;  %v2223_v40 = vadd.f32 %v5866_v23, %v2222_v45  ;;  %v2300_v51 = vmul.f32 %v5886_v55, %v5916_v22  ;;  %v2267_v53 = vmul.f32 %v5870_v37, %v2231_v27  ;;  %4677 = vmatprep.subr.bf16.mxu1 %v4938_v19  ;;  %v4940_v25 = vld [vmem:[#allocation8 + $0x100] sm:$0xff]   ;;  %v4941_v27 = vld [vmem:[#allocation8 + $0x178] sm:$0xff]   ;;  %v4942_v45 = vld [vmem:[#allocation8 + $0x170] sm:$0xff]  }
 0x718   : > { %v4630_v30 = vpop.f32.mrf.mxu1  ;;  %4678 = vmatpush3.bf16.msra.mxu1 %v4938_v19  ;;  %4699 = vmatprep.subr.bf16.mxu0 %v4941_v27 }
 0x719   : > { %v2265_v31 = vmul.f32 %v5870_v37, %v2223_v40  ;;  %v2234_v32 = vadd.f32 %v4630_v30, %v5866_v23  ;;  %v2298_v33 = vmul.f32 %v5886_v55, %v5924_v29  ;;  %v2312_v2 = vpack.c.bf16 %v2300_v51, %v2299_v38  ;;  %4700 = vmatpush3.bf16.msra.mxu0 %v4941_v27  ;;  %v4943_v40 = vld [vmem:[#allocation8 + $0x168] sm:$0xff]   ;;  %v4945_v30 = vld [vmem:[#allocation8 + $0x158] sm:$0xff]  }
 0x71a   : > { %v2225_v34 = vpop.f32.mrf.mxu1  ;;  %v5948_v63 = vadd.f32 %v2267_v53, %v5758_v16  ;;  %4701 = vmatprep.subr.bf16.mxu0 %v4942_v45 }
 0x71b   : > { %v2268_v35 = vmul.f32 %v5870_v37, %v2234_v32  ;;  %v2226_v56 = vadd.f32 %v5866_v23, %v2225_v34  ;;  %v2311_v36 = vpack.c.bf16 %v2298_v33, %v2297_v46  ;;  %v5941_v42 = vadd.f32 %v2265_v31, %v5751_v8  ;;  %v5992_v31 = vld [vmem:[%s6833_s3 + $0x2] ss:$0 sm:$0xff] }
 0x71c   : > { %v4633_v44 = vpop.f32.mrf.mxu1  ;;  %v2303_v62 = vmul.f32 %v5886_v55, %v5948_v63 }
 0x71d   : > { %v5944_v47 = vadd.f32 %v2268_v35, %v5754_v12  ;;  %v2266_v11 = vmul.f32 %v5870_v37, %v2226_v56  ;;  %4655 = vmatprep.mubr.bf16.mxu0 %v2311_v36  ;;  %v2247_v4 = vadd.f32 %v4633_v44, %v5866_v23  ;;  %v2301_v12 = vmul.f32 %v5886_v55, %v5941_v42 }
 0x71e   : > { %v2238_v52 = vpop.f32.mrf.mxu1  ;;  %4656 = vmatmul.mubr.bf16.gmra.mxu0 %v2312_v2 }
 0x71f   : > { %v5951_v41 = vadd.f32 %v2266_v11, %v5761_v21  ;;  %v2239_v8 = vadd.f32 %v5866_v23, %v2238_v52  ;;  %v2304_v21 = vmul.f32 %v5886_v55, %v5944_v47  ;;  %v2271_v1 = vmul.f32 %v5870_v37, %v2247_v4  ;;  %4702 = vmatpush3.bf16.msra.mxu0 %v4942_v45 }
 0x720   : > { %v4634_v58 = vpop.f32.mrf.mxu1  ;;  %4703 = vmatprep.subr.bf16.mxu0 %v4943_v40 }
 0x721   : > { %v2269_v61 = vmul.f32 %v5870_v37, %v2239_v8  ;;  %v2250_v3 = vadd.f32 %v4634_v58, %v5866_v23  ;;  %v2302_v16 = vmul.f32 %v5886_v55, %v5951_v41  ;;  %v2314_v10 = vpack.c.bf16 %v2304_v21, %v2303_v62 }
 0x722   : > { %v2241_v18 = vpop.f32.mrf.mxu1  ;;  %v5976_v13 = vadd.f32 %v2271_v1, %v5786_v48 }
 0x723   : > { %v2272_v20 = vmul.f32 %v5870_v37, %v2250_v3  ;;  %v2242_v6 = vadd.f32 %v5866_v23, %v2241_v18  ;;  %v2313_v24 = vpack.c.bf16 %v2302_v16, %v2301_v12  ;;  %v5969_v26 = vadd.f32 %v2269_v61, %v5779_v39  ;;  %4704 = vmatpush3.bf16.msra.mxu0 %v4943_v40 }
 0x725   : > { %v5972_v7 = vadd.f32 %v2272_v20, %v5782_v43  ;;  %v2270_v9 = vmul.f32 %v5870_v37, %v2242_v6  ;;  %4659 = vmatprep.mubr.bf16.mxu0 %v2313_v24  ;;  %v2305_v23 = vmul.f32 %v5886_v55, %v5969_v26  ;;  %v2307_v37 = vmul.f32 %v5886_v55, %v5976_v13 }
 0x726   : > { %4660 = vmatmul.mubr.bf16.gmra.mxu0 %v2314_v10 }
 0x727   : > { %v5979_v15 = vadd.f32 %v2270_v9, %v5789_v50  ;;  %v2308_v43 = vmul.f32 %v5886_v55, %v5972_v7  ;;  %v4939_v50 = vld [vmem:[#allocation8 + $0x108] sm:$0xff]  }
 0x728   : > { %4679 = vmatprep.subr.bf16.mxu1 %v4939_v50 }
 0x729   : > { %v2306_v39 = vmul.f32 %v5886_v55, %v5979_v15  ;;  %v2316_v48 = vpack.c.bf16 %v2308_v43, %v2307_v37  ;;  %4680 = vmatpush3.bf16.msra.mxu1 %v4939_v50  ;;  %v4944_v55 = vld [vmem:[#allocation8 + $0x160] sm:$0xff]  }
 0x72a   : > { %4681 = vmatprep.subr.bf16.mxu1 %v4940_v25  ;;  %4705 = vmatprep.subr.bf16.mxu0 %v4944_v55 }
 0x72b   : > { %v2315_v17 = vpack.c.bf16 %v2306_v39, %v2305_v23  ;;  %4706 = vmatpush3.bf16.msra.mxu0 %v4944_v55 }
 0x72c   : > { %4707 = vmatprep.subr.bf16.mxu0 %v4945_v30 }
 0x72d   : > { %4663 = vmatprep.mubr.bf16.mxu0 %v2315_v17  ;;  %4682 = vmatpush3.bf16.msra.mxu1 %v4940_v25 }
 0x72e   : > { %4664 = vmatmul.mubr.bf16.gmra.mxu0 %v2316_v48 }
 0x72f   : > { %4708 = vmatpush3.bf16.msra.mxu0 %v4945_v30 }
 0x7d6   : > { %v4653_v46 = vpop.f32.mrf.mxu0 }
 0x7d7   : > { %v2433_v51 = vadd.f32 %v4653_v46, %v5992_v31 }
 0x7d8   : > { %v2424_v32 = vpop.f32.mrf.mxu0 }
 0x7d9   : > { %v2425_v33 = vadd.f32 %v5992_v31, %v2424_v32  ;;  %v2505_v44 = vmul.f32 0.2, %v2433_v51  ;;  %vm2489_vm2 = vcmp.gt.f32.partialorder %v2433_v51, 0.0 }
 0x7da   : > { %v4654_v53 = vpop.f32.mrf.mxu0 }
 0x7db   : > { %v2436_v34 = vadd.f32 %v4654_v53, %v5992_v31  ;;  %v2503_v56 = vmul.f32 0.2, %v2425_v33  ;;  %vm2487_vm1 = vcmp.gt.f32.partialorder %v2425_v33, 0.0  ;;  %v2521_v61 = vsel %vm2489_vm2, %v2433_v51, %v2505_v44 }
 0x7dc   : > { %v2427_v35 = vpop.f32.mrf.mxu0 }
 0x7dd   : > { %vm2490_vm0 = vcmp.gt.f32.partialorder %v2436_v34, 0.0  ;;  %v2506_v36 = vmul.f32 0.2, %v2436_v34  ;;  %v2428_v38 = vadd.f32 %v5992_v31, %v2427_v35  ;;  %v2519_v58 = vsel %vm2487_vm1, %v2425_v33, %v2503_v56 }
 0x7de   : > { %v4657_v11 = vpop.f32.mrf.mxu0 }
 0x7df   : > { %vm2488_vm3 = vcmp.gt.f32.partialorder %v2428_v38, 0.0  ;;  %v2504_v2 = vmul.f32 0.2, %v2428_v38  ;;  %v2522_v52 = vsel %vm2490_vm0, %v2436_v34, %v2506_v36  ;;  %v2449_v3 = vadd.f32 %v4657_v11, %v5992_v31 }
 0x7e0   : > { %v2440_v4 = vpop.f32.mrf.mxu0  ;;  %v2536_v18 = vpack.c.bf16 %v2522_v52, %v2521_v61 }
 0x7e1   : > { %v2441_v8 = vadd.f32 %v5992_v31, %v2440_v4  ;;  %v2520_v12 = vsel %vm2488_vm3, %v2428_v38, %v2504_v2  ;;  %v2509_v9 = vmul.f32 0.2, %v2449_v3  ;;  %vm2493_vm6 = vcmp.gt.f32.partialorder %v2449_v3, 0.0 }
 0x7e2   : > { %v4658_v16 = vpop.f32.mrf.mxu0  ;;  %v2535_v21 = vpack.c.bf16 %v2520_v12, %v2519_v58 }
 0x7e3   : > { %v2452_v62 = vadd.f32 %v4658_v16, %v5992_v31  ;;  %v2507_v20 = vmul.f32 0.2, %v2441_v8  ;;  %vm2491_vm5 = vcmp.gt.f32.partialorder %v2441_v8, 0.0  ;;  %v2525_v27 = vsel %vm2493_vm6, %v2449_v3, %v2509_v9  ;;  %v4946_v9 = vld [vmem:[#allocation8 + $0x150] sm:$0xff]  }
 0x7e4   : > { %v2443_v1 = vpop.f32.mrf.mxu0  ;;  %4683 = vmatprep.mubr.bf16.mxu1 %v2535_v21  ;;  %4709 = vmatprep.subr.bf16.mxu0 %v4946_v9 }
 0x7e5   : > { %vm2494_vm4 = vcmp.gt.f32.partialorder %v2452_v62, 0.0  ;;  %v2510_v6 = vmul.f32 0.2, %v2452_v62  ;;  %v2444_v24 = vadd.f32 %v5992_v31, %v2443_v1  ;;  %4684 = vmatmul.mubr.bf16.vlgmr.msra.gmra.mxu1 %v2536_v18  ;;  %v2523_v37 = vsel %vm2491_vm5, %v2441_v8, %v2507_v20  ;;  %4710 = vmatpush3.bf16.msra.mxu0 %v4946_v9 }
 0x7e6   : > { %v4661_v10 = vpop.f32.mrf.mxu0 }
 0x7e7   : > { %vm2492_vm7 = vcmp.gt.f32.partialorder %v2444_v24, 0.0  ;;  %v2508_v23 = vmul.f32 0.2, %v2444_v24  ;;  %v2526_v43 = vsel %vm2494_vm4, %v2452_v62, %v2510_v6  ;;  %v2465_v19 = vadd.f32 %v4661_v10, %v5992_v31  ;;  %v4947_v10 = vld [vmem:[#allocation8 + $0x148] sm:$0xff]  }
 0x7e8   : > { %v2456_v39 = vpop.f32.mrf.mxu0  ;;  %v2538_v40 = vpack.c.bf16 %v2526_v43, %v2525_v27  ;;  %4711 = vmatprep.subr.bf16.mxu0 %v4947_v10  ;;  %v4951_v43 = vld [vmem:[#allocation10 + $0xa8] sm:$0xff]  }
 0x7e9   : > { %v2457_v17 = vadd.f32 %v5992_v31, %v2456_v39  ;;  %v2524_v48 = vsel %vm2492_vm7, %v2444_v24, %v2508_v23  ;;  %v2513_v33 = vmul.f32 0.2, %v2465_v19  ;;  %vm2497_vm10 = vcmp.gt.f32.partialorder %v2465_v19, 0.0  ;;  %4712 = vmatpush3.bf16.msra.mxu0 %v4947_v10  ;;  %v4949_v23 = vld [vmem:[#allocation10 + $0xb8] sm:$0xff]   ;;  %v4950_v39 = vld [vmem:[#allocation10 + $0xb0] sm:$0xff]  }
 0x7ea   : > { %v4662_v50 = vpop.f32.mrf.mxu0  ;;  %v2537_v25 = vpack.c.bf16 %v2524_v48, %v2523_v37  ;;  %4731 = vmatprep.subr.bf16.mxu1 %v4949_v23  ;;  %v4953_v37 = vld [vmem:[#allocation10 + $0x98] sm:$0xff]  }
 0x7eb   : > { %v2468_v45 = vadd.f32 %v4662_v50, %v5992_v31  ;;  %v2511_v30 = vmul.f32 0.2, %v2457_v17  ;;  %vm2495_vm9 = vcmp.gt.f32.partialorder %v2457_v17, 0.0  ;;  %v2529_v52 = vsel %vm2497_vm10, %v2465_v19, %v2513_v33  ;;  %4732 = vmatpush3.bf16.msra.mxu1 %v4949_v23  ;;  %v6013_v19 = vld [vmem:[%s6835_s5 + $0x4] ss:$0 sm:$0xff] }
 0x7ec   : > { %v2459_v55 = vpop.f32.mrf.mxu0  ;;  %4687 = vmatprep.mubr.bf16.mxu1 %v2537_v25  ;;  %4733 = vmatprep.subr.bf16.mxu1 %v4950_v39 }
 0x7ed   : > { %vm2498_vm8 = vcmp.gt.f32.partialorder %v2468_v45, 0.0  ;;  %v2514_v46 = vmul.f32 0.2, %v2468_v45  ;;  %v2460_v32 = vadd.f32 %v5992_v31, %v2459_v55  ;;  %4688 = vmatmul.mubr.bf16.gmra.mxu1 %v2538_v40  ;;  %v2527_v36 = vsel %vm2495_vm9, %v2457_v17, %v2511_v30  ;;  %v4952_v17 = vld [vmem:[#allocation10 + $0xa0] sm:$0xff]  }
 0x7ee   : > { %v4665_v51 = vpop.f32.mrf.mxu0 }
 0x7ef   : > { %vm2496_vm11 = vcmp.gt.f32.partialorder %v2460_v32, 0.0  ;;  %v2512_v53 = vmul.f32 0.2, %v2460_v32  ;;  %v2530_v35 = vsel %vm2498_vm8, %v2468_v45, %v2514_v46  ;;  %v2481_v44 = vadd.f32 %v4665_v51, %v5992_v31  ;;  %4734 = vmatpush3.bf16.msra.mxu1 %v4950_v39 }
 0x7f0   : > { %v2472_v34 = vpop.f32.mrf.mxu0  ;;  %v2540_v8 = vpack.c.bf16 %v2530_v35, %v2529_v52  ;;  %4735 = vmatprep.subr.bf16.mxu1 %v4951_v43 }
 0x7f1   : > { %v2473_v56 = vadd.f32 %v5992_v31, %v2472_v34  ;;  %v2528_v38 = vsel %vm2496_vm11, %v2460_v32, %v2512_v53  ;;  %v2517_v16 = vmul.f32 0.2, %v2481_v44  ;;  %vm2501_vm14 = vcmp.gt.f32.partialorder %v2481_v44, 0.0 }
 0x7f2   : > { %v4666_v11 = vpop.f32.mrf.mxu0  ;;  %v2539_v2 = vpack.c.bf16 %v2528_v38, %v2527_v36 }
 0x7f3   : > { %v2484_v4 = vadd.f32 %v4666_v11, %v5992_v31  ;;  %v2515_v12 = vmul.f32 0.2, %v2473_v56  ;;  %vm2499_vm13 = vcmp.gt.f32.partialorder %v2473_v56, 0.0  ;;  %v2533_v6 = vsel %vm2501_vm14, %v2481_v44, %v2517_v16  ;;  %4736 = vmatpush3.bf16.msra.mxu1 %v4951_v43 }
 0x7f4   : > { %v2475_v58 = vpop.f32.mrf.mxu0  ;;  %4691 = vmatprep.mubr.bf16.mxu1 %v2539_v2  ;;  %4737 = vmatprep.subr.bf16.mxu1 %v4952_v17 }
 0x7f5   : > { %vm2502_vm12 = vcmp.gt.f32.partialorder %v2484_v4, 0.0  ;;  %v2518_v61 = vmul.f32 0.2, %v2484_v4  ;;  %v2476_v3 = vadd.f32 %v5992_v31, %v2475_v58  ;;  %4692 = vmatmul.mubr.bf16.gmra.mxu1 %v2540_v8  ;;  %v2531_v62 = vsel %vm2499_vm13, %v2473_v56, %v2515_v12  ;;  %v4948_v31 = vld [vmem:[#allocation8 + $0x140] sm:$0xff]  }
 0x7f6   : > { %4713 = vmatprep.subr.bf16.mxu0 %v4948_v31 }
 0x7f7   : > { %vm2500_vm15 = vcmp.gt.f32.partialorder %v2476_v3, 0.0  ;;  %v2516_v21 = vmul.f32 0.2, %v2476_v3  ;;  %v2534_v18 = vsel %vm2502_vm12, %v2484_v4, %v2518_v61  ;;  %4714 = vmatpush3.bf16.msra.mxu0 %v4948_v31  ;;  %4738 = vmatpush3.bf16.msra.mxu1 %v4952_v17 }
 0x7f8   : > { %v2542_v24 = vpack.c.bf16 %v2534_v18, %v2533_v6  ;;  %4739 = vmatprep.subr.bf16.mxu1 %v4953_v37 }
 0x7f9   : > { %v2532_v1 = vsel %vm2500_vm15, %v2476_v3, %v2516_v21 }
 0x7fa   : > { %v2541_v20 = vpack.c.bf16 %v2532_v1, %v2531_v62 }
 0x7fb   : > { %4740 = vmatpush3.bf16.msra.mxu1 %v4953_v37 }
 0x7fc   : > { %4695 = vmatprep.mubr.bf16.mxu1 %v2541_v20 }
 0x7fd   : > { %4696 = vmatmul.mubr.bf16.gmra.mxu1 %v2542_v24 }
 0x8a5   : > { %v4685_v48 = vpop.f32.mrf.mxu1 }
 0x8a6   : > { %v2659_v27 = vadd.f32 %v4685_v48, %v6013_v19 }
 0x8a7   : > { %v2650_v50 = vpop.f32.mrf.mxu1 }
 0x8a8   : > { %v2651_v25 = vadd.f32 %v6013_v19, %v2650_v50  ;;  %v2731_v33 = vmul.f32 0.2, %v2659_v27  ;;  %vm2715_vm2 = vcmp.gt.f32.partialorder %v2659_v27, 0.0 }
 0x8a9   : > { %v4686_v45 = vpop.f32.mrf.mxu1 }
 0x8aa   : > { %v2662_v40 = vadd.f32 %v4686_v45, %v6013_v19  ;;  %v2729_v30 = vmul.f32 0.2, %v2651_v25  ;;  %vm2713_vm1 = vcmp.gt.f32.partialorder %v2651_v25, 0.0  ;;  %v2747_v44 = vsel %vm2715_vm2, %v2659_v27, %v2731_v33 }
 0x8ab   : > { %v2653_v55 = vpop.f32.mrf.mxu1 }
 0x8ac   : > { %vm2716_vm0 = vcmp.gt.f32.partialorder %v2662_v40, 0.0  ;;  %v2732_v46 = vmul.f32 0.2, %v2662_v40  ;;  %v2654_v32 = vadd.f32 %v6013_v19, %v2653_v55  ;;  %v2745_v36 = vsel %vm2713_vm1, %v2651_v25, %v2729_v30 }
 0x8ad   : > { %v4689_v51 = vpop.f32.mrf.mxu1 }
 0x8ae   : > { %vm2714_vm3 = vcmp.gt.f32.partialorder %v2654_v32, 0.0  ;;  %v2730_v53 = vmul.f32 0.2, %v2654_v32  ;;  %v2748_v34 = vsel %vm2716_vm0, %v2662_v40, %v2732_v46  ;;  %v2675_v11 = vadd.f32 %v4689_v51, %v6013_v19 }
 0x8af   : > { %v2666_v35 = vpop.f32.mrf.mxu1  ;;  %v2762_v4 = vpack.c.bf16 %v2748_v34, %v2747_v44 }
 0x8b0   : > { %v2667_v56 = vadd.f32 %v6013_v19, %v2666_v35  ;;  %v2746_v38 = vsel %vm2714_vm3, %v2654_v32, %v2730_v53  ;;  %v2735_v16 = vmul.f32 0.2, %v2675_v11  ;;  %vm2719_vm6 = vcmp.gt.f32.partialorder %v2675_v11, 0.0 }
 0x8b1   : > { %v4690_v2 = vpop.f32.mrf.mxu1  ;;  %v2761_v52 = vpack.c.bf16 %v2746_v38, %v2745_v36 }
 0x8b2   : > { %v2678_v8 = vadd.f32 %v4690_v2, %v6013_v19  ;;  %v2733_v12 = vmul.f32 0.2, %v2667_v56  ;;  %vm2717_vm5 = vcmp.gt.f32.partialorder %v2667_v56, 0.0  ;;  %v2751_v23 = vsel %vm2719_vm6, %v2675_v11, %v2735_v16  ;;  %v4954_v16 = vld [vmem:[#allocation10 + $0x90] sm:$0xff]  }
 0x8b3   : > { %v2669_v58 = vpop.f32.mrf.mxu1  ;;  %4715 = vmatprep.mubr.bf16.mxu0 %v2761_v52  ;;  %4741 = vmatprep.subr.bf16.mxu1 %v4954_v16 }
 0x8b4   : > { %vm2720_vm4 = vcmp.gt.f32.partialorder %v2678_v8, 0.0  ;;  %v2736_v61 = vmul.f32 0.2, %v2678_v8  ;;  %v2670_v3 = vadd.f32 %v6013_v19, %v2669_v58  ;;  %4716 = vmatmul.mubr.bf16.vlgmr.msra.gmra.mxu0 %v2762_v4  ;;  %v2749_v6 = vsel %vm2717_vm5, %v2667_v56, %v2733_v12  ;;  %4742 = vmatpush3.bf16.msra.mxu1 %v4954_v16 }
 0x8b5   : > { %v4693_v21 = vpop.f32.mrf.mxu1 }
 0x8b6   : > { %vm2718_vm7 = vcmp.gt.f32.partialorder %v2670_v3, 0.0  ;;  %v2734_v18 = vmul.f32 0.2, %v2670_v3  ;;  %v2752_v1 = vsel %vm2720_vm4, %v2678_v8, %v2736_v61  ;;  %v2691_v9 = vadd.f32 %v4693_v21, %v6013_v19  ;;  %v4955_v21 = vld [vmem:[#allocation10 + $0x88] sm:$0xff]  }
 0x8b7   : > { %v2682_v62 = vpop.f32.mrf.mxu1  ;;  %v2764_v43 = vpack.c.bf16 %v2752_v1, %v2751_v23  ;;  %4743 = vmatprep.subr.bf16.mxu1 %v4955_v21 }
 0x8b8   : > { %v2683_v20 = vadd.f32 %v6013_v19, %v2682_v62  ;;  %v2750_v24 = vsel %vm2718_vm7, %v2670_v3, %v2734_v18  ;;  %v2739_v25 = vmul.f32 0.2, %v2691_v9  ;;  %vm2723_vm10 = vcmp.gt.f32.partialorder %v2691_v9, 0.0  ;;  %4744 = vmatpush3.bf16.msra.mxu1 %v4955_v21  ;;  %v6034_v62 = vld [vmem:[%s6835_s5 + $0x5] ss:$0 sm:$0xff] }
 0x8b9   : > { %v4694_v10 = vpop.f32.mrf.mxu1  ;;  %v2763_v31 = vpack.c.bf16 %v2750_v24, %v2749_v6 }
 0x8ba   : > { %v2694_v39 = vadd.f32 %v4694_v10, %v6013_v19  ;;  %v2737_v37 = vmul.f32 0.2, %v2683_v20  ;;  %vm2721_vm9 = vcmp.gt.f32.partialorder %v2683_v20, 0.0  ;;  %v2755_v34 = vsel %vm2723_vm10, %v2691_v9, %v2739_v25 }
 0x8bb   : > { %v2685_v17 = vpop.f32.mrf.mxu1  ;;  %4719 = vmatprep.mubr.bf16.mxu0 %v2763_v31 }
 0x8bc   : > { %vm2724_vm8 = vcmp.gt.f32.partialorder %v2694_v39, 0.0  ;;  %v2740_v48 = vmul.f32 0.2, %v2694_v39  ;;  %v2686_v50 = vadd.f32 %v6013_v19, %v2685_v17  ;;  %4720 = vmatmul.mubr.bf16.gmra.mxu0 %v2764_v43  ;;  %v2753_v46 = vsel %vm2721_vm9, %v2683_v20, %v2737_v37 }
 0x8bd   : > { %v4697_v27 = vpop.f32.mrf.mxu1 }
 0x8be   : > { %vm2722_vm11 = vcmp.gt.f32.partialorder %v2686_v50, 0.0  ;;  %v2738_v45 = vmul.f32 0.2, %v2686_v50  ;;  %v2756_v55 = vsel %vm2724_vm8, %v2694_v39, %v2740_v48  ;;  %v2707_v33 = vadd.f32 %v4697_v27, %v6013_v19 }
 0x8bf   : > { %v2698_v40 = vpop.f32.mrf.mxu1  ;;  %v2766_v56 = vpack.c.bf16 %v2756_v55, %v2755_v34 }
 0x8c0   : > { %v2699_v30 = vadd.f32 %v6013_v19, %v2698_v40  ;;  %v2754_v32 = vsel %vm2722_vm11, %v2686_v50, %v2738_v45  ;;  %v2743_v2 = vmul.f32 0.2, %v2707_v33  ;;  %vm2727_vm14 = vcmp.gt.f32.partialorder %v2707_v33, 0.0 }
 0x8c1   : > { %v4698_v51 = vpop.f32.mrf.mxu1  ;;  %v2765_v53 = vpack.c.bf16 %v2754_v32, %v2753_v46 }
 0x8c2   : > { %v2710_v35 = vadd.f32 %v4698_v51, %v6013_v19  ;;  %v2741_v38 = vmul.f32 0.2, %v2699_v30  ;;  %vm2725_vm13 = vcmp.gt.f32.partialorder %v2699_v30, 0.0  ;;  %v2759_v61 = vsel %vm2727_vm14, %v2707_v33, %v2743_v2 }
 0x8c3   : > { %v2701_v36 = vpop.f32.mrf.mxu1  ;;  %4723 = vmatprep.mubr.bf16.mxu0 %v2765_v53 }
 0x8c4   : > { %vm2728_vm12 = vcmp.gt.f32.partialorder %v2710_v35, 0.0  ;;  %v2744_v44 = vmul.f32 0.2, %v2710_v35  ;;  %v2702_v11 = vadd.f32 %v6013_v19, %v2701_v36  ;;  %4724 = vmatmul.mubr.bf16.gmra.mxu0 %v2766_v56  ;;  %v2757_v8 = vsel %vm2725_vm13, %v2699_v30, %v2741_v38  ;;  %v4956_v19 = vld [vmem:[#allocation10 + $0x80] sm:$0xff]  }
 0x8c5   : > { %4745 = vmatprep.subr.bf16.mxu1 %v4956_v19 }
 0x8c6   : > { %vm2726_vm15 = vcmp.gt.f32.partialorder %v2702_v11, 0.0  ;;  %v2742_v52 = vmul.f32 0.2, %v2702_v11  ;;  %v2760_v4 = vsel %vm2728_vm12, %v2710_v35, %v2744_v44  ;;  %4746 = vmatpush3.bf16.msra.mxu1 %v4956_v19 }
 0x8c7   : > { %v2768_v3 = vpack.c.bf16 %v2760_v4, %v2759_v61 }
 0x8c8   : > { %v2758_v58 = vsel %vm2726_vm15, %v2702_v11, %v2742_v52 }
 0x8c9   : > { %v2767_v12 = vpack.c.bf16 %v2758_v58, %v2757_v8 }
 0x8cb   : > { %4727 = vmatprep.mubr.bf16.mxu0 %v2767_v12 }
 0x8cc   : > { %4728 = vmatmul.mubr.bf16.gmra.mxu0 %v2768_v3 }
 0x974   : > { %v4717_v18 = vpop.f32.mrf.mxu0 }
 0x975   : > { %v2885_v6 = vadd.f32 %v4717_v18, %v6034_v62 }
 0x976   : > { %v2876_v1 = vpop.f32.mrf.mxu0 }
 0x977   : > { %v2877_v20 = vadd.f32 %v6034_v62, %v2876_v1  ;;  %v2957_v43 = vmul.f32 0.2, %v2885_v6  ;;  %vm2941_vm2 = vcmp.gt.f32.partialorder %v2885_v6, 0.0 }
 0x978   : > { %v4718_v24 = vpop.f32.mrf.mxu0 }
 0x979   : > { %v2888_v9 = vadd.f32 %v4718_v24, %v6034_v62  ;;  %v2955_v31 = vmul.f32 0.2, %v2877_v20  ;;  %vm2939_vm1 = vcmp.gt.f32.partialorder %v2877_v20, 0.0  ;;  %v2973_v40 = vsel %vm2941_vm2, %v2885_v6, %v2957_v43 }
 0x97a   : > { %v2879_v10 = vpop.f32.mrf.mxu0 }
 0x97b   : > { %vm2942_vm0 = vcmp.gt.f32.partialorder %v2888_v9, 0.0  ;;  %v2958_v23 = vmul.f32 0.2, %v2888_v9  ;;  %v2880_v39 = vadd.f32 %v6034_v62, %v2879_v10  ;;  %v2971_v27 = vsel %vm2939_vm1, %v2877_v20, %v2955_v31 }
 0x97c   : > { %v4721_v17 = vpop.f32.mrf.mxu0 }
 0x97d   : > { %vm2940_vm3 = vcmp.gt.f32.partialorder %v2880_v39, 0.0  ;;  %v2956_v37 = vmul.f32 0.2, %v2880_v39  ;;  %v2974_v48 = vsel %vm2942_vm0, %v2888_v9, %v2958_v23  ;;  %v2901_v55 = vadd.f32 %v4721_v17, %v6034_v62 }
 0x97e   : > { %v2892_v50 = vpop.f32.mrf.mxu0  ;;  %v2988_v32 = vpack.c.bf16 %v2974_v48, %v2973_v40  ;;  %vm3226_vm0 = vcmask 1040384  }
 0x97f   : > { %v2893_v25 = vadd.f32 %v6034_v62, %v2892_v50  ;;  %v2972_v45 = vsel %vm2940_vm3, %v2880_v39, %v2956_v37  ;;  %v2961_v56 = vmul.f32 0.2, %v2901_v55  ;;  %vm2945_vm6 = vcmp.gt.f32.partialorder %v2901_v55, 0.0 }
 0x980   : > { %v4722_v30 = vpop.f32.mrf.mxu0  ;;  %v2987_v46 = vpack.c.bf16 %v2972_v45, %v2971_v27 }
 0x981   : > { %v2904_v33 = vadd.f32 %v4722_v30, %v6034_v62  ;;  %v2959_v53 = vmul.f32 0.2, %v2893_v25  ;;  %vm2943_vm5 = vcmp.gt.f32.partialorder %v2893_v25, 0.0  ;;  %v2977_v61 = vsel %vm2945_vm6, %v2901_v55, %v2961_v56  ;;  %v3201_v56 = vld [vmem:[%s6838_s8] sm:$0x1] }
 0x982   : > { %v2895_v51 = vpop.f32.mrf.mxu0  ;;  %4747 = vmatprep.mubr.bf16.mxu1 %v2987_v46 }
 0x983   : > { %vm2946_vm4 = vcmp.gt.f32.partialorder %v2904_v33, 0.0  ;;  %v2962_v34 = vmul.f32 0.2, %v2904_v33  ;;  %v2896_v35 = vadd.f32 %v6034_v62, %v2895_v51  ;;  %4748 = vmatmul.mubr.bf16.vlgmr.msra.gmra.mxu1 %v2988_v32  ;;  %v2975_v52 = vsel %vm2943_vm5, %v2893_v25, %v2959_v53 }
 0x984   : > { %v4725_v36 = vpop.f32.mrf.mxu0 }
 0x985   : > { %vm2944_vm7 = vcmp.gt.f32.partialorder %v2896_v35, 0.0  ;;  %v2960_v38 = vmul.f32 0.2, %v2896_v35  ;;  %v2978_v11 = vsel %vm2946_vm4, %v2904_v33, %v2962_v34  ;;  %v2917_v8 = vadd.f32 %v4725_v36, %v6034_v62 }
 0x986   : > { %v2908_v44 = vpop.f32.mrf.mxu0  ;;  %v2990_v16 = vpack.c.bf16 %v2978_v11, %v2977_v61  ;;  %v3202_v36 = vmul.f32 1.442695, %v3201_v56 }
 0x987   : > { %v2909_v2 = vadd.f32 %v6034_v62, %v2908_v44  ;;  %v2976_v4 = vsel %vm2944_vm7, %v2896_v35, %v2960_v38  ;;  %v2965_v20 = vmul.f32 0.2, %v2917_v8  ;;  %vm2949_vm10 = vcmp.gt.f32.partialorder %v2917_v8, 0.0  ;;  %v6059_v44 = vld [vmem:[%s6837_s7 + $0x2] ss:$0 sm:$0xff] }
 0x988   : > { %v4726_v58 = vpop.f32.mrf.mxu0  ;;  %v2989_v12 = vpack.c.bf16 %v2976_v4, %v2975_v52  ;;  %4957 = vpow2.f32 %v3202_v36  ;;  %v470_v38 = vsub.f32 1.0, %v5875_v49 }
 0x989   : > { %v2920_v3 = vadd.f32 %v4726_v58, %v6034_v62  ;;  %v2963_v19 = vmul.f32 0.2, %v2909_v2  ;;  %vm2947_vm9 = vcmp.gt.f32.partialorder %v2909_v2, 0.0  ;;  %v2981_v48 = vsel %vm2949_vm10, %v2917_v8, %v2965_v20 }
 0x98a   : > { %v2911_v21 = vpop.f32.mrf.mxu0  ;;  %4751 = vmatprep.mubr.bf16.mxu1 %v2989_v12  ;;  %v6062_v11 = vrot.slane %v470_v38, %v5574_v5 }
 0x98b   : > { %vm2950_vm8 = vcmp.gt.f32.partialorder %v2920_v3, 0.0  ;;  %v2966_v18 = vmul.f32 0.2, %v2920_v3  ;;  %v2912_v1 = vadd.f32 %v6034_v62, %v2911_v21  ;;  %4752 = vmatmul.mubr.bf16.gmra.mxu1 %v2990_v16  ;;  %v2979_v23 = vsel %vm2947_vm9, %v2909_v2, %v2963_v19 }
 0x98c   : > { %v4729_v6 = vpop.f32.mrf.mxu0 }
 0x98d   : > { %vm2948_vm11 = vcmp.gt.f32.partialorder %v2912_v1, 0.0  ;;  %v2964_v24 = vmul.f32 0.2, %v2912_v1  ;;  %v2982_v10 = vsel %vm2950_vm8, %v2920_v3, %v2966_v18  ;;  %v2933_v43 = vadd.f32 %v4729_v6, %v6034_v62 }
 0x98e   : > { %v2924_v9 = vpop.f32.mrf.mxu0  ;;  %v2992_v25 = vpack.c.bf16 %v2982_v10, %v2981_v48 }
 0x98f   : > { %v2925_v31 = vadd.f32 %v6034_v62, %v2924_v9  ;;  %v2980_v39 = vsel %vm2948_vm11, %v2912_v1, %v2964_v24  ;;  %v2969_v30 = vmul.f32 0.2, %v2933_v43  ;;  %vm2953_vm14 = vcmp.gt.f32.partialorder %v2933_v43, 0.0 }
 0x990   : > { %v4730_v17 = vpop.f32.mrf.mxu0  ;;  %v2991_v37 = vpack.c.bf16 %v2980_v39, %v2979_v23 }
 0x991   : > { %v2936_v50 = vadd.f32 %v4730_v17, %v6034_v62  ;;  %v2967_v45 = vmul.f32 0.2, %v2925_v31  ;;  %vm2951_vm13 = vcmp.gt.f32.partialorder %v2925_v31, 0.0  ;;  %v2985_v34 = vsel %vm2953_vm14, %v2933_v43, %v2969_v30 }
 0x992   : > { %v2927_v27 = vpop.f32.mrf.mxu0  ;;  %4755 = vmatprep.mubr.bf16.mxu1 %v2991_v37 }
 0x993   : > { %vm2954_vm12 = vcmp.gt.f32.partialorder %v2936_v50, 0.0  ;;  %v2970_v40 = vmul.f32 0.2, %v2936_v50  ;;  %v2928_v55 = vadd.f32 %v6034_v62, %v2927_v27  ;;  %4756 = vmatmul.mubr.bf16.gmra.mxu1 %v2992_v25  ;;  %v2983_v33 = vsel %vm2951_vm13, %v2925_v31, %v2967_v45 }
 0x994   : > { %v3227_v62 = vsel %vm3226_vm0, %v3201_v56, 0.0 }
 0x995   : > { %vm2952_vm15 = vcmp.gt.f32.partialorder %v2928_v55, 0.0  ;;  %v2968_v46 = vmul.f32 0.2, %v2928_v55  ;;  %v2986_v32 = vsel %vm2954_vm12, %v2936_v50, %v2970_v40  ;;  %3228 = vadd.xlane.f32.xlu0 %v3227_v62  ;;  %v4958_v2 = vpop.eup %4957 }
 0x996   : > { %v2994_v35 = vpack.c.bf16 %v2986_v32, %v2985_v34  ;;  %v6068_v49 = vrot.slane %v4958_v2, %v5574_v5 }
 0x997   : > { %v2984_v51 = vsel %vm2952_vm15, %v2928_v55, %v2968_v46 }
 0x998   : > { %v2993_v53 = vpack.c.bf16 %v2984_v51, %v2983_v33 }
 0x99a   : > { %4759 = vmatprep.mubr.bf16.mxu1 %v2993_v53 }
 0x99b   : > { %4760 = vmatmul.mubr.bf16.gmra.mxu1 %v2994_v35 }
 0xa43   : > { %v4749_v52 = vpop.f32.mrf.mxu1 }
 0xa44   : > { %v3111_v4 = vadd.f32 %v4749_v52, %v6059_v44 }
 0xa45   : > { %v3102_v8 = vpop.f32.mrf.mxu1 }
 0xa46   : > { %v3171_v58 = vmul.f32 %v6062_v11, %v3111_v4  ;;  %v3103_v12 = vadd.f32 %v6059_v44, %v3102_v8 }
 0xa47   : > { %v4750_v61 = vpop.f32.mrf.mxu1 }
 0xa48   : > { %v3187_v3 = vadd.f32 %v3171_v58, %v5892_v59  ;;  %v3169_v16 = vmul.f32 %v6062_v11, %v3103_v12  ;;  %v3114_v21 = vadd.f32 %v4750_v61, %v6059_v44 }
 0xa49   : > { %v3105_v19 = vpop.f32.mrf.mxu1 }
 0xa4a   : > { %v3185_v18 = vadd.f32 %v3169_v16, %v5889_v57  ;;  %v3172_v1 = vmul.f32 %v6062_v11, %v3114_v21  ;;  %v3106_v20 = vadd.f32 %v6059_v44, %v3105_v19  ;;  %v6077_v6 = vmul.f32 %v6068_v49, %v3187_v3 }
 0xa4b   : > { %v4753_v24 = vpop.f32.mrf.mxu1 }
 0xa4c   : > { %v3188_v9 = vadd.f32 %v3172_v1, %v5881_v54  ;;  %v3170_v10 = vmul.f32 %v6062_v11, %v3106_v20  ;;  %3833 = vst [vmem:[%s6082_s1 + $0x10] sm:$0xff] %v6077_v6  ;;  %v3250_v59 = vand.u32 2147483647, %v6077_v6  ;;  %v3474_v31 = vsub.f32 0.0, %v6077_v6 }
 0xa4d   : > { %v3118_v57 = vpop.f32.mrf.mxu1  ;;  %v6089_v23 = vmul.f32 %v6068_v49, %v3185_v18  ;;  %v3127_v43 = vadd.f32 %v4753_v24, %v6059_v44 }
 0xa4e   : > { %v3186_v39 = vadd.f32 %v3170_v10, %v5895_v60  ;;  %v6093_v54 = vmul.f32 %v6068_v49, %v3188_v9  ;;  %v3266_v37 = vsub.f32 0.0, %v3250_v59  ;;  %v3506_v48 = vand.u32 2147483647, %v3474_v31 }
 0xa4f   : > { %v4754_v17 = vpop.f32.mrf.mxu1  ;;  %3831 = vst [vmem:[%s6082_s1] sm:$0xff] %v6089_v23  ;;  %v3248_v50 = vand.u32 2147483647, %v6089_v23  ;;  %v3472_v45 = vsub.f32 0.0, %v6089_v23  ;;  %v3175_v30 = vmul.f32 %v6062_v11, %v3127_v43  ;;  %v3119_v21 = vadd.f32 %v6059_v44, %v3118_v57 }
 0xa50   : > { %3834 = vst [vmem:[%s6082_s1 + $0x18] sm:$0xff] %v6093_v54  ;;  %v3284_v27 = vmul.f32 1.442695, %v3266_v37  ;;  %v3522_v60 = vsub.f32 0.0, %v3506_v48  ;;  %v6105_v40 = vmul.f32 %v6068_v49, %v3186_v39  ;;  %v3130_v51 = vadd.f32 %v4754_v17, %v6059_v44 }
 0xa51   : > { %v3121_v25 = vpop.f32.mrf.mxu1  ;;  %v3264_v55 = vsub.f32 0.0, %v3248_v50  ;;  %v3504_v33 = vand.u32 2147483647, %v3472_v45  ;;  %v3191_v36 = vadd.f32 %v3175_v30, %v5921_v28  ;;  %v3251_v61 = vand.u32 2147483647, %v6093_v54 }
 0xa52   : > { %4959 = vpow2.f32 %v3284_v27  ;;  %v3540_v32 = vmul.f32 1.442695, %v3522_v60  ;;  %3832 = vst [vmem:[%s6082_s1 + $0x8] sm:$0xff] %v6105_v40  ;;  %v3249_v56 = vand.u32 2147483647, %v6105_v40  ;;  %v3473_v4 = vsub.f32 0.0, %v6105_v40 }
 0xa53   : > { %v4757_v46 = vpop.f32.mrf.mxu1  ;;  %v3280_v53 = vmul.f32 1.442695, %v3264_v55  ;;  %v3520_v35 = vsub.f32 0.0, %v3504_v33  ;;  %v3176_v8 = vmul.f32 %v6062_v11, %v3130_v51  ;;  %v3267_v1 = vsub.f32 0.0, %v3251_v61 }
 0xa54   : > { %4961 = vpow2.f32 %v3540_v32  ;;  %v3265_v52 = vsub.f32 0.0, %v3249_v56  ;;  %v3505_v28 = vand.u32 2147483647, %v3473_v4  ;;  %v3475_v9 = vsub.f32 0.0, %v6093_v54 }
 0xa55   : > { %v3134_v34 = vpop.f32.mrf.mxu1  ;;  %4963 = vpow2.f32 %v3280_v53  ;;  %v3536_v2 = vmul.f32 1.442695, %v3520_v35  ;;  %v6132_v10 = vmul.f32 %v6068_v49, %v3191_v36  ;;  %v3192_v59 = vadd.f32 %v3176_v8, %v5916_v22 }
 0xa56   : > { %v3135_v62 = vadd.f32 %v6059_v44, %v3134_v34  ;;  %v3282_v16 = vmul.f32 1.442695, %v3265_v52  ;;  %v3521_v24 = vsub.f32 0.0, %v3505_v28  ;;  %v3286_v43 = vmul.f32 1.442695, %v3267_v1 }
 0xa57   : > { %v4758_v38 = vpop.f32.mrf.mxu1  ;;  %4965 = vpow2.f32 %v3536_v2  ;;  %v3122_v17 = vadd.f32 %v6059_v44, %v3121_v25  ;;  %v3507_v50 = vand.u32 2147483647, %v3475_v9  ;;  %3837 = vst [vmem:[%s6082_s1 + $0x30] sm:$0xff] %v6132_v10  ;;  %v3143_v27 = vadd.f32 %v4757_v46, %v6059_v44 }
 0xa58   : > { %v6119_v58 = vmul.f32 %v6062_v11, %v3135_v62  ;;  %v3146_v12 = vadd.f32 %v4758_v38, %v6059_v44  ;;  %4967 = vpow2.f32 %v3282_v16  ;;  %v3538_v48 = vmul.f32 1.442695, %v3521_v24 }
 0xa59   : > { %v3137_v3 = vpop.f32.mrf.mxu1  ;;  %4969 = vpow2.f32 %v3286_v43  ;;  %v3173_v55 = vmul.f32 %v6062_v11, %v3119_v21  ;;  %v3523_v51 = vsub.f32 0.0, %v3507_v50  ;;  %v6157_v46 = vmul.f32 %v6068_v49, %v3192_v59 }
 0xa5a   : > { %v6127_v19 = vmul.f32 %v6062_v11, %v3146_v12  ;;  %v3138_v18 = vadd.f32 %v6059_v44, %v3137_v3  ;;  %4971 = vpow2.f32 %v3538_v48  ;;  %v3174_v53 = vmul.f32 %v6062_v11, %v3122_v17 }
 0xa5b   : > { %v4761_v20 = vpop.f32.mrf.mxu1  ;;  %v6161_v35 = vand.u32 127, %v471_v0  ;;  %v3234_v56 = vmax.f32 %v6077_v6, 0.0  ;;  %v3179_v38 = vmul.f32 %v6062_v11, %v3143_v27  ;;  %v6172_v8 = vmax.f32 %v3474_v31, 0.0  ;;  %3838 = vst [vmem:[%s6082_s1 + $0x38] sm:$0xff] %v6157_v46 }
 0xa5c   : > { %v6136_v39 = vmul.f32 %v6062_v11, %v3138_v18  ;;  %v3159_v57 = vadd.f32 %v4761_v20, %v6059_v44  ;;  %v6177_v12 = vadd.f32 %v3173_v55, %v5913_v14  ;;  %v3232_v3 = vmax.f32 %v6089_v23, 0.0 }
 0xa5d   : > { %v3150_v37 = vpop.f32.mrf.mxu1  ;;  %v3542_v28 = vmul.f32 1.442695, %v3523_v51  ;;  %v3254_v31 = vand.u32 2147483647, %v6132_v10  ;;  %v3190_v21 = vadd.f32 %v3174_v53, %v5924_v29  ;;  %v3233_v14 = vmax.f32 %v6105_v40, 0.0 }
 0xa5e   : > { %v6146_v60 = vmul.f32 %v6062_v11, %v3159_v57  ;;  %v3151_v22 = vadd.f32 %v6059_v44, %v3150_v37  ;;  %v3195_v20 = vadd.f32 %v3179_v38, %v5948_v63  ;;  %v3235_v59 = vmax.f32 %v6093_v54, 0.0 }
 0xa5f   : > { %v4762_v30 = vpop.f32.mrf.mxu1  ;;  %v6150_v25 = vpop.eup %4959  ;;  %v3478_v43 = vsub.f32 0.0, %v6132_v10  ;;  %v6201_v17 = vadd.f32 %v6119_v58, %v5941_v42  ;;  %v6205_v63 = vmax.f32 %v3473_v4, 0.0  ;;  %v3270_v37 = vsub.f32 0.0, %v3254_v31 }
 0xa60   : > { %v6153_v32 = vmul.f32 %v6062_v11, %v3151_v22  ;;  %v3162_v33 = vadd.f32 %v4762_v30, %v6059_v44  ;;  %v3330_v62 = vadd.f32 1.0, %v6150_v25  ;;  %v6209_v48 = vadd.f32 %v6127_v19, %v5944_v47 }
 0xa61   : > { %v3153_v34 = vpop.f32.mrf.mxu1  ;;  %v4962_v36 = vpop.eup %4961  ;;  %v3336_v50 = vand.u32 2147483647, %v6150_v25  ;;  %v3510_v51 = vand.u32 2147483647, %v3478_v43  ;;  %v6223_v53 = vmax.f32 %v3475_v9, 0.0  ;;  %v6228_v38 = vadd.f32 %v6136_v39, %v5951_v41 }
 0xa62   : > { %v6167_v2 = vmul.f32 %v6062_v11, %v3162_v33  ;;  %v3154_v52 = vadd.f32 %v6059_v44, %v3153_v34  ;;  %v4964_v0 = vpop.eup %4963  ;;  %4973 = vlog2.f32 %v3330_v62  ;;  %v3586_v61 = vadd.f32 1.0, %v4962_v36 }
 0xa63   : > { %v6185_v44 = vmax.f32 %v3472_v45, 0.0  ;;  %v3312_v18 = vadd.f32 1.0, %v4964_v0  ;;  %v3589_v24 = vmul.f32 -0.5, %v4962_v36  ;;  %v3315_v45 = vmul.f32 -0.5, %v4964_v0 }
 0xa64   : > { %v6181_v16 = vmul.f32 %v6062_v11, %v3154_v52  ;;  %4975 = vlog2.f32 %v3586_v61  ;;  %v6190_v1 = vpop.eup %4965  ;;  %v3333_v11 = vmul.f32 -0.5, %v6150_v25  ;;  %v3592_v30 = vand.u32 2147483647, %v4962_v36 }
 0xa65   : > { %4977 = vlog2.f32 %v3312_v18  ;;  %v3568_v57 = vadd.f32 1.0, %v6190_v1  ;;  %v6197_v29 = vpop.eup %4967  ;;  %v3590_v55 = vadd.f32 1.0, %v3589_v24  ;;  %v3318_v42 = vand.u32 2147483647, %v4964_v0 }
 0xa66   : > { %4979 = vpow2.f32 %v3542_v28  ;;  %v3321_v27 = vadd.f32 1.0, %v6197_v29  ;;  %v3334_v22 = vadd.f32 1.0, %v3333_v11  ;;  %v6213_v58 = vpop.eup %4969  ;;  %v3316_v33 = vadd.f32 1.0, %v3315_v45 }
 0xa67   : > { %4981 = vlog2.f32 %v3568_v57  ;;  %v3571_v4 = vmul.f32 -0.5, %v6190_v1  ;;  %v6218_v47 = vpop.eup %4971  ;;  %v3574_v19 = vand.u32 2147483647, %v6190_v1  ;;  %v3238_v34 = vmax.f32 %v6132_v10, 0.0 }
 0xa68   : > { %4983 = vlog2.f32 %v3321_v27  ;;  %v3292_v62 = vmul.f32 1.442695, %v3270_v37  ;;  %vm6230_vm1 = vcmp.lt.f32.partialorder %v3336_v50, 0.0004427343  ;;  %v3577_v61 = vadd.f32 1.0, %v6218_v47 }
 0xa69   : > { %v3339_v28 = vadd.f32 1.0, %v6213_v58  ;;  %v3335_v31 = vmul.f32 %v6150_v25, %v3334_v22  ;;  %v3591_v18 = vmul.f32 %v4962_v36, %v3590_v55  ;;  %vm6237_vm2 = vcmp.lt.f32.partialorder %v3592_v30, 0.0004427343 }
 0xa6a   : > { %v3526_v11 = vsub.f32 0.0, %v3510_v51  ;;  %v3317_v24 = vmul.f32 %v4964_v0, %v3316_v33  ;;  %vm6241_vm3 = vcmp.lt.f32.partialorder %v3318_v42, 0.0004427343  ;;  %v3572_v39 = vadd.f32 1.0, %v3571_v4 }
 0xa6b   : > { %4985 = vlog2.f32 %v3577_v61  ;;  %vm6245_vm4 = vcmp.lt.f32.partialorder %v3574_v19, 0.0004427343  ;;  %v3324_v25 = vmul.f32 -0.5, %v6197_v29  ;;  %vm3760_vm5 = vcmp.lt.s32.totalorder %v6161_v35, 16 }
 0xa6c   : > { %4987 = vpow2.f32 %v3292_v62  ;;  %v3548_v36 = vmul.f32 1.442695, %v3526_v11  ;;  %v3255_v0 = vand.u32 2147483647, %v6157_v46  ;;  %v3479_v50 = vsub.f32 0.0, %v6157_v46 }
 0xa6d   : > { %4989 = vlog2.f32 %v3339_v28  ;;  %v6255_v22 = vmul.f32 %v6068_v49, %v6177_v12  ;;  %v6258_v55 = vmul.f32 %v6068_v49, %v3190_v21  ;;  %v6261_v30 = vmul.f32 %v6068_v49, %v3195_v20 }
 0xa6e   : > { %4991 = vpow2.f32 %v3548_v36  ;;  %v3327_v4 = vand.u32 2147483647, %v6197_v29  ;;  %v3271_v51 = vsub.f32 0.0, %v3255_v0  ;;  %v3573_v62 = vmul.f32 %v6190_v1, %v3572_v39 }
 0xa6f   : > { %v4974_v45 = vpop.eup %4973  ;;  %v3325_v61 = vadd.f32 1.0, %v3324_v25  ;;  %v3580_v12 = vmul.f32 -0.5, %v6218_v47  ;;  %v3511_v21 = vand.u32 2147483647, %v3479_v50  ;;  %3835 = vst [vmem:[%s6082_s1 + $0x20] sm:$0xff] %v6255_v22  ;;  %3836 = vst [vmem:[%s6082_s1 + $0x28] sm:$0xff] %v6258_v55 }
 0xa70   : > { %v3332_v37 = vmul.f32 0.6931472, %v4974_v45  ;;  %3841 = vst [vmem:[%s6082_s1 + $0x50] sm:$0xff] %v6261_v30  ;;  %v3252_v25 = vand.u32 2147483647, %v6255_v22  ;;  %v3476_v36 = vsub.f32 0.0, %v6255_v22 }
 0xa71   : > { %v4976_v27 = vpop.eup %4975  ;;  %v3527_v6 = vsub.f32 0.0, %v3511_v21  ;;  %vm6288_vm6 = vcmp.lt.f32.partialorder %v3327_v4, 0.0004427343  ;;  %v3326_v4 = vmul.f32 %v6197_v29, %v3325_v61  ;;  %v3345_v23 = vand.u32 2147483647, %v6213_v58 }
 0xa72   : > { %v3338_v42 = vsel %vm6230_vm1, %v3335_v31, %v3332_v37  ;;  %v3588_v33 = vmul.f32 0.6931472, %v4976_v27  ;;  %v4978_v19 = vpop.eup %4977  ;;  %v3294_v31 = vmul.f32 1.442695, %v3271_v51  ;;  %v3581_v27 = vadd.f32 1.0, %v3580_v12 }
 0xa73   : > { %v6276_v20 = vpop.eup %4979  ;;  %v3458_v52 = vadd.f32 %v3338_v42, %v3234_v56  ;;  %v3314_v28 = vmul.f32 0.6931472, %v4978_v19  ;;  %v3550_v51 = vmul.f32 1.442695, %v3527_v6  ;;  %v3268_v21 = vsub.f32 0.0, %v3252_v25 }
 0xa74   : > { %v3594_v1 = vsel %vm6237_vm2, %v3591_v18, %v3588_v33  ;;  %v4982_v11 = vpop.eup %4981  ;;  %v3595_v45 = vadd.f32 1.0, %v6276_v20  ;;  %4993 = vpow2.f32 %v3294_v31  ;;  %v3583_v33 = vand.u32 2147483647, %v6218_v47 }
 0xa75   : > { %v3714_v39 = vadd.f32 %v3594_v1, %v6172_v8  ;;  %v3320_v37 = vsel %vm6241_vm3, %v3317_v24, %v3314_v28  ;;  %v3570_v0 = vmul.f32 0.6931472, %v4982_v11  ;;  %v4984_v56 = vpop.eup %4983  ;;  %v3508_v57 = vand.u32 2147483647, %v3476_v36 }
 0xa76   : > { %4995 = vlog2.f32 %v3595_v45  ;;  %v3323_v42 = vmul.f32 0.6931472, %v4984_v56  ;;  %v3456_v24 = vadd.f32 %v3320_v37, %v3232_v3  ;;  %v3582_v28 = vmul.f32 %v6218_v47, %v3581_v27 }
 0xa77   : > { %v3730_v9 = vadd.f32 %v3714_v39, %v3458_v52  ;;  %v3576_v8 = vsel %vm6245_vm4, %v3573_v62, %v3570_v0  ;;  %v3342_v52 = vmul.f32 -0.5, %v6213_v58  ;;  %4997 = vpow2.f32 %v3550_v51 }
 0xa78   : > { %v3712_v19 = vadd.f32 %v3576_v8, %v6185_v44  ;;  %v4986_v62 = vpop.eup %4985  ;;  %v3329_v44 = vsel %vm6288_vm6, %v3326_v4, %v3323_v42  ;;  %v3598_v61 = vmul.f32 -0.5, %v6276_v20  ;;  %v3288_v31 = vmul.f32 1.442695, %v3268_v21 }
 0xa79   : > { %v3746_v41 = vsub.f32 0.0, %v3730_v9  ;;  %v6306_v3 = vpop.eup %4987  ;;  %v3579_v29 = vmul.f32 0.6931472, %v4986_v62  ;;  %vm3584_vm7 = vcmp.lt.f32.partialorder %v3583_v33, 0.0004427343  ;;  %v3524_v25 = vsub.f32 0.0, %v3508_v57 }
 0xa7a   : > { %v3728_v1 = vadd.f32 %v3712_v19, %v3456_v24  ;;  %v4990_v11 = vpop.eup %4989  ;;  %v3366_v45 = vadd.f32 1.0, %v6306_v3  ;;  %v6316_v47 = vadd.f32 %v6146_v60, %v5976_v13  ;;  %v3343_v6 = vadd.f32 1.0, %v3342_v52 }
 0xa7b   : > { %v3765_v12 = vsel %vm3760_vm5, %v3746_v41, 0.0  ;;  %v6312_v37 = vpop.eup %4991  ;;  %v3585_v0 = vsel %vm3584_vm7, %v3582_v28, %v3579_v29  ;;  %4999 = vpow2.f32 %v3288_v31  ;;  %v3457_v9 = vadd.f32 %v3329_v44, %v3233_v14 }
 0xa7c   : > { %3783 = vadd.xlane.f32.xlu1 %v3765_v12  ;;  %v3744_v39 = vsub.f32 0.0, %v3728_v1  ;;  %v3713_v18 = vadd.f32 %v3585_v0, %v6205_v63  ;;  %5001 = vlog2.f32 %v3366_v45  ;;  %vm6323_vm8 = vcmp.lt.f32.partialorder %v3345_v23, 0.0004427343 }
 0xa7d   : > { %v3599_v8 = vadd.f32 1.0, %v3598_v61  ;;  %v6329_v13 = vmax.f32 %v3478_v43, 0.0  ;;  %v3622_v60 = vadd.f32 1.0, %v6312_v37  ;;  %v3341_v33 = vmul.f32 0.6931472, %v4990_v11 }
 0xa7e   : > { %v3763_v56 = vsel %vm3760_vm5, %v3744_v39, 0.0  ;;  %v3729_v42 = vadd.f32 %v3713_v18, %v3457_v9  ;;  %v3544_v51 = vmul.f32 1.442695, %v3524_v25  ;;  %v3253_v40 = vand.u32 2147483647, %v6258_v55 }
 0xa7f   : > { %3779 = vadd.xlane.f32.xlu0 %v3763_v56  ;;  %v3344_v14 = vmul.f32 %v6213_v58, %v3343_v6  ;;  %v3601_v63 = vand.u32 2147483647, %v6276_v20  ;;  %5003 = vlog2.f32 %v3622_v60  ;;  %v3477_v41 = vsub.f32 0.0, %v6258_v55 }
 0xa80   : > { %v3745_v19 = vsub.f32 0.0, %v3729_v42  ;;  %v3239_v43 = vmax.f32 %v6157_v46, 0.0  ;;  %5005 = vpow2.f32 %v3544_v51  ;;  %v3269_v21 = vsub.f32 0.0, %v3253_v40 }
 0xa81   : > { %v6336_v24 = vpop.eup %4993  ;;  %v3600_v52 = vmul.f32 %v6276_v20, %v3599_v8  ;;  %v6343_v58 = vmax.f32 %v3479_v50, 0.0  ;;  %v3236_v62 = vmax.f32 %v6255_v22, 0.0  ;;  %v3347_v1 = vsel %vm6323_vm8, %v3344_v14, %v3341_v33 }
 0xa82   : > { %v3375_v57 = vadd.f32 1.0, %v6336_v24  ;;  %v3764_v12 = vsel %vm3760_vm5, %v3745_v19, 0.0  ;;  %v3290_v23 = vmul.f32 1.442695, %v3269_v21  ;;  %vm3602_vm9 = vcmp.lt.f32.partialorder %v3601_v63, 0.0004427343 }
 0xa83   : > { %v4996_v4 = vpop.eup %4995  ;;  %3781 = vadd.xlane.f32.xlu1 %v3764_v12  ;;  %v3369_v20 = vmul.f32 -0.5, %v6306_v3  ;;  %v3509_v44 = vand.u32 2147483647, %v3477_v41  ;;  %v3258_v61 = vand.u32 2147483647, %v6261_v30  ;;  %v3482_v31 = vsub.f32 0.0, %v6261_v30 }
 0xa84   : > { %v3597_v28 = vmul.f32 0.6931472, %v4996_v4  ;;  %5007 = vlog2.f32 %v3375_v57  ;;  %v6353_v50 = vpop.eup %4997  ;;  %v3459_v11 = vadd.f32 %v3347_v1, %v3235_v59  ;;  %v3625_v45 = vmul.f32 -0.5, %v6312_v37 }
 0xa85   : > { %5009 = vpow2.f32 %v3290_v23  ;;  %v3631_v25 = vadd.f32 1.0, %v6353_v50  ;;  %v3372_v0 = vand.u32 2147483647, %v6306_v3  ;;  %v6365_v6 = vmax.f32 %v3476_v36, 0.0 }
 0xa86   : > { %v3603_v29 = vsel %vm3602_vm9, %v3600_v52, %v3597_v28  ;;  %v3525_v56 = vsub.f32 0.0, %v3509_v44  ;;  %v3274_v9 = vsub.f32 0.0, %v3258_v61  ;;  %v3370_v27 = vadd.f32 1.0, %v3369_v20 }
 0xa87   : > { %v3715_v39 = vadd.f32 %v3603_v29, %v6223_v53  ;;  %5011 = vlog2.f32 %v3631_v25  ;;  %v3514_v54 = vand.u32 2147483647, %v3482_v31  ;;  %v3628_v53 = vand.u32 2147483647, %v6312_v37 }
 0xa88   : > { %v6369_v59 = vpop.eup %4999  ;;  %v3546_v8 = vmul.f32 1.442695, %v3525_v56  ;;  %v3300_v60 = vmul.f32 1.442695, %v3274_v9  ;;  %v6374_v42 = vmul.f32 %v6068_v49, %v6209_v48  ;;  %v3626_v51 = vadd.f32 1.0, %v3625_v45 }
 0xa89   : > { %v3731_v18 = vadd.f32 %v3715_v39, %v3459_v11  ;;  %v5002_v36 = vpop.eup %5001  ;;  %v3348_v40 = vadd.f32 1.0, %v6369_v59  ;;  %v3237_v14 = vmax.f32 %v6258_v55, 0.0  ;;  %v3378_v19 = vmul.f32 -0.5, %v6336_v24 }
 0xa8a   : > { %v3368_v63 = vmul.f32 0.6931472, %v5002_v36  ;;  %5013 = vpow2.f32 %v3546_v8  ;;  %v3530_v21 = vsub.f32 0.0, %v3514_v54  ;;  %3842 = vst [vmem:[%s6082_s1 + $0x58] sm:$0xff] %v6374_v42  ;;  %v3371_v48 = vmul.f32 %v6306_v3, %v3370_v27 }
 0xa8b   : > { %v3747_v33 = vsub.f32 0.0, %v3731_v18  ;;  %vm6384_vm10 = vcmp.lt.f32.partialorder %v3372_v0, 0.0004427343  ;;  %5015 = vlog2.f32 %v3348_v40  ;;  %vm6388_vm11 = vcmp.lt.f32.partialorder %v3628_v53, 0.0004427343 }
 0xa8c   : > { %v5004_v57 = vpop.eup %5003  ;;  %v3634_v1 = vmul.f32 -0.5, %v6353_v50  ;;  %5017 = vpow2.f32 %v3300_v60  ;;  %v3556_v28 = vmul.f32 1.442695, %v3530_v21  ;;  %v3374_v3 = vsel %vm6384_vm10, %v3371_v48, %v3368_v63 }
 0xa8d   : > { %v3766_v4 = vsel %vm3760_vm5, %v3747_v33, 0.0  ;;  %v6393_v23 = vpop.eup %5005  ;;  %v3624_v20 = vmul.f32 0.6931472, %v5004_v57  ;;  %v3627_v44 = vmul.f32 %v6312_v37, %v3626_v51  ;;  %v3259_v29 = vand.u32 2147483647, %v6374_v42 }
 0xa8e   : > { %3785 = vadd.xlane.f32.xlu0 %v3766_v4  ;;  %v3379_v61 = vadd.f32 1.0, %v3378_v19  ;;  %v3381_v11 = vand.u32 2147483647, %v6336_v24  ;;  %v3604_v39 = vadd.f32 1.0, %v6393_v23  ;;  %5019 = vpow2.f32 %v3556_v28 }
 0xa8f   : > { %v3630_v45 = vsel %vm6388_vm11, %v3627_v44, %v3624_v20  ;;  %v3275_v25 = vsub.f32 0.0, %v3259_v29  ;;  %v3483_v0 = vsub.f32 0.0, %v6374_v42  ;;  %v6406_v56 = vmul.f32 %v6068_v49, %v6201_v17 }
 0xa90   : > { %v3462_v9 = vadd.f32 %v3374_v3, %v3238_v34  ;;  %v3718_v18 = vadd.f32 %v3630_v45, %v6329_v13  ;;  %v3635_v27 = vadd.f32 1.0, %v3634_v1  ;;  %5021 = vlog2.f32 %v3604_v39 }
 0xa91   : > { %v5008_v37 = vpop.eup %5007  ;;  %v6415_v8 = vmax.f32 %v3477_v41, 0.0  ;;  %v3242_v60 = vmax.f32 %v6261_v30, 0.0  ;;  %v3302_v36 = vmul.f32 1.442695, %v3275_v25  ;;  %3839 = vst [vmem:[%s6082_s1 + $0x40] sm:$0xff] %v6406_v56  ;;  %v3380_v33 = vmul.f32 %v6336_v24, %v3379_v61 }
 0xa92   : > { %v6411_v54 = vpop.eup %5009  ;;  %v3377_v53 = vmul.f32 0.6931472, %v5008_v37  ;;  %v3734_v17 = vadd.f32 %v3718_v18, %v3462_v9  ;;  %vm6420_vm12 = vcmp.lt.f32.partialorder %v3381_v11, 0.0004427343  ;;  %v3637_v34 = vand.u32 2147483647, %v6353_v50 }
 0xa93   : > { %v3357_v13 = vadd.f32 1.0, %v6411_v54  ;;  %v3351_v51 = vmul.f32 -0.5, %v6369_v59  ;;  %5023 = vpow2.f32 %v3302_v36  ;;  %v3515_v41 = vand.u32 2147483647, %v3483_v0 }
 0xa94   : > { %v5012_v40 = vpop.eup %5011  ;;  %v3750_v63 = vsub.f32 0.0, %v3734_v17  ;;  %v3636_v19 = vmul.f32 %v6353_v50, %v3635_v27  ;;  %v3607_v21 = vmul.f32 -0.5, %v6393_v23  ;;  %v3383_v4 = vsel %vm6420_vm12, %v3380_v33, %v3377_v53 }
 0xa95   : > { %5025 = vlog2.f32 %v3357_v13  ;;  %v3633_v48 = vmul.f32 0.6931472, %v5012_v40  ;;  %v3531_v52 = vsub.f32 0.0, %v3515_v41  ;;  %v3480_v24 = vsub.f32 0.0, %v6406_v56 }
 0xa96   : > { %v3769_v57 = vsel %vm3760_vm5, %v3750_v63, 0.0  ;;  %vm3638_vm13 = vcmp.lt.f32.partialorder %v3637_v34, 0.0004427343  ;;  %v3354_v12 = vand.u32 2147483647, %v6369_v59  ;;  %v6440_v50 = vmul.f32 %v6068_v49, %v6228_v38 }
 0xa97   : > { %v6442_v1 = vpop.eup %5013  ;;  %3791 = vadd.xlane.f32.xlu1 %v3769_v57  ;;  %v3639_v28 = vsel %vm3638_vm13, %v3636_v19, %v3633_v48  ;;  %v3352_v3 = vadd.f32 1.0, %v3351_v51  ;;  %v3558_v20 = vmul.f32 1.442695, %v3531_v52  ;;  %v3256_v44 = vand.u32 2147483647, %v6406_v56 }
 0xa98   : > { %v5016_v29 = vpop.eup %5015  ;;  %v3463_v61 = vadd.f32 %v3383_v4, %v3239_v43  ;;  %v3719_v11 = vadd.f32 %v3639_v28, %v6343_v58  ;;  %v3613_v39 = vadd.f32 1.0, %v6442_v1  ;;  %v3512_v38 = vand.u32 2147483647, %v3480_v24  ;;  %3840 = vst [vmem:[%s6082_s1 + $0x48] sm:$0xff] %v6440_v50 }
 0xa99   : > { %v6453_v45 = vpop.eup %5017  ;;  %v3608_v25 = vadd.f32 1.0, %v3607_v21  ;;  %v3360_v37 = vmul.f32 -0.5, %v6411_v54  ;;  %v6458_v9 = vmax.f32 %v3482_v31, 0.0  ;;  %5027 = vpow2.f32 %v3558_v20 }
 0xa9a   : > { %v3735_v46 = vadd.f32 %v3719_v11, %v3463_v61  ;;  %v3350_v43 = vmul.f32 0.6931472, %v5016_v29  ;;  %vm6460_vm14 = vcmp.lt.f32.partialorder %v3354_v12, 0.0004427343  ;;  %5029 = vlog2.f32 %v3613_v39 }
 0xa9b   : > { %v6464_v18 = vpop.eup %5019  ;;  %v3610_v27 = vand.u32 2147483647, %v6393_v23  ;;  %v3363_v53 = vand.u32 2147483647, %v6411_v54  ;;  %v3402_v36 = vadd.f32 1.0, %v6453_v45  ;;  %v3272_v17 = vsub.f32 0.0, %v3256_v44 }
 0xa9c   : > { %v3751_v10 = vsub.f32 0.0, %v3735_v46  ;;  %v3353_v31 = vmul.f32 %v6369_v59, %v3352_v3  ;;  %v3658_v34 = vadd.f32 1.0, %v6464_v18  ;;  %v3528_v13 = vsub.f32 0.0, %v3512_v38 }
 0xa9d   : > { %v5022_v33 = vpop.eup %5021  ;;  %v3609_v51 = vmul.f32 %v6393_v23, %v3608_v25  ;;  %v3361_v41 = vadd.f32 1.0, %v3360_v37  ;;  %v3616_v40 = vmul.f32 -0.5, %v6442_v1  ;;  %5031 = vlog2.f32 %v3402_v36 }
 0xa9e   : > { %v3770_v63 = vsel %vm3760_vm5, %v3751_v10, 0.0  ;;  %v3356_v19 = vsel %vm6460_vm14, %v3353_v31, %v3350_v43  ;;  %v3606_v21 = vmul.f32 0.6931472, %v5022_v33  ;;  %5033 = vlog2.f32 %v3658_v34 }
 0xa9f   : > { %v3197_v59 = vadd.f32 %v6153_v32, %v5969_v26  ;;  %3793 = vadd.xlane.f32.xlu0 %v3770_v63  ;;  %vm3611_vm15 = vcmp.lt.f32.partialorder %v3610_v27, 0.0004427343  ;;  %vm6479_vm0 = vcmp.lt.f32.partialorder %v3363_v53, 0.0004427343  ;;  %v3296_v23 = vmul.f32 1.442695, %v3272_v17 }
 0xaa0   : > { %v6483_v48 = vpop.eup %5023  ;;  %v3612_v52 = vsel %vm3611_vm15, %v3609_v51, %v3606_v21  ;;  %v3619_v57 = vand.u32 2147483647, %v6442_v1  ;;  %v3552_v12 = vmul.f32 1.442695, %v3528_v13  ;;  %v3257_v28 = vand.u32 2147483647, %v6440_v50 }
 0xaa1   : > { %v3460_v20 = vadd.f32 %v3356_v19, %v3236_v62  ;;  %v3716_v26 = vadd.f32 %v3612_v52, %v6365_v6  ;;  %v3405_v32 = vmul.f32 -0.5, %v6453_v45  ;;  %v3411_v44 = vadd.f32 1.0, %v6483_v48 }
 0xaa2   : > { %v5026_v3 = vpop.eup %5025  ;;  %v3362_v29 = vmul.f32 %v6411_v54, %v3361_v41  ;;  %v3617_v61 = vadd.f32 1.0, %v3616_v40  ;;  %5035 = vpow2.f32 %v3296_v23  ;;  %v3273_v11 = vsub.f32 0.0, %v3257_v28 }
 0xaa3   : > { %v3732_v39 = vadd.f32 %v3716_v26, %v3460_v20  ;;  %v3661_v38 = vmul.f32 -0.5, %v6464_v18  ;;  %5037 = vlog2.f32 %v3411_v44  ;;  %v3481_v25 = vsub.f32 0.0, %v6440_v50 }
 0xaa4   : > { %v3359_v37 = vmul.f32 0.6931472, %v5026_v3  ;;  %vm6495_vm1 = vcmp.lt.f32.partialorder %v3619_v57, 0.0004427343  ;;  %5039 = vpow2.f32 %v3552_v12  ;;  %v3298_v62 = vmul.f32 1.442695, %v3273_v11 }
 0xaa5   : > { %v3748_v6 = vsub.f32 0.0, %v3732_v39  ;;  %v3406_v46 = vadd.f32 1.0, %v3405_v32  ;;  %v3408_v54 = vand.u32 2147483647, %v6453_v45  ;;  %v3664_v43 = vand.u32 2147483647, %v6464_v18 }
 0xaa6   : > { %v6501_v58 = vpop.eup %5027  ;;  %5041 = vpow2.f32 %v3298_v62  ;;  %v3513_v27 = vand.u32 2147483647, %v3481_v25  ;;  %v6506_v53 = vmul.f32 %v6068_v49, %v3197_v59  ;;  %v6510_v36 = vmul.f32 %v6068_v49, %v6316_v47 }
 0xaa7   : > { %v5030_v17 = vpop.eup %5029  ;;  %v3767_v10 = vsel %vm3760_vm5, %v3748_v6, 0.0  ;;  %v3618_v31 = vmul.f32 %v6442_v1, %v3617_v61  ;;  %v3662_v34 = vadd.f32 1.0, %v3661_v38  ;;  %v3667_v13 = vadd.f32 1.0, %v6501_v58 }
 0xaa8   : > { %3787 = vadd.xlane.f32.xlu1 %v3767_v10  ;;  %v3365_v33 = vsel %vm6479_vm0, %v3362_v29, %v3359_v37  ;;  %v3615_v51 = vmul.f32 0.6931472, %v5030_v17  ;;  %v3529_v41 = vsub.f32 0.0, %v3513_v27  ;;  %v3260_v40 = vand.u32 2147483647, %v6506_v53  ;;  %3843 = vst [vmem:[%s6082_s1 + $0x60] sm:$0xff] %v6506_v53 }
 0xaa9   : > { %3845 = vst [vmem:[%s6082_s1 + $0x70] sm:$0xff] %v6510_v36  ;;  %v3407_v47 = vmul.f32 %v6453_v45, %v3406_v46  ;;  %vm6524_vm2 = vcmp.lt.f32.partialorder %v3408_v54, 0.0004427343  ;;  %5043 = vlog2.f32 %v3667_v13  ;;  %v3484_v1 = vsub.f32 0.0, %v6506_v53 }
 0xaaa   : > { %v5032_v19 = vpop.eup %5031  ;;  %v3621_v21 = vsel %vm6495_vm1, %v3618_v31, %v3615_v51  ;;  %vm6531_vm3 = vcmp.lt.f32.partialorder %v3664_v43, 0.0004427343  ;;  %v3554_v4 = vmul.f32 1.442695, %v3529_v41  ;;  %v3276_v23 = vsub.f32 0.0, %v3260_v40 }
 0xaab   : > { %v5034_v52 = vpop.eup %5033  ;;  %v3461_v45 = vadd.f32 %v3365_v33, %v3237_v14  ;;  %v3717_v57 = vadd.f32 %v3621_v21, %v6415_v8  ;;  %v3404_v12 = vmul.f32 0.6931472, %v5032_v19  ;;  %v3663_v28 = vmul.f32 %v6464_v18, %v3662_v34 }
 0xaac   : > { %v3660_v3 = vmul.f32 0.6931472, %v5034_v52  ;;  %5045 = vpow2.f32 %v3554_v4  ;;  %v3304_v20 = vmul.f32 1.442695, %v3276_v23  ;;  %v3516_v26 = vand.u32 2147483647, %v3484_v1 }
 0xaad   : > { %v3733_v32 = vadd.f32 %v3717_v57, %v3461_v45  ;;  %v3410_v44 = vsel %vm6524_vm2, %v3407_v47, %v3404_v12  ;;  %v3414_v29 = vmul.f32 -0.5, %v6483_v48  ;;  %v3262_v55 = vand.u32 2147483647, %v6510_v36 }
 0xaae   : > { %v3666_v14 = vsel %vm6531_vm3, %v3663_v28, %v3660_v3  ;;  %v3670_v8 = vmul.f32 -0.5, %v6501_v58  ;;  %5047 = vpow2.f32 %v3304_v20  ;;  %v3466_v11 = vadd.f32 %v3410_v44, %v3242_v60 }
 0xaaf   : > { %v6548_v18 = vpop.eup %5035  ;;  %v3749_v61 = vsub.f32 0.0, %v3733_v32  ;;  %v3722_v39 = vadd.f32 %v3666_v14, %v6458_v9  ;;  %v3532_v38 = vsub.f32 0.0, %v3516_v26  ;;  %v3198_v22 = vadd.f32 %v6181_v16, %v5979_v15 }
 0xab0   : > { %v5038_v37 = vpop.eup %5037  ;;  %v3384_v62 = vadd.f32 1.0, %v6548_v18  ;;  %v3278_v6 = vsub.f32 0.0, %v3262_v55  ;;  %v3415_v27 = vadd.f32 1.0, %v3414_v29  ;;  %v3417_v30 = vand.u32 2147483647, %v6483_v48 }
 0xab1   : > { %v6556_v46 = vpop.eup %5039  ;;  %v3768_v54 = vsel %vm3760_vm5, %v3749_v61, 0.0  ;;  %v3738_v43 = vadd.f32 %v3722_v39, %v3466_v11  ;;  %v3671_v60 = vadd.f32 1.0, %v3670_v8  ;;  %v3486_v17 = vsub.f32 0.0, %v6510_v36 }
 0xab2   : > { %3789 = vadd.xlane.f32.xlu0 %v3768_v54  ;;  %5049 = vlog2.f32 %v3384_v62  ;;  %v3640_v9 = vadd.f32 1.0, %v6556_v46  ;;  %v3200_v16 = vadd.f32 %v6167_v2, %v5972_v7  ;;  %v3413_v31 = vmul.f32 0.6931472, %v5038_v37 }
 0xab3   : > { %v6563_v15 = vpop.eup %5041  ;;  %v3754_v10 = vsub.f32 0.0, %v3738_v43  ;;  %v3560_v34 = vmul.f32 1.442695, %v3532_v38  ;;  %v3673_v13 = vand.u32 2147483647, %v6501_v58  ;;  %v3243_v40 = vmax.f32 %v6374_v42, 0.0 }
 0xab4   : > { %5051 = vlog2.f32 %v3640_v9  ;;  %v3393_v33 = vadd.f32 1.0, %v6563_v15  ;;  %v3308_v51 = vmul.f32 1.442695, %v3278_v6  ;;  %v3416_v47 = vmul.f32 %v6483_v48, %v3415_v27 }
 0xab5   : > { %v3773_v41 = vsel %vm3760_vm5, %v3754_v10, 0.0  ;;  %vm6573_vm4 = vcmp.lt.f32.partialorder %v3417_v30, 0.0004427343  ;;  %v3672_v2 = vmul.f32 %v6501_v58, %v3671_v60  ;;  %v3518_v19 = vand.u32 2147483647, %v3486_v17 }
 0xab6   : > { %v5044_v7 = vpop.eup %5043  ;;  %3799 = vadd.xlane.f32.xlu1 %v3773_v41  ;;  %5053 = vlog2.f32 %v3393_v33  ;;  %v6581_v21 = vmul.f32 %v6068_v49, %v3198_v22  ;;  %v3419_v59 = vsel %vm6573_vm4, %v3416_v47, %v3413_v31  ;;  %v3387_v4 = vmul.f32 -0.5, %v6548_v18 }
 0xab7   : > { %v3669_v48 = vmul.f32 0.6931472, %v5044_v7  ;;  %5055 = vpow2.f32 %v3560_v34  ;;  %v3499_v23 = vmax.f32 %v3483_v0, 0.0  ;;  %vm3674_vm6 = vcmp.lt.f32.partialorder %v3673_v13, 0.0004427343 }
 0xab8   : > { %5057 = vpow2.f32 %v3308_v51  ;;  %v3534_v58 = vsub.f32 0.0, %v3518_v19  ;;  %3844 = vst [vmem:[%s6082_s1 + $0x68] sm:$0xff] %v6581_v21  ;;  %v3643_v57 = vmul.f32 -0.5, %v6556_v46  ;;  %v3261_v12 = vand.u32 2147483647, %v6581_v21 }
 0xab9   : > { %v6590_v52 = vpop.eup %5045  ;;  %v3675_v45 = vsel %vm3674_vm6, %v3672_v2, %v3669_v48  ;;  %v3485_v28 = vsub.f32 0.0, %v6581_v21  ;;  %v3467_v3 = vadd.f32 %v3419_v59, %v3243_v40  ;;  %v3390_v26 = vand.u32 2147483647, %v6548_v18 }
 0xaba   : > { %v3723_v20 = vadd.f32 %v3675_v45, %v3499_v23  ;;  %v3649_v42 = vadd.f32 1.0, %v6590_v52  ;;  %v3388_v32 = vadd.f32 1.0, %v3387_v4  ;;  %v3564_v44 = vmul.f32 1.442695, %v3534_v58 }
 0xabb   : > { %v6597_v0 = vpop.eup %5047  ;;  %v3277_v29 = vsub.f32 0.0, %v3261_v12  ;;  %v3517_v55 = vand.u32 2147483647, %v3485_v28  ;;  %v3240_v8 = vmax.f32 %v6406_v56, 0.0  ;;  %v3644_v61 = vadd.f32 1.0, %v3643_v57 }
 0xabc   : > { %v3739_v14 = vadd.f32 %v3723_v20, %v3467_v3  ;;  %5059 = vlog2.f32 %v3649_v42  ;;  %v3420_v11 = vadd.f32 1.0, %v6597_v0  ;;  %vm6603_vm7 = vcmp.lt.f32.partialorder %v3390_v26, 0.0004427343 }
 0xabd   : > { %5061 = vpow2.f32 %v3564_v44  ;;  %v3306_v37 = vmul.f32 1.442695, %v3277_v29  ;;  %v3533_v22 = vsub.f32 0.0, %v3517_v55  ;;  %v3389_v6 = vmul.f32 %v6548_v18, %v3388_v32 }
 0xabe   : > { %v3755_v39 = vsub.f32 0.0, %v3739_v14  ;;  %v3646_v54 = vand.u32 2147483647, %v6556_v46  ;;  %v3396_v43 = vmul.f32 -0.5, %v6563_v15  ;;  %v6611_v27 = vmul.f32 %v6068_v49, %v3200_v16 }
 0xabf   : > { %v5050_v62 = vpop.eup %5049  ;;  %5063 = vpow2.f32 %v3306_v37  ;;  %v3562_v9 = vmul.f32 1.442695, %v3533_v22  ;;  %v3645_v31 = vmul.f32 %v6556_v46, %v3644_v61  ;;  %v3652_v13 = vmul.f32 -0.5, %v6590_v52 }
 0xac0   : > { %v3774_v30 = vsel %vm3760_vm5, %v3755_v39, 0.0  ;;  %v3386_v60 = vmul.f32 0.6931472, %v5050_v62  ;;  %5065 = vlog2.f32 %v3420_v11  ;;  %v3263_v18 = vand.u32 2147483647, %v6611_v27  ;;  %3846 = vst [vmem:[%s6082_s1 + $0x78] sm:$0xff] %v6611_v27 }
 0xac1   : > { %v5052_v10 = vpop.eup %5051  ;;  %3801 = vadd.xlane.f32.xlu0 %v3774_v30  ;;  %v3487_v34 = vsub.f32 0.0, %v6611_v27  ;;  %5067 = vpow2.f32 %v3562_v9  ;;  %v3496_v51 = vmax.f32 %v3480_v24, 0.0  ;;  %vm3647_vm8 = vcmp.lt.f32.partialorder %v3646_v54, 0.0004427343 }
 0xac2   : > { %v3392_v49 = vsel %vm6603_vm7, %v3389_v6, %v3386_v60  ;;  %v3642_v16 = vmul.f32 0.6931472, %v5052_v10  ;;  %v3397_v47 = vadd.f32 1.0, %v3396_v43  ;;  %v3399_v63 = vand.u32 2147483647, %v6563_v15 }
 0xac3   : > { %v5054_v33 = vpop.eup %5053  ;;  %v3464_v41 = vadd.f32 %v3392_v49, %v3240_v8  ;;  %v3279_v59 = vsub.f32 0.0, %v3263_v18  ;;  %v3519_v48 = vand.u32 2147483647, %v3487_v34  ;;  %v3653_v56 = vadd.f32 1.0, %v3652_v13 }
 0xac4   : > { %v6625_v46 = vpop.eup %5055  ;;  %v3648_v40 = vsel %vm3647_vm8, %v3645_v31, %v3642_v16  ;;  %v3395_v4 = vmul.f32 0.6931472, %v5054_v33  ;;  %v3655_v58 = vand.u32 2147483647, %v6590_v52  ;;  %v3241_v45 = vmax.f32 %v6440_v50, 0.0 }
 0xac5   : > { %v6628_v7 = vpop.eup %5057  ;;  %v3720_v2 = vadd.f32 %v3648_v40, %v3496_v51  ;;  %v3676_v19 = vadd.f32 1.0, %v6625_v46  ;;  %v3398_v57 = vmul.f32 %v6563_v15, %v3397_v47  ;;  %vm6637_vm9 = vcmp.lt.f32.partialorder %v3399_v63, 0.0004427343 }
 0xac6   : > { %v3438_v24 = vadd.f32 1.0, %v6628_v7  ;;  %v3310_v26 = vmul.f32 1.442695, %v3279_v59  ;;  %v3535_v42 = vsub.f32 0.0, %v3519_v48  ;;  %v3497_v29 = vmax.f32 %v3481_v25, 0.0 }
 0xac7   : > { %v3736_v23 = vadd.f32 %v3720_v2, %v3464_v41  ;;  %5069 = vlog2.f32 %v3676_v19  ;;  %v3401_v44 = vsel %vm6637_vm9, %v3398_v57, %v3395_v4  ;;  %v3654_v15 = vmul.f32 %v6590_v52, %v3653_v56 }
 0xac8   : > { %5071 = vlog2.f32 %v3438_v24  ;;  %vm3656_vm10 = vcmp.lt.f32.partialorder %v3655_v58, 0.0004427343  ;;  %v3423_v8 = vmul.f32 -0.5, %v6597_v0  ;;  %v3566_v39 = vmul.f32 1.442695, %v3535_v42 }
 0xac9   : > { %v5060_v12 = vpop.eup %5059  ;;  %v3752_v3 = vsub.f32 0.0, %v3736_v23  ;;  %5073 = vpow2.f32 %v3310_v26  ;;  %v3465_v37 = vadd.f32 %v3401_v44, %v3241_v45  ;;  %v3679_v25 = vmul.f32 -0.5, %v6625_v46 }
 0xaca   : > { %v6641_v32 = vpop.eup %5061  ;;  %v3651_v55 = vmul.f32 0.6931472, %v5060_v12  ;;  %v3424_v54 = vadd.f32 1.0, %v3423_v8  ;;  %v3426_v43 = vand.u32 2147483647, %v6597_v0  ;;  %v3441_v30 = vmul.f32 -0.5, %v6628_v7 }
 0xacb   : > { %v3771_v14 = vsel %vm3760_vm5, %v3752_v3, 0.0  ;;  %v3694_v61 = vadd.f32 1.0, %v6641_v32  ;;  %v3680_v10 = vadd.f32 1.0, %v3679_v25  ;;  %v3682_v18 = vand.u32 2147483647, %v6625_v46 }
 0xacc   : > { %3795 = vadd.xlane.f32.xlu1 %v3771_v14  ;;  %v3657_v11 = vsel %vm3656_vm10, %v3654_v15, %v3651_v55  ;;  %v6652_v38 = vpop.eup %5063  ;;  %v3425_v16 = vmul.f32 %v6597_v0, %v3424_v54  ;;  %v3697_v13 = vmul.f32 -0.5, %v6641_v32  ;;  %vm3427_vm11 = vcmp.lt.f32.partialorder %v3426_v43, 0.0004427343 }
 0xacd   : > { %v3721_v50 = vadd.f32 %v3657_v11, %v3497_v29  ;;  %5075 = vlog2.f32 %v3694_v61  ;;  %v5066_v52 = vpop.eup %5065  ;;  %v3429_v22 = vadd.f32 1.0, %v6652_v38  ;;  %v3681_v47 = vmul.f32 %v6625_v46, %v3680_v10 }
 0xace   : > { %v6656_v62 = vpop.eup %5067  ;;  %5077 = vpow2.f32 %v3566_v39  ;;  %v3422_v9 = vmul.f32 0.6931472, %v5066_v52  ;;  %v3442_v63 = vadd.f32 1.0, %v3441_v30  ;;  %v3244_v2 = vmax.f32 %v6506_v53, 0.0 }
 0xacf   : > { %v3737_v6 = vadd.f32 %v3721_v50, %v3465_v37  ;;  %5079 = vlog2.f32 %v3429_v22  ;;  %v3685_v31 = vadd.f32 1.0, %v6656_v62  ;;  %v3500_v19 = vmax.f32 %v3484_v1, 0.0 }
 0xad0   : > { %v3428_v41 = vsel %vm3427_vm11, %v3425_v16, %v3422_v9  ;;  %vm3683_vm12 = vcmp.lt.f32.partialorder %v3682_v18, 0.0004427343  ;;  %v3444_v0 = vand.u32 2147483647, %v6628_v7  ;;  %v3698_v4 = vadd.f32 1.0, %v3697_v13 }
 0xad1   : > { %v3753_v60 = vsub.f32 0.0, %v3737_v6  ;;  %5081 = vlog2.f32 %v3685_v31  ;;  %v3432_v56 = vmul.f32 -0.5, %v6652_v38  ;;  %v3468_v24 = vadd.f32 %v3428_v41, %v3244_v2 }
 0xad2   : > { %v3700_v58 = vand.u32 2147483647, %v6641_v32  ;;  %v3246_v46 = vmax.f32 %v6510_v36, 0.0  ;;  %v3443_v57 = vmul.f32 %v6628_v7, %v3442_v63  ;;  %v3688_v53 = vmul.f32 -0.5, %v6656_v62 }
 0xad3   : > { %v3772_v49 = vsel %vm3760_vm5, %v3753_v60, 0.0  ;;  %vm6676_vm13 = vcmp.lt.f32.partialorder %v3444_v0, 0.0004427343  ;;  %v3502_v20 = vmax.f32 %v3486_v17, 0.0  ;;  %v3699_v29 = vmul.f32 %v6641_v32, %v3698_v4 }
 0xad4   : > { %v5070_v33 = vpop.eup %5069  ;;  %3797 = vadd.xlane.f32.xlu0 %v3772_v49  ;;  %v3433_v55 = vadd.f32 1.0, %v3432_v56  ;;  %vm3701_vm14 = vcmp.lt.f32.partialorder %v3700_v58, 0.0004427343  ;;  %v3435_v14 = vand.u32 2147483647, %v6652_v38  ;;  %v3689_v11 = vadd.f32 1.0, %v3688_v53 }
 0xad5   : > { %v5072_v51 = vpop.eup %5071  ;;  %v3678_v40 = vmul.f32 0.6931472, %v5070_v33  ;;  %v3691_v36 = vand.u32 2147483647, %v6656_v62  ;;  %v3245_v60 = vmax.f32 %v6581_v21, 0.0  ;;  %v3501_v9 = vmax.f32 %v3485_v28, 0.0 }
 0xad6   : > { %v3440_v48 = vmul.f32 0.6931472, %v5072_v51  ;;  %v5074_v45 = vpop.eup %5073  ;;  %v3434_v32 = vmul.f32 %v6652_v38, %v3433_v55  ;;  %vm3436_vm15 = vcmp.lt.f32.partialorder %v3435_v14, 0.0004427343  ;;  %v3690_v43 = vmul.f32 %v6656_v62, %v3689_v11 }
 0xad7   : > { %v3684_v59 = vsel %vm3683_vm12, %v3681_v47, %v3678_v40  ;;  %v3447_v26 = vadd.f32 1.0, %v5074_v45  ;;  %vm3692_vm0 = vcmp.lt.f32.partialorder %v3691_v36, 0.0004427343  ;;  %v3450_v31 = vmul.f32 -0.5, %v5074_v45 }
 0xad8   : > { %v3724_v23 = vadd.f32 %v3684_v59, %v3500_v19  ;;  %v3446_v42 = vsel %vm6676_vm13, %v3443_v57, %v3440_v48  ;;  %v3453_v62 = vand.u32 2147483647, %v5074_v45  ;;  %v3247_v48 = vmax.f32 %v6611_v27, 0.0  ;;  %v3229_v57 = vpop.xlane.xlu0 %3228 }
 0xad9   : > { %5083 = vlog2.f32 %v3447_v26  ;;  %v3470_v37 = vadd.f32 %v3446_v42, %v3246_v46  ;;  %v3451_v33 = vadd.f32 1.0, %v3450_v31  ;;  %v3503_v4 = vmax.f32 %v3487_v34, 0.0 }
 0xada   : > { %v5076_v1 = vpop.eup %5075  ;;  %v3740_v12 = vadd.f32 %v3724_v23, %v3468_v24  ;;  %vm3454_vm1 = vcmp.lt.f32.partialorder %v3453_v62, 0.0004427343  ;;  %v6704_v53 = vrot.slane %v3229_v57, %v5574_v5 }
 0xadb   : > { %v3696_v44 = vmul.f32 0.6931472, %v5076_v1  ;;  %v5078_v7 = vpop.eup %5077  ;;  %v3452_v63 = vmul.f32 %v5074_v45, %v3451_v33 }
 0xadc   : > { %v3756_v15 = vsub.f32 0.0, %v3740_v12  ;;  %v5080_v8 = vpop.eup %5079  ;;  %v3703_v17 = vadd.f32 1.0, %v5078_v7  ;;  %v3706_v16 = vmul.f32 -0.5, %v5078_v7  ;;  %v3709_v47 = vand.u32 2147483647, %v5078_v7 }
 0xadd   : > { %v3702_v61 = vsel %vm3701_vm14, %v3699_v29, %v3696_v44  ;;  %v3431_v25 = vmul.f32 0.6931472, %v5080_v8 }
 0xade   : > { %v3775_v39 = vsel %vm3760_vm5, %v3756_v15, 0.0  ;;  %v3726_v50 = vadd.f32 %v3702_v61, %v3502_v20  ;;  %5085 = vlog2.f32 %v3703_v17  ;;  %v5082_v52 = vpop.eup %5081  ;;  %v3707_v40 = vadd.f32 1.0, %v3706_v16 }
 0xadf   : > { %3803 = vadd.xlane.f32.xlu1 %v3775_v39  ;;  %v3437_v6 = vsel %vm3436_vm15, %v3434_v32, %v3431_v25  ;;  %v3687_v54 = vmul.f32 0.6931472, %v5082_v52  ;;  %vm3710_vm2 = vcmp.lt.f32.partialorder %v3709_v47, 0.0004427343 }
 0xae0   : > { %v3742_v22 = vadd.f32 %v3726_v50, %v3470_v37  ;;  %v3469_v18 = vadd.f32 %v3437_v6, %v3245_v60  ;;  %v3708_v59 = vmul.f32 %v5078_v7, %v3707_v40 }
 0xae1   : > { %v3693_v10 = vsel %vm3692_vm0, %v3690_v43, %v3687_v54 }
 0xae2   : > { %v3758_v30 = vsub.f32 0.0, %v3742_v22  ;;  %v3725_v49 = vadd.f32 %v3693_v10, %v3501_v9 }
 0xae4   : > { %v3777_v38 = vsel %vm3760_vm5, %v3758_v30, 0.0  ;;  %v3741_v13 = vadd.f32 %v3725_v49, %v3469_v18 }
 0xae5   : > { %3807 = vadd.xlane.f32.xlu1 %v3777_v38 }
 0xae6   : > { %v3757_v51 = vsub.f32 0.0, %v3741_v13  ;;  %v5084_v41 = vpop.eup %5083 }
 0xae7   : > { %v3449_v28 = vmul.f32 0.6931472, %v5084_v41 }
 0xae8   : > { %v3776_v21 = vsel %vm3760_vm5, %v3757_v51, 0.0 }
 0xae9   : > { %3805 = vadd.xlane.f32.xlu0 %v3776_v21  ;;  %v3455_v19 = vsel %vm3454_vm1, %v3452_v63, %v3449_v28 }
 0xaea   : > { %v3471_v24 = vadd.f32 %v3455_v19, %v3247_v48 }
 0xaeb   : > { %v5086_v2 = vpop.eup %5085 }
 0xaec   : > { %v3705_v0 = vmul.f32 0.6931472, %v5086_v2 }
 0xaee   : > { %v3711_v56 = vsel %vm3710_vm2, %v3708_v59, %v3705_v0 }
 0xaef   : > { %v3727_v23 = vadd.f32 %v3711_v56, %v3503_v4 }
 0xaf1   : > { %v3743_v58 = vadd.f32 %v3727_v23, %v3471_v24 }
 0xaf3   : > { %v3759_v45 = vsub.f32 0.0, %v3743_v58 }
 0xaf5   : > { %v3778_v46 = vsel %vm3760_vm5, %v3759_v45, 0.0 }
 0xaf6   : > { %3809 = vadd.xlane.f32.xlu0 %v3778_v46 }
 0xb05   : > { %v3784_v27 = vpop.xlane.xlu1 %3783 }
 0xb06   : > { %v3817_v34 = vadd.f32 %v6704_v53, %v3784_v27 }
 0xb08   : > { %3849 = vst [vmem:[%s6717_s27 + $0x10] sm:$0xff] %v3817_v34  ;;  %v3780_v5 = vpop.xlane.xlu0 %3779 }
 0xb09   : > { %v3815_v35 = vadd.f32 %v6704_v53, %v3780_v5 }
 0xb0a   : > { %5250 = shalt.err (!%p5247_p13)
}
 0xb0b   : > { %s5251_s12 = scalar_lea.hbm %s6713_s24, 2048  ;;  %s5255_s21 = scalar_lea.hbm %s6839_s9, 4096 }
 0xb0c   : > { %p5252_p10 = scmp.ne.s32.totalorder %s6713_s24, %s5251_s12  ;;  %p5256_p0 = scmp.lt.s32.totalorder %s6713_s24, %s6839_s9 }
 0xb0d   : > { %p5257_p9 = scmp.lt.s32.totalorder %s5255_s21, %s5251_s12 }
 0xb0e   : > { %p5253_p4 = pnand %p5252_p10, %p6902_p2 }
 0xb0f   : > { %p5258_p1 = por %p5257_p9, %p5256_p0 }
 0xb10   : > { %p5254_p11 = pneg %p5253_p4 }
 0xb12   : > { %p5259_p12 = pnand %p5258_p1, %p5254_p11 }
 0xb14   : > { %5262 = shalt.err (!%p5259_p12)
}
 0xb15   : > { %s5351_s18 = smov 128   ;;  %s5352_s22 = smov 8   ;;  %3847 = vst [vmem:[%s6717_s27] sm:$0xff] %v3815_v35  ;;  %v3782_v1 = vpop.xlane.xlu1 %3781 }
 0xb16   : > { %4781 = dma.vmem_to_hbm [thread:$0]  (%p6902_p2), %s6720_s23, 2048, %s6713_s24, %s3864_s26, %s5351_s18, %s5351_s18, %s5352_s22   ;;  %v3816_v12 = vadd.f32 %v6704_v53, %v3782_v1 }
 0xb17   : > { %v3786_v3 = vpop.xlane.xlu0 %3785  ;;  %s3898_s24 = sshll.u32 %s6717_s27, 4  ;;  %s6783_s6 = scalar_lea.hbm %s6840_s10, %s4185_s19  ;;  %s6785_s24 = int_to_ptr.vmem [resolvable:$true] %s3898_s24 }
 0xb18   : > { %3848 = vst [vmem:[%s6717_s27 + $0x8] sm:$0xff] %v3816_v12  ;;  %v3818_v20 = vadd.f32 %v6704_v53, %v3786_v3  ;;  %s3869_s12 = scalar_lea.sflag [#allocation13], %s5552_s4  ;;  %s5263_s11 = scalar_lea.vmem %s6785_s24, 2048 }
 0xb19   : > { %p5264_p3 = scmp.ne.s32.totalorder %s6785_s24, %s5263_s11  ;;  %s5353_s1 = smov [#allocation12]  }
 0xb1a   : > { %3850 = vst [vmem:[%s6717_s27 + $0x18] sm:$0xff] %v3818_v20  ;;  %s5267_s21 = sshll.u32 %s5353_s1, 4  ;;  %s5268_s21 = int_to_ptr.vmem [resolvable:$false] %s5267_s21 }
 0xb1b   : > { %p5265_p5 = pnand %p5264_p3, %p6902_p2  ;;  %s5269_s17 = scalar_lea.vmem %s5268_s21, 4096 }
 0xb1c   : > { %p5270_p8 = scmp.lt.s32.totalorder %s6785_s24, %s5268_s21  ;;  %p5271_p7 = scmp.lt.s32.totalorder %s5269_s17, %s5263_s11 }
 0xb1d   : > { %p5266_p6 = pneg %p5265_p5 }
 0xb1e   : > { %p5272_p13 = por %p5271_p7, %p5270_p8 }
 0xb20   : > { %v3792_v26 = vpop.xlane.xlu1 %3791  ;;  %p5273_p10 = pnand %p5272_p13, %p5266_p6 }
 0xb21   : > { %v3821_v42 = vadd.f32 %v6704_v53, %v3792_v26 }
 0xb23   : > { %3853 = vst [vmem:[%s6717_s27 + $0x30] sm:$0xff] %v3821_v42 }
 0xb28   : > { %v3794_v44 = vpop.xlane.xlu0 %3793 }
 0xb29   : > { %v3822_v29 = vadd.f32 %v6704_v53, %v3794_v44 }
 0xb2b   : > { %3854 = vst [vmem:[%s6717_s27 + $0x38] sm:$0xff] %v3822_v29 }
 0xb31   : > { %v3788_v55 = vpop.xlane.xlu1 %3787 }
 0xb32   : > { %v3819_v7 = vadd.f32 %v6704_v53, %v3788_v55 }
 0xb34   : > { %3851 = vst [vmem:[%s6717_s27 + $0x20] sm:$0xff] %v3819_v7 }
 0xb3b   : > { %v3790_v15 = vpop.xlane.xlu0 %3789 }
 0xb3c   : > { %v3820_v14 = vadd.f32 %v6704_v53, %v3790_v15 }
 0xb3e   : > { %3852 = vst [vmem:[%s6717_s27 + $0x28] sm:$0xff] %v3820_v14 }
 0xb3f   : > { %v3800_v8 = vpop.xlane.xlu1 %3799 }
 0xb40   : > { %v3825_v61 = vadd.f32 %v6704_v53, %v3800_v8 }
 0xb42   : > { %3857 = vst [vmem:[%s6717_s27 + $0x50] sm:$0xff] %v3825_v61 }
 0xb4a   : > { %v3802_v11 = vpop.xlane.xlu0 %3801 }
 0xb4b   : > { %v3826_v36 = vadd.f32 %v6704_v53, %v3802_v11 }
 0xb4d   : > { %3858 = vst [vmem:[%s6717_s27 + $0x58] sm:$0xff] %v3826_v36 }
 0xb55   : > { %v3796_v17 = vpop.xlane.xlu1 %3795 }
 0xb56   : > { %v3823_v39 = vadd.f32 %v6704_v53, %v3796_v17 }
 0xb58   : > { %3855 = vst [vmem:[%s6717_s27 + $0x40] sm:$0xff] %v3823_v39 }
 0xb5d   : > { %v3798_v37 = vpop.xlane.xlu0 %3797 }
 0xb5e   : > { %v3824_v50 = vadd.f32 %v6704_v53, %v3798_v37 }
 0xb60   : > { %3856 = vst [vmem:[%s6717_s27 + $0x48] sm:$0xff] %v3824_v50 }
 0xb68   : > { %v3804_v25 = vpop.xlane.xlu1 %3803 }
 0xb69   : > { %v3827_v32 = vadd.f32 %v6704_v53, %v3804_v25 }
 0xb6b   : > { %3859 = vst [vmem:[%s6717_s27 + $0x60] sm:$0xff] %v3827_v32 }
 0xb6e   : > { %v3808_v52 = vpop.xlane.xlu1 %3807 }
 0xb6f   : > { %v3829_v22 = vadd.f32 %v6704_v53, %v3808_v52 }
 0xb71   : > { %3861 = vst [vmem:[%s6717_s27 + $0x70] sm:$0xff] %v3829_v22 }
 0xb72   : > { %v3806_v6 = vpop.xlane.xlu0 %3805 }
 0xb73   : > { %v3828_v54 = vadd.f32 %v6704_v53, %v3806_v6 }
 0xb75   : > { %3860 = vst [vmem:[%s6717_s27 + $0x68] sm:$0xff] %v3828_v54 }
 0xb7f   : > { %v3810_v43 = vpop.xlane.xlu0 %3809 }
 0xb80   : > { %v3830_v30 = vadd.f32 %v6704_v53, %v3810_v43 }
 0xb82   : > { %3862 = vst [vmem:[%s6717_s27 + $0x78] sm:$0xff] %v3830_v30 }
 0xb83   : > { %5276 = shalt.err (!%p5273_p10)
}
 0xb84   : > { %s5277_s19 = scalar_lea.hbm %s6783_s6, 2048  ;;  %s5281_s25 = scalar_lea.hbm %s6840_s10, 4096 }
 0xb85   : > { %p5278_p4 = scmp.ne.s32.totalorder %s6783_s6, %s5277_s19  ;;  %p5282_p9 = scmp.lt.s32.totalorder %s6783_s6, %s6840_s10 }
 0xb86   : > { %p5283_p1 = scmp.lt.s32.totalorder %s5281_s25, %s5277_s19 }
 0xb87   : > { %p5279_p11 = pnand %p5278_p4, %p6902_p2 }
 0xb88   : > { %p5284_p12 = por %p5283_p1, %p5282_p9 }
 0xb89   : > { %p5280_p0 = pneg %p5279_p11 }
 0xb8b   : > { %p5285_p3 = pnand %p5284_p12, %p5280_p0 }
 0xb8d   : > { %5288 = shalt.err (!%p5285_p3)
}
 0xb8e   : > { %4782 = dma.vmem_to_hbm [thread:$0]  (%p6902_p2), %s6785_s24, 2048, %s6783_s6, %s3869_s12, %s5351_s18, %s5351_s18, %s5352_s22  }
 0xb8f PF: > { %s3913_s26 = sand.u32 1, %s5327_s13   ;;  %p6903_p5 = scmp.ne.s32.totalorder %s6850_s20, 0 }
 0xb90   : > { %p6904_p6 = scmp.ge.s32.totalorder %s5339_s16, 2  ;;  %s3914_s11 = scalar_lea.sflag [#allocation4], %s3913_s26 }
 0xb92   : > { %p4803_p8 = pnand %p6904_p6, %p6903_p5 }
 0xb94   : > { %p4804_p7 = pneg %p4803_p8 }
 0xb96   : > { %5318 = dma.done.wait (%p4804_p7), %s3914_s11, 2048  }
 0xb97   : > { %5320 = vsyncadd (%p4804_p7), %s3914_s11, 4294965248  ;;  %s3923_s1 = scalar_lea.sflag [#allocation13], %s3913_s26 }
 0xb98   : > { %5322 = dma.done.wait (%p4804_p7), %s3923_s1, 2048  }
 0xb99   : > { %5324 = vsyncadd (%p4804_p7), %s3923_s1, 4294965248  ;;  %p29_p2 = scmp.ge.s32.totalorder %s5497_s28, 4   ;;  %s6905_s13 = smov %s5331_s14 }
 0xb9a   : > { %s6906_s14 = smov %s5335_s15  ;;  %s6907_s15 = smov %s5513_s30 }
 0xb9b   : > { %s6908_s16 = smov %s5497_s28  ;;  %31 = sbr.rel (!%p29_p2) target bundleno = 14 (0xe), region = 152 }
 0xba0   :  { %3928 = vsyncpa [#allocation3], 1 }
 0xba1   :  { %3930 = vsyncpa [#allocation3 + $0x1], 1 }
 0xba2   :  { %3931 = vsyncpa [#allocation6], 1 }
 0xba3   :  { %3932 = vsyncpa [#allocation9], 1 }
 0xba4   :  { %3933 = vsyncpa [#allocation4], 1 }
 0xba5   :  { %3935 = vsyncpa [#allocation4 + $0x1], 1 }
 0xba6   :  { %3936 = vsyncpa [#allocation13], 1 }
 0xba7   :  { %3938 = vsyncpa [#allocation13 + $0x1], 1 }

</bundles_post_ra>
